<compile_context>
chip_gen: v5e
topology: v5e:2x2
jax: 0.10.0
libtpu: 0.0.40
codegen_flags: <defaults>
</compile_context>

<pallas_src>
import math

import jax
import jax.numpy as jnp
from jax.experimental import pallas as pl
from jax.experimental.pallas import tpu as pltpu


# ----------------------------------------------------------------------------
# Fused Pallas kernel: both layers + full time recurrence for one direction.
# ----------------------------------------------------------------------------
def make_contextualizer_kernel(T, L, H, tanh_input):
    def cell_step(x_in, h, c, wx, wh, b):
        # Fused projection; columns [0:H] = content pre-activation,
        # columns [H:4H] = the 3 gates' pre-activations.
        proj = (jnp.dot(x_in, wx, preferred_element_type=jnp.float32)
                + jnp.dot(h, wh, preferred_element_type=jnp.float32)
                + b)
        content = jnp.tanh(proj[:, 0:H])
        gates = jax.nn.sigmoid(proj[:, H:])
        g0 = gates[:, 0:H]
        g1 = gates[:, H:2 * H]
        g2 = gates[:, 2 * H:3 * H]
        c_new = g0 * c + g1 * content          # new_cell_state
        h_new = g2 * jnp.tanh(c_new)           # gates.has_tanh + has_zero_gate
        # output_mask == 1 (dropout p=0), so output == new_hidden_state.
        return h_new, c_new

    def kernel(x_ref, wx_ref, wh_ref, b_ref, h0_ref, c0_ref,
               out_ref, hT_ref, cT_ref):
        d = pl.program_id(0)          # 0 = forward direction, 1 = backward

        # tanh_input hoisted out of the time loop (applies to layer-0 input).
        xt = x_ref[...]
        if tanh_input:
            xt = jnp.tanh(xt)

        wx = [wx_ref[0, l] for l in range(L)]     # (Din, 4H)
        wh = [wh_ref[0, l] for l in range(L)]     # (H,   4H)
        b = [b_ref[0, l] for l in range(L)]       # (1,   4H)

        def run_direction(reverse):
            h = [h0_ref[0, l] for l in range(L)]
            c = [c0_ref[0, l] for l in range(L)]
            for s in range(T):                    # fully unrolled, static idx
                t = T - 1 - s if reverse else s   # in-kernel flip for bwd dir
                layer_in = xt[t]
                for l in range(L):
                    h[l], c[l] = cell_step(layer_in, h[l], c[l],
                                           wx[l], wh[l], b[l])
                    layer_in = h[l]
                # Backward outputs are stored already time-flipped, so the
                # wrapper only needs a lane concat (no jnp.flip pass).
                out_ref[0, t] = h[L - 1]
            for l in range(L):
                hT_ref[0, l] = h[l]
                cT_ref[0, l] = c[l]

        @pl.when(d == 0)
        def _():
            run_direction(reverse=False)

        @pl.when(d == 1)
        def _():
            run_direction(reverse=True)

    return kernel


# ----------------------------------------------------------------------------
# Wrapper: pack weights lane-dense, single pallas_call, unpack results.
# ----------------------------------------------------------------------------
def _fuse_direction_params(layer_params):
    wxs, whs, bs = [], [], []
    for (wcx, wch, bc, wgh, wgx, bg) in layer_params:
        wxs.append(jnp.concatenate([wcx, wgx], axis=1))   # (Din, 4H)
        whs.append(jnp.concatenate([wch, wgh], axis=1))   # (H,   4H)
        bs.append(jnp.concatenate([bc, bg], axis=1))      # (1,   4H)
    return jnp.stack(wxs), jnp.stack(whs), jnp.stack(bs)


def contextualizer_forward(inputs, states, params, *, tanh_input=True):
    """Bidirectional Contextualizer forward with one fused Pallas kernel."""
    T, B, D0 = inputs.shape
    fwd_params, bwd_params = params
    fwd_states, bwd_states = states
    L = len(fwd_params)
    H = fwd_states[0][0].shape[-1]
    assert D0 == H, "fused kernel stacks per-layer weights; requires dims[i]==H"

    wx_f, wh_f, b_f = _fuse_direction_params(fwd_params)
    wx_b, wh_b, b_b = _fuse_direction_params(bwd_params)
    wx = jnp.stack([wx_f, wx_b])       # (2, L, Din, 4H)
    wh = jnp.stack([wh_f, wh_b])       # (2, L, H,   4H)
    b = jnp.stack([b_f, b_b])          # (2, L, 1,   4H)
    h0 = jnp.stack([jnp.stack([s[0] for s in fwd_states]),
                    jnp.stack([s[0] for s in bwd_states])])   # (2, L, B, H)
    c0 = jnp.stack([jnp.stack([s[1] for s in fwd_states]),
                    jnp.stack([s[1] for s in bwd_states])])   # (2, L, B, H)

    kernel = make_contextualizer_kernel(T, L, H, tanh_input)
    grid_spec = pltpu.PrefetchScalarGridSpec(
        num_scalar_prefetch=0,
        grid=(2,),                                             # direction axis
        in_specs=[
            pl.BlockSpec((T, B, D0), lambda d: (0, 0, 0)),            # x (shared)
            pl.BlockSpec((1, L, D0, 4 * H), lambda d: (d, 0, 0, 0)),  # Wx
            pl.BlockSpec((1, L, H, 4 * H), lambda d: (d, 0, 0, 0)),   # Wh
            pl.BlockSpec((1, L, 1, 4 * H), lambda d: (d, 0, 0, 0)),   # b
            pl.BlockSpec((1, L, B, H), lambda d: (d, 0, 0, 0)),       # h0
            pl.BlockSpec((1, L, B, H), lambda d: (d, 0, 0, 0)),       # c0
        ],
        out_specs=[
            pl.BlockSpec((1, T, B, H), lambda d: (d, 0, 0, 0)),       # outputs
            pl.BlockSpec((1, L, B, H), lambda d: (d, 0, 0, 0)),       # h_T
            pl.BlockSpec((1, L, B, H), lambda d: (d, 0, 0, 0)),       # c_T
        ],
    )
    out, hT, cT = pl.pallas_call(
        kernel,
        out_shape=(
            jax.ShapeDtypeStruct((2, T, B, H), jnp.float32),
            jax.ShapeDtypeStruct((2, L, B, H), jnp.float32),
            jax.ShapeDtypeStruct((2, L, B, H), jnp.float32),
        ),
        grid_spec=grid_spec,
        # Independent directions: lets v7x's two TensorCores run them in
        # parallel; no-op on single-TC v5e/v6e.
        compiler_params=pltpu.CompilerParams(
            dimension_semantics=("parallel",)),
    )(inputs, wx, wh, b, h0, c0)

    # Backward outputs were written already time-flipped inside the kernel.
    outputs = jnp.concatenate([out[0], out[1]], axis=-1)      # (T, B, 2H)
    new_fwd = [(hT[0, l], cT[0, l]) for l in range(L)]
    new_bwd = [(hT[1, l], cT[1, l]) for l in range(L)]
    return outputs, (new_fwd, new_bwd)


# ----------------------------------------------------------------------------
# Deterministic parameter init (matches Cell.init_weights: xavier_uniform for
# 2-D params, zeros for 1-D biases).
# ----------------------------------------------------------------------------
def init_cell_params(key, din, h):
    k1, k2 = jax.random.split(key)
    bound_c = math.sqrt(6.0 / ((din + h) + h))
    w_content = jax.random.uniform(k1, (din + h, h), jnp.float32, -bound_c, bound_c)
    bound_g = math.sqrt(6.0 / ((h + din) + 3 * h))
    w_gates = jax.random.uniform(k2, (h + din, 3 * h), jnp.float32, -bound_g, bound_g)
    wcx, wch = w_content[:din], w_content[din:]
    wgh, wgx = w_gates[:h], w_gates[h:]
    bc = jnp.zeros((1, h), jnp.float32)
    bg = jnp.zeros((1, 3 * h), jnp.float32)
    return (wcx, wch, bc, wgh, wgx, bg)


# ----------------------------------------------------------------------------
# Pure-JAX reference (mirrors the PyTorch forward) for correctness checking.
# ----------------------------------------------------------------------------
def ref_layer(x, h0, c0, params, apply_tanh_input):
    wcx, wch, bc, wgh, wgx, bg = params
    H = h0.shape[-1]
    h, c = h0, c0
    outs = []
    for t in range(x.shape[0]):
        xt = jnp.tanh(x[t]) if apply_tanh_input else x[t]
        content = jnp.tanh(xt @ wcx + h @ wch + bc[0])
        gates = jax.nn.sigmoid(h @ wgh + xt @ wgx + bg[0])
        g0, g1, g2 = gates[:, :H], gates[:, H:2 * H], gates[:, 2 * H:]
        c = g0 * c + g1 * content
        h = g2 * jnp.tanh(c)
        outs.append(h)
    return jnp.stack(outs, 0), h, c


def ref_forward(inputs, states, params, *, tanh_input=True):
    def layers(x, sts, prms):
        new_sts = []
        for li, (p, (h0, c0)) in enumerate(zip(prms, sts)):
            x, hT, cT = ref_layer(x, h0, c0, p, tanh_input and li == 0)
            new_sts.append((hT, cT))
        return x, new_sts

    fp, bp = params
    fs, bs = states
    fo, nfs = layers(inputs, fs, fp)
    bo, nbs = layers(jnp.flip(inputs, 0), bs, bp)
    return jnp.concatenate([fo, jnp.flip(bo, 0)], -1), (nfs, nbs)


if __name__ == "__main__":
    # Small shapes: T=8 time steps, B=2 batch, dims = [32, 32, 32] (2 layers).
    T, B = 8, 2
    dims = [32, 32, 32]
    tanh_input = True

    key = jax.random.PRNGKey(0)
    k_in, k_fwd, k_bwd = jax.random.split(key, 3)

    inputs = jax.random.normal(k_in, (T, B, dims[0]), jnp.float32)

    def make_direction_params(k):
        ks = jax.random.split(k, len(dims) - 1)
        return [init_cell_params(ks[i], dims[i], dims[i + 1])
                for i in range(len(dims) - 1)]

    fwd_params = make_direction_params(k_fwd)
    bwd_params = make_direction_params(k_bwd)
    params = (fwd_params, bwd_params)

    # init_hidden: zeros (dual state) per layer, per direction.
    def zero_states():
        return [(jnp.zeros((B, d), jnp.float32), jnp.zeros((B, d), jnp.float32))
                for d in dims[1:]]
    states = (zero_states(), zero_states())

    outputs, new_states = contextualizer_forward(
        inputs, states, params, tanh_input=tanh_input)
    outputs = jax.block_until_ready(outputs)

    # Correctness check against pure-JAX reference.
    ref_out, ref_states = ref_forward(inputs, states, params, tanh_input=tanh_input)
    assert outputs.shape == (T, B, 2 * dims[-1]), outputs.shape
    assert jnp.allclose(outputs, ref_out, atol=1e-5, rtol=1e-5)
    for (ph, pc), (rh, rc) in zip(new_states[0] + new_states[1],
                                  ref_states[0] + ref_states[1]):
        assert jnp.allclose(ph, rh, atol=1e-5, rtol=1e-5)
        assert jnp.allclose(pc, rc, atol=1e-5, rtol=1e-5)

    print("KERNEL_OK")
</pallas_src>

<mosaic_0001>
module attributes {stable_mosaic.version = 11 : i64} {
  func.func @kernel(%arg0: i32, %arg1: memref<8x2x32xf32, #tpu.memory_space<vmem>>, %arg2: memref<1x2x32x128xf32, #tpu.memory_space<vmem>>, %arg3: memref<1x2x32x128xf32, #tpu.memory_space<vmem>>, %arg4: memref<1x2x1x128xf32, #tpu.memory_space<vmem>>, %arg5: memref<1x2x2x32xf32, #tpu.memory_space<vmem>>, %arg6: memref<1x2x2x32xf32, #tpu.memory_space<vmem>>, %arg7: memref<1x8x2x32xf32, #tpu.memory_space<vmem>>, %arg8: memref<1x2x2x32xf32, #tpu.memory_space<vmem>>, %arg9: memref<1x2x2x32xf32, #tpu.memory_space<vmem>>) attributes {dimension_semantics = [#tpu.dimension_semantics<parallel>], iteration_bounds = array<i64: 2>, scalar_prefetch = 0 : i64, scratch_operands = 0 : i64, tpu.core_type = #tpu.core_type<tc>, window_params = [{pipeline_mode = #tpu.pipeline_mode<synchronous>, transform_indices = @transform_0, window_bounds = array<i64: 8, 2, 32>}, {transform_indices = @transform_1, window_bounds = array<i64: 1, 2, 32, 128>}, {transform_indices = @transform_2, window_bounds = array<i64: 1, 2, 32, 128>}, {transform_indices = @transform_3, window_bounds = array<i64: 1, 2, 1, 128>}, {transform_indices = @transform_4, window_bounds = array<i64: 1, 2, 2, 32>}, {transform_indices = @transform_5, window_bounds = array<i64: 1, 2, 2, 32>}, {transform_indices = @transform_6, window_bounds = array<i64: 1, 8, 2, 32>}, {transform_indices = @transform_7, window_bounds = array<i64: 1, 2, 2, 32>}, {transform_indices = @transform_8, window_bounds = array<i64: 1, 2, 2, 32>}]} {
    %c0 = arith.constant 0 : index
    %c0_0 = arith.constant 0 : index
    %c0_1 = arith.constant 0 : index
    %0 = vector.load %arg1[%c0, %c0_0, %c0_1] : memref<8x2x32xf32, #tpu.memory_space<vmem>>, vector<8x2x32xf32>
    %1 = math.tanh %0 : vector<8x2x32xf32>
    %c0_2 = arith.constant 0 : index
    %c0_3 = arith.constant 0 : index
    %c0_4 = arith.constant 0 : index
    %c0_5 = arith.constant 0 : index
    %2 = vector.load %arg2[%c0_2, %c0_3, %c0_4, %c0_5] : memref<1x2x32x128xf32, #tpu.memory_space<vmem>>, vector<1x1x32x128xf32>
    %3 = vector.shape_cast %2 : vector<1x1x32x128xf32> to vector<32x128xf32>
    %c0_6 = arith.constant 0 : index
    %c1 = arith.constant 1 : index
    %c0_7 = arith.constant 0 : index
    %c0_8 = arith.constant 0 : index
    %4 = vector.load %arg2[%c0_6, %c1, %c0_7, %c0_8] : memref<1x2x32x128xf32, #tpu.memory_space<vmem>>, vector<1x1x32x128xf32>
    %5 = vector.shape_cast %4 : vector<1x1x32x128xf32> to vector<32x128xf32>
    %c0_9 = arith.constant 0 : index
    %c0_10 = arith.constant 0 : index
    %c0_11 = arith.constant 0 : index
    %c0_12 = arith.constant 0 : index
    %6 = vector.load %arg3[%c0_9, %c0_10, %c0_11, %c0_12] : memref<1x2x32x128xf32, #tpu.memory_space<vmem>>, vector<1x1x32x128xf32>
    %7 = vector.shape_cast %6 : vector<1x1x32x128xf32> to vector<32x128xf32>
    %c0_13 = arith.constant 0 : index
    %c1_14 = arith.constant 1 : index
    %c0_15 = arith.constant 0 : index
    %c0_16 = arith.constant 0 : index
    %8 = vector.load %arg3[%c0_13, %c1_14, %c0_15, %c0_16] : memref<1x2x32x128xf32, #tpu.memory_space<vmem>>, vector<1x1x32x128xf32>
    %9 = vector.shape_cast %8 : vector<1x1x32x128xf32> to vector<32x128xf32>
    %c0_17 = arith.constant 0 : index
    %c0_18 = arith.constant 0 : index
    %c0_19 = arith.constant 0 : index
    %c0_20 = arith.constant 0 : index
    %10 = vector.load %arg4[%c0_17, %c0_18, %c0_19, %c0_20] : memref<1x2x1x128xf32, #tpu.memory_space<vmem>>, vector<1x1x1x128xf32>
    %11 = vector.shape_cast %10 : vector<1x1x1x128xf32> to vector<1x128xf32>
    %c0_21 = arith.constant 0 : index
    %c1_22 = arith.constant 1 : index
    %c0_23 = arith.constant 0 : index
    %c0_24 = arith.constant 0 : index
    %12 = vector.load %arg4[%c0_21, %c1_22, %c0_23, %c0_24] : memref<1x2x1x128xf32, #tpu.memory_space<vmem>>, vector<1x1x1x128xf32>
    %13 = vector.shape_cast %12 : vector<1x1x1x128xf32> to vector<1x128xf32>
    %c0_i32 = arith.constant 0 : i32
    %14 = arith.cmpi eq, %arg0, %c0_i32 : i32
    %15 = arith.extui %14 : i1 to i32
    %c0_i32_25 = arith.constant 0 : i32
    %16 = arith.cmpi ne, %15, %c0_i32_25 : i32
    scf.if %16 {
      %c0_27 = arith.constant 0 : index
      %c0_28 = arith.constant 0 : index
      %c0_29 = arith.constant 0 : index
      %c0_30 = arith.constant 0 : index
      %20 = vector.load %arg5[%c0_27, %c0_28, %c0_29, %c0_30] : memref<1x2x2x32xf32, #tpu.memory_space<vmem>>, vector<1x1x2x32xf32>
      %21 = vector.shape_cast %20 : vector<1x1x2x32xf32> to vector<2x32xf32>
      %c0_31 = arith.constant 0 : index
      %c1_32 = arith.constant 1 : index
      %c0_33 = arith.constant 0 : index
      %c0_34 = arith.constant 0 : index
      %22 = vector.load %arg5[%c0_31, %c1_32, %c0_33, %c0_34] : memref<1x2x2x32xf32, #tpu.memory_space<vmem>>, vector<1x1x2x32xf32>
      %23 = vector.shape_cast %22 : vector<1x1x2x32xf32> to vector<2x32xf32>
      %c0_35 = arith.constant 0 : index
      %c0_36 = arith.constant 0 : index
      %c0_37 = arith.constant 0 : index
      %c0_38 = arith.constant 0 : index
      %24 = vector.load %arg6[%c0_35, %c0_36, %c0_37, %c0_38] : memref<1x2x2x32xf32, #tpu.memory_space<vmem>>, vector<1x1x2x32xf32>
      %25 = vector.shape_cast %24 : vector<1x1x2x32xf32> to vector<2x32xf32>
      %c0_39 = arith.constant 0 : index
      %c1_40 = arith.constant 1 : index
      %c0_41 = arith.constant 0 : index
      %c0_42 = arith.constant 0 : index
      %26 = vector.load %arg6[%c0_39, %c1_40, %c0_41, %c0_42] : memref<1x2x2x32xf32, #tpu.memory_space<vmem>>, vector<1x1x2x32xf32>
      %27 = vector.shape_cast %26 : vector<1x1x2x32xf32> to vector<2x32xf32>
      %28 = vector.extract_strided_slice %1 {offsets = [0, 0, 0], sizes = [1, 2, 32], strides = [1, 1, 1]} : vector<8x2x32xf32> to vector<1x2x32xf32>
      %29 = vector.shape_cast %28 : vector<1x2x32xf32> to vector<2x32xf32>
      %cst = arith.constant dense<0.000000e+00> : vector<2x128xf32>
      %30 = tpu.matmul %29, %3, %cst {dimension_numbers = #tpu.dot_dimension_numbers<[1], [0], [0], [1], [0, 0, 1, 1], [], []>} : vector<2x32xf32>, vector<32x128xf32>, vector<2x128xf32> -> vector<2x128xf32>
      %cst_43 = arith.constant dense<0.000000e+00> : vector<2x128xf32>
      %31 = tpu.matmul %21, %7, %cst_43 {dimension_numbers = #tpu.dot_dimension_numbers<[1], [0], [0], [1], [0, 0, 1, 1], [], []>} : vector<2x32xf32>, vector<32x128xf32>, vector<2x128xf32> -> vector<2x128xf32>
      %32 = arith.addf %30, %31 : vector<2x128xf32>
      %33 = vector.broadcast %11 : vector<1x128xf32> to vector<2x128xf32>
      %34 = arith.addf %32, %33 : vector<2x128xf32>
      %35 = vector.extract_strided_slice %34 {offsets = [0, 0], sizes = [2, 32], strides = [1, 1]} : vector<2x128xf32> to vector<2x32xf32>
      %36 = math.tanh %35 : vector<2x32xf32>
      %37 = vector.extract_strided_slice %34 {offsets = [0, 32], sizes = [2, 96], strides = [1, 1]} : vector<2x128xf32> to vector<2x96xf32>
      %38 = arith.negf %37 : vector<2x96xf32>
      %39 = math.exp %38 : vector<2x96xf32>
      %cst_44 = arith.constant 1.000000e+00 : f32
      %40 = vector.broadcast %cst_44 : f32 to vector<2x96xf32>
      %41 = arith.addf %40, %39 : vector<2x96xf32>
      %42 = arith.divf %40, %41 : vector<2x96xf32>
      %43 = vector.extract_strided_slice %42 {offsets = [0, 0], sizes = [2, 32], strides = [1, 1]} : vector<2x96xf32> to vector<2x32xf32>
      %44 = vector.extract_strided_slice %42 {offsets = [0, 32], sizes = [2, 32], strides = [1, 1]} : vector<2x96xf32> to vector<2x32xf32>
      %45 = vector.extract_strided_slice %42 {offsets = [0, 64], sizes = [2, 32], strides = [1, 1]} : vector<2x96xf32> to vector<2x32xf32>
      %46 = arith.mulf %43, %25 : vector<2x32xf32>
      %47 = arith.mulf %44, %36 : vector<2x32xf32>
      %48 = arith.addf %46, %47 : vector<2x32xf32>
      %49 = math.tanh %48 : vector<2x32xf32>
      %50 = arith.mulf %45, %49 : vector<2x32xf32>
      %cst_45 = arith.constant dense<0.000000e+00> : vector<2x128xf32>
      %51 = tpu.matmul %50, %5, %cst_45 {dimension_numbers = #tpu.dot_dimension_numbers<[1], [0], [0], [1], [0, 0, 1, 1], [], []>} : vector<2x32xf32>, vector<32x128xf32>, vector<2x128xf32> -> vector<2x128xf32>
      %cst_46 = arith.constant dense<0.000000e+00> : vector<2x128xf32>
      %52 = tpu.matmul %23, %9, %cst_46 {dimension_numbers = #tpu.dot_dimension_numbers<[1], [0], [0], [1], [0, 0, 1, 1], [], []>} : vector<2x32xf32>, vector<32x128xf32>, vector<2x128xf32> -> vector<2x128xf32>
      %53 = arith.addf %51, %52 : vector<2x128xf32>
      %54 = vector.broadcast %13 : vector<1x128xf32> to vector<2x128xf32>
      %55 = arith.addf %53, %54 : vector<2x128xf32>
      %56 = vector.extract_strided_slice %55 {offsets = [0, 0], sizes = [2, 32], strides = [1, 1]} : vector<2x128xf32> to vector<2x32xf32>
      %57 = math.tanh %56 : vector<2x32xf32>
      %58 = vector.extract_strided_slice %55 {offsets = [0, 32], sizes = [2, 96], strides = [1, 1]} : vector<2x128xf32> to vector<2x96xf32>
      %59 = arith.negf %58 : vector<2x96xf32>
      %60 = math.exp %59 : vector<2x96xf32>
      %cst_47 = arith.constant 1.000000e+00 : f32
      %61 = vector.broadcast %cst_47 : f32 to vector<2x96xf32>
      %62 = arith.addf %61, %60 : vector<2x96xf32>
      %63 = arith.divf %61, %62 : vector<2x96xf32>
      %64 = vector.extract_strided_slice %63 {offsets = [0, 0], sizes = [2, 32], strides = [1, 1]} : vector<2x96xf32> to vector<2x32xf32>
      %65 = vector.extract_strided_slice %63 {offsets = [0, 32], sizes = [2, 32], strides = [1, 1]} : vector<2x96xf32> to vector<2x32xf32>
      %66 = vector.extract_strided_slice %63 {offsets = [0, 64], sizes = [2, 32], strides = [1, 1]} : vector<2x96xf32> to vector<2x32xf32>
      %67 = arith.mulf %64, %27 : vector<2x32xf32>
      %68 = arith.mulf %65, %57 : vector<2x32xf32>
      %69 = arith.addf %67, %68 : vector<2x32xf32>
      %70 = math.tanh %69 : vector<2x32xf32>
      %71 = arith.mulf %66, %70 : vector<2x32xf32>
      %c0_48 = arith.constant 0 : index
      %c0_49 = arith.constant 0 : index
      %c0_50 = arith.constant 0 : index
      %c0_51 = arith.constant 0 : index
      %72 = vector.load %arg7[%c0_48, %c0_49, %c0_50, %c0_51] : memref<1x8x2x32xf32, #tpu.memory_space<vmem>>, vector<1x1x2x32xf32>
      %73 = vector.shape_cast %72 : vector<1x1x2x32xf32> to vector<2x32xf32>
      %74 = vector.shape_cast %71 : vector<2x32xf32> to vector<1x1x2x32xf32>
      tpu.vector_store %arg7[%c0_48, %c0_49, %c0_50, %c0_51], %74 {strides = array<i32>} : memref<1x8x2x32xf32, #tpu.memory_space<vmem>>, vector<1x1x2x32xf32>,
      %75 = vector.extract_strided_slice %1 {offsets = [1, 0, 0], sizes = [1, 2, 32], strides = [1, 1, 1]} : vector<8x2x32xf32> to vector<1x2x32xf32>
      %76 = vector.shape_cast %75 : vector<1x2x32xf32> to vector<2x32xf32>
      %cst_52 = arith.constant dense<0.000000e+00> : vector<2x128xf32>
      %77 = tpu.matmul %76, %3, %cst_52 {dimension_numbers = #tpu.dot_dimension_numbers<[1], [0], [0], [1], [0, 0, 1, 1], [], []>} : vector<2x32xf32>, vector<32x128xf32>, vector<2x128xf32> -> vector<2x128xf32>
      %cst_53 = arith.constant dense<0.000000e+00> : vector<2x128xf32>
      %78 = tpu.matmul %50, %7, %cst_53 {dimension_numbers = #tpu.dot_dimension_numbers<[1], [0], [0], [1], [0, 0, 1, 1], [], []>} : vector<2x32xf32>, vector<32x128xf32>, vector<2x128xf32> -> vector<2x128xf32>
      %79 = arith.addf %77, %78 : vector<2x128xf32>
      %80 = vector.broadcast %11 : vector<1x128xf32> to vector<2x128xf32>
      %81 = arith.addf %79, %80 : vector<2x128xf32>
      %82 = vector.extract_strided_slice %81 {offsets = [0, 0], sizes = [2, 32], strides = [1, 1]} : vector<2x128xf32> to vector<2x32xf32>
      %83 = math.tanh %82 : vector<2x32xf32>
      %84 = vector.extract_strided_slice %81 {offsets = [0, 32], sizes = [2, 96], strides = [1, 1]} : vector<2x128xf32> to vector<2x96xf32>
      %85 = arith.negf %84 : vector<2x96xf32>
      %86 = math.exp %85 : vector<2x96xf32>
      %cst_54 = arith.constant 1.000000e+00 : f32
      %87 = vector.broadcast %cst_54 : f32 to vector<2x96xf32>
      %88 = arith.addf %87, %86 : vector<2x96xf32>
      %89 = arith.divf %87, %88 : vector<2x96xf32>
      %90 = vector.extract_strided_slice %89 {offsets = [0, 0], sizes = [2, 32], strides = [1, 1]} : vector<2x96xf32> to vector<2x32xf32>
      %91 = vector.extract_strided_slice %89 {offsets = [0, 32], sizes = [2, 32], strides = [1, 1]} : vector<2x96xf32> to vector<2x32xf32>
      %92 = vector.extract_strided_slice %89 {offsets = [0, 64], sizes = [2, 32], strides = [1, 1]} : vector<2x96xf32> to vector<2x32xf32>
      %93 = arith.mulf %90, %48 : vector<2x32xf32>
      %94 = arith.mulf %91, %83 : vector<2x32xf32>
      %95 = arith.addf %93, %94 : vector<2x32xf32>
      %96 = math.tanh %95 : vector<2x32xf32>
      %97 = arith.mulf %92, %96 : vector<2x32xf32>
      %cst_55 = arith.constant dense<0.000000e+00> : vector<2x128xf32>
      %98 = tpu.matmul %97, %5, %cst_55 {dimension_numbers = #tpu.dot_dimension_numbers<[1], [0], [0], [1], [0, 0, 1, 1], [], []>} : vector<2x32xf32>, vector<32x128xf32>, vector<2x128xf32> -> vector<2x128xf32>
      %cst_56 = arith.constant dense<0.000000e+00> : vector<2x128xf32>
      %99 = tpu.matmul %71, %9, %cst_56 {dimension_numbers = #tpu.dot_dimension_numbers<[1], [0], [0], [1], [0, 0, 1, 1], [], []>} : vector<2x32xf32>, vector<32x128xf32>, vector<2x128xf32> -> vector<2x128xf32>
      %100 = arith.addf %98, %99 : vector<2x128xf32>
      %101 = vector.broadcast %13 : vector<1x128xf32> to vector<2x128xf32>
      %102 = arith.addf %100, %101 : vector<2x128xf32>
      %103 = vector.extract_strided_slice %102 {offsets = [0, 0], sizes = [2, 32], strides = [1, 1]} : vector<2x128xf32> to vector<2x32xf32>
      %104 = math.tanh %103 : vector<2x32xf32>
      %105 = vector.extract_strided_slice %102 {offsets = [0, 32], sizes = [2, 96], strides = [1, 1]} : vector<2x128xf32> to vector<2x96xf32>
      %106 = arith.negf %105 : vector<2x96xf32>
      %107 = math.exp %106 : vector<2x96xf32>
      %cst_57 = arith.constant 1.000000e+00 : f32
      %108 = vector.broadcast %cst_57 : f32 to vector<2x96xf32>
      %109 = arith.addf %108, %107 : vector<2x96xf32>
      %110 = arith.divf %108, %109 : vector<2x96xf32>
      %111 = vector.extract_strided_slice %110 {offsets = [0, 0], sizes = [2, 32], strides = [1, 1]} : vector<2x96xf32> to vector<2x32xf32>
      %112 = vector.extract_strided_slice %110 {offsets = [0, 32], sizes = [2, 32], strides = [1, 1]} : vector<2x96xf32> to vector<2x32xf32>
      %113 = vector.extract_strided_slice %110 {offsets = [0, 64], sizes = [2, 32], strides = [1, 1]} : vector<2x96xf32> to vector<2x32xf32>
      %114 = arith.mulf %111, %69 : vector<2x32xf32>
      %115 = arith.mulf %112, %104 : vector<2x32xf32>
      %116 = arith.addf %114, %115 : vector<2x32xf32>
      %117 = math.tanh %116 : vector<2x32xf32>
      %118 = arith.mulf %113, %117 : vector<2x32xf32>
      %c0_58 = arith.constant 0 : index
      %c1_59 = arith.constant 1 : index
      %c0_60 = arith.constant 0 : index
      %c0_61 = arith.constant 0 : index
      %119 = vector.load %arg7[%c0_58, %c1_59, %c0_60, %c0_61] : memref<1x8x2x32xf32, #tpu.memory_space<vmem>>, vector<1x1x2x32xf32>
      %120 = vector.shape_cast %119 : vector<1x1x2x32xf32> to vector<2x32xf32>
      %121 = vector.shape_cast %118 : vector<2x32xf32> to vector<1x1x2x32xf32>
      tpu.vector_store %arg7[%c0_58, %c1_59, %c0_60, %c0_61], %121 {strides = array<i32>} : memref<1x8x2x32xf32, #tpu.memory_space<vmem>>, vector<1x1x2x32xf32>,
      %122 = vector.extract_strided_slice %1 {offsets = [2, 0, 0], sizes = [1, 2, 32], strides = [1, 1, 1]} : vector<8x2x32xf32> to vector<1x2x32xf32>
      %123 = vector.shape_cast %122 : vector<1x2x32xf32> to vector<2x32xf32>
      %cst_62 = arith.constant dense<0.000000e+00> : vector<2x128xf32>
      %124 = tpu.matmul %123, %3, %cst_62 {dimension_numbers = #tpu.dot_dimension_numbers<[1], [0], [0], [1], [0, 0, 1, 1], [], []>} : vector<2x32xf32>, vector<32x128xf32>, vector<2x128xf32> -> vector<2x128xf32>
      %cst_63 = arith.constant dense<0.000000e+00> : vector<2x128xf32>
      %125 = tpu.matmul %97, %7, %cst_63 {dimension_numbers = #tpu.dot_dimension_numbers<[1], [0], [0], [1], [0, 0, 1, 1], [], []>} : vector<2x32xf32>, vector<32x128xf32>, vector<2x128xf32> -> vector<2x128xf32>
      %126 = arith.addf %124, %125 : vector<2x128xf32>
      %127 = vector.broadcast %11 : vector<1x128xf32> to vector<2x128xf32>
      %128 = arith.addf %126, %127 : vector<2x128xf32>
      %129 = vector.extract_strided_slice %128 {offsets = [0, 0], sizes = [2, 32], strides = [1, 1]} : vector<2x128xf32> to vector<2x32xf32>
      %130 = math.tanh %129 : vector<2x32xf32>
      %131 = vector.extract_strided_slice %128 {offsets = [0, 32], sizes = [2, 96], strides = [1, 1]} : vector<2x128xf32> to vector<2x96xf32>
      %132 = arith.negf %131 : vector<2x96xf32>
      %133 = math.exp %132 : vector<2x96xf32>
      %cst_64 = arith.constant 1.000000e+00 : f32
      %134 = vector.broadcast %cst_64 : f32 to vector<2x96xf32>
      %135 = arith.addf %134, %133 : vector<2x96xf32>
      %136 = arith.divf %134, %135 : vector<2x96xf32>
      %137 = vector.extract_strided_slice %136 {offsets = [0, 0], sizes = [2, 32], strides = [1, 1]} : vector<2x96xf32> to vector<2x32xf32>
      %138 = vector.extract_strided_slice %136 {offsets = [0, 32], sizes = [2, 32], strides = [1, 1]} : vector<2x96xf32> to vector<2x32xf32>
      %139 = vector.extract_strided_slice %136 {offsets = [0, 64], sizes = [2, 32], strides = [1, 1]} : vector<2x96xf32> to vector<2x32xf32>
      %140 = arith.mulf %137, %95 : vector<2x32xf32>
      %141 = arith.mulf %138, %130 : vector<2x32xf32>
      %142 = arith.addf %140, %141 : vector<2x32xf32>
      %143 = math.tanh %142 : vector<2x32xf32>
      %144 = arith.mulf %139, %143 : vector<2x32xf32>
      %cst_65 = arith.constant dense<0.000000e+00> : vector<2x128xf32>
      %145 = tpu.matmul %144, %5, %cst_65 {dimension_numbers = #tpu.dot_dimension_numbers<[1], [0], [0], [1], [0, 0, 1, 1], [], []>} : vector<2x32xf32>, vector<32x128xf32>, vector<2x128xf32> -> vector<2x128xf32>
      %cst_66 = arith.constant dense<0.000000e+00> : vector<2x128xf32>
      %146 = tpu.matmul %118, %9, %cst_66 {dimension_numbers = #tpu.dot_dimension_numbers<[1], [0], [0], [1], [0, 0, 1, 1], [], []>} : vector<2x32xf32>, vector<32x128xf32>, vector<2x128xf32> -> vector<2x128xf32>
      %147 = arith.addf %145, %146 : vector<2x128xf32>
      %148 = vector.broadcast %13 : vector<1x128xf32> to vector<2x128xf32>
      %149 = arith.addf %147, %148 : vector<2x128xf32>
      %150 = vector.extract_strided_slice %149 {offsets = [0, 0], sizes = [2, 32], strides = [1, 1]} : vector<2x128xf32> to vector<2x32xf32>
      %151 = math.tanh %150 : vector<2x32xf32>
      %152 = vector.extract_strided_slice %149 {offsets = [0, 32], sizes = [2, 96], strides = [1, 1]} : vector<2x128xf32> to vector<2x96xf32>
      %153 = arith.negf %152 : vector<2x96xf32>
      %154 = math.exp %153 : vector<2x96xf32>
      %cst_67 = arith.constant 1.000000e+00 : f32
      %155 = vector.broadcast %cst_67 : f32 to vector<2x96xf32>
      %156 = arith.addf %155, %154 : vector<2x96xf32>
      %157 = arith.divf %155, %156 : vector<2x96xf32>
      %158 = vector.extract_strided_slice %157 {offsets = [0, 0], sizes = [2, 32], strides = [1, 1]} : vector<2x96xf32> to vector<2x32xf32>
      %159 = vector.extract_strided_slice %157 {offsets = [0, 32], sizes = [2, 32], strides = [1, 1]} : vector<2x96xf32> to vector<2x32xf32>
      %160 = vector.extract_strided_slice %157 {offsets = [0, 64], sizes = [2, 32], strides = [1, 1]} : vector<2x96xf32> to vector<2x32xf32>
      %161 = arith.mulf %158, %116 : vector<2x32xf32>
      %162 = arith.mulf %159, %151 : vector<2x32xf32>
      %163 = arith.addf %161, %162 : vector<2x32xf32>
      %164 = math.tanh %163 : vector<2x32xf32>
      %165 = arith.mulf %160, %164 : vector<2x32xf32>
      %c0_68 = arith.constant 0 : index
      %c2 = arith.constant 2 : index
      %c0_69 = arith.constant 0 : index
      %c0_70 = arith.constant 0 : index
      %166 = vector.load %arg7[%c0_68, %c2, %c0_69, %c0_70] : memref<1x8x2x32xf32, #tpu.memory_space<vmem>>, vector<1x1x2x32xf32>
      %167 = vector.shape_cast %166 : vector<1x1x2x32xf32> to vector<2x32xf32>
      %168 = vector.shape_cast %165 : vector<2x32xf32> to vector<1x1x2x32xf32>
      tpu.vector_store %arg7[%c0_68, %c2, %c0_69, %c0_70], %168 {strides = array<i32>} : memref<1x8x2x32xf32, #tpu.memory_space<vmem>>, vector<1x1x2x32xf32>,
      %169 = vector.extract_strided_slice %1 {offsets = [3, 0, 0], sizes = [1, 2, 32], strides = [1, 1, 1]} : vector<8x2x32xf32> to vector<1x2x32xf32>
      %170 = vector.shape_cast %169 : vector<1x2x32xf32> to vector<2x32xf32>
      %cst_71 = arith.constant dense<0.000000e+00> : vector<2x128xf32>
      %171 = tpu.matmul %170, %3, %cst_71 {dimension_numbers = #tpu.dot_dimension_numbers<[1], [0], [0], [1], [0, 0, 1, 1], [], []>} : vector<2x32xf32>, vector<32x128xf32>, vector<2x128xf32> -> vector<2x128xf32>
      %cst_72 = arith.constant dense<0.000000e+00> : vector<2x128xf32>
      %172 = tpu.matmul %144, %7, %cst_72 {dimension_numbers = #tpu.dot_dimension_numbers<[1], [0], [0], [1], [0, 0, 1, 1], [], []>} : vector<2x32xf32>, vector<32x128xf32>, vector<2x128xf32> -> vector<2x128xf32>
      %173 = arith.addf %171, %172 : vector<2x128xf32>
      %174 = vector.broadcast %11 : vector<1x128xf32> to vector<2x128xf32>
      %175 = arith.addf %173, %174 : vector<2x128xf32>
      %176 = vector.extract_strided_slice %175 {offsets = [0, 0], sizes = [2, 32], strides = [1, 1]} : vector<2x128xf32> to vector<2x32xf32>
      %177 = math.tanh %176 : vector<2x32xf32>
      %178 = vector.extract_strided_slice %175 {offsets = [0, 32], sizes = [2, 96], strides = [1, 1]} : vector<2x128xf32> to vector<2x96xf32>
      %179 = arith.negf %178 : vector<2x96xf32>
      %180 = math.exp %179 : vector<2x96xf32>
      %cst_73 = arith.constant 1.000000e+00 : f32
      %181 = vector.broadcast %cst_73 : f32 to vector<2x96xf32>
      %182 = arith.addf %181, %180 : vector<2x96xf32>
      %183 = arith.divf %181, %182 : vector<2x96xf32>
      %184 = vector.extract_strided_slice %183 {offsets = [0, 0], sizes = [2, 32], strides = [1, 1]} : vector<2x96xf32> to vector<2x32xf32>
      %185 = vector.extract_strided_slice %183 {offsets = [0, 32], sizes = [2, 32], strides = [1, 1]} : vector<2x96xf32> to vector<2x32xf32>
      %186 = vector.extract_strided_slice %183 {offsets = [0, 64], sizes = [2, 32], strides = [1, 1]} : vector<2x96xf32> to vector<2x32xf32>
      %187 = arith.mulf %184, %142 : vector<2x32xf32>
      %188 = arith.mulf %185, %177 : vector<2x32xf32>
      %189 = arith.addf %187, %188 : vector<2x32xf32>
      %190 = math.tanh %189 : vector<2x32xf32>
      %191 = arith.mulf %186, %190 : vector<2x32xf32>
      %cst_74 = arith.constant dense<0.000000e+00> : vector<2x128xf32>
      %192 = tpu.matmul %191, %5, %cst_74 {dimension_numbers = #tpu.dot_dimension_numbers<[1], [0], [0], [1], [0, 0, 1, 1], [], []>} : vector<2x32xf32>, vector<32x128xf32>, vector<2x128xf32> -> vector<2x128xf32>
      %cst_75 = arith.constant dense<0.000000e+00> : vector<2x128xf32>
      %193 = tpu.matmul %165, %9, %cst_75 {dimension_numbers = #tpu.dot_dimension_numbers<[1], [0], [0], [1], [0, 0, 1, 1], [], []>} : vector<2x32xf32>, vector<32x128xf32>, vector<2x128xf32> -> vector<2x128xf32>
      %194 = arith.addf %192, %193 : vector<2x128xf32>
      %195 = vector.broadcast %13 : vector<1x128xf32> to vector<2x128xf32>
      %196 = arith.addf %194, %195 : vector<2x128xf32>
      %197 = vector.extract_strided_slice %196 {offsets = [0, 0], sizes = [2, 32], strides = [1, 1]} : vector<2x128xf32> to vector<2x32xf32>
      %198 = math.tanh %197 : vector<2x32xf32>
      %199 = vector.extract_strided_slice %196 {offsets = [0, 32], sizes = [2, 96], strides = [1, 1]} : vector<2x128xf32> to vector<2x96xf32>
      %200 = arith.negf %199 : vector<2x96xf32>
      %201 = math.exp %200 : vector<2x96xf32>
      %cst_76 = arith.constant 1.000000e+00 : f32
      %202 = vector.broadcast %cst_76 : f32 to vector<2x96xf32>
      %203 = arith.addf %202, %201 : vector<2x96xf32>
      %204 = arith.divf %202, %203 : vector<2x96xf32>
      %205 = vector.extract_strided_slice %204 {offsets = [0, 0], sizes = [2, 32], strides = [1, 1]} : vector<2x96xf32> to vector<2x32xf32>
      %206 = vector.extract_strided_slice %204 {offsets = [0, 32], sizes = [2, 32], strides = [1, 1]} : vector<2x96xf32> to vector<2x32xf32>
      %207 = vector.extract_strided_slice %204 {offsets = [0, 64], sizes = [2, 32], strides = [1, 1]} : vector<2x96xf32> to vector<2x32xf32>
      %208 = arith.mulf %205, %163 : vector<2x32xf32>
      %209 = arith.mulf %206, %198 : vector<2x32xf32>
      %210 = arith.addf %208, %209 : vector<2x32xf32>
      %211 = math.tanh %210 : vector<2x32xf32>
      %212 = arith.mulf %207, %211 : vector<2x32xf32>
      %c0_77 = arith.constant 0 : index
      %c3 = arith.constant 3 : index
      %c0_78 = arith.constant 0 : index
      %c0_79 = arith.constant 0 : index
      %213 = vector.load %arg7[%c0_77, %c3, %c0_78, %c0_79] : memref<1x8x2x32xf32, #tpu.memory_space<vmem>>, vector<1x1x2x32xf32>
      %214 = vector.shape_cast %213 : vector<1x1x2x32xf32> to vector<2x32xf32>
      %215 = vector.shape_cast %212 : vector<2x32xf32> to vector<1x1x2x32xf32>
      tpu.vector_store %arg7[%c0_77, %c3, %c0_78, %c0_79], %215 {strides = array<i32>} : memref<1x8x2x32xf32, #tpu.memory_space<vmem>>, vector<1x1x2x32xf32>,
      %216 = vector.extract_strided_slice %1 {offsets = [4, 0, 0], sizes = [1, 2, 32], strides = [1, 1, 1]} : vector<8x2x32xf32> to vector<1x2x32xf32>
      %217 = vector.shape_cast %216 : vector<1x2x32xf32> to vector<2x32xf32>
      %cst_80 = arith.constant dense<0.000000e+00> : vector<2x128xf32>
      %218 = tpu.matmul %217, %3, %cst_80 {dimension_numbers = #tpu.dot_dimension_numbers<[1], [0], [0], [1], [0, 0, 1, 1], [], []>} : vector<2x32xf32>, vector<32x128xf32>, vector<2x128xf32> -> vector<2x128xf32>
      %cst_81 = arith.constant dense<0.000000e+00> : vector<2x128xf32>
      %219 = tpu.matmul %191, %7, %cst_81 {dimension_numbers = #tpu.dot_dimension_numbers<[1], [0], [0], [1], [0, 0, 1, 1], [], []>} : vector<2x32xf32>, vector<32x128xf32>, vector<2x128xf32> -> vector<2x128xf32>
      %220 = arith.addf %218, %219 : vector<2x128xf32>
      %221 = vector.broadcast %11 : vector<1x128xf32> to vector<2x128xf32>
      %222 = arith.addf %220, %221 : vector<2x128xf32>
      %223 = vector.extract_strided_slice %222 {offsets = [0, 0], sizes = [2, 32], strides = [1, 1]} : vector<2x128xf32> to vector<2x32xf32>
      %224 = math.tanh %223 : vector<2x32xf32>
      %225 = vector.extract_strided_slice %222 {offsets = [0, 32], sizes = [2, 96], strides = [1, 1]} : vector<2x128xf32> to vector<2x96xf32>
      %226 = arith.negf %225 : vector<2x96xf32>
      %227 = math.exp %226 : vector<2x96xf32>
      %cst_82 = arith.constant 1.000000e+00 : f32
      %228 = vector.broadcast %cst_82 : f32 to vector<2x96xf32>
      %229 = arith.addf %228, %227 : vector<2x96xf32>
      %230 = arith.divf %228, %229 : vector<2x96xf32>
      %231 = vector.extract_strided_slice %230 {offsets = [0, 0], sizes = [2, 32], strides = [1, 1]} : vector<2x96xf32> to vector<2x32xf32>
      %232 = vector.extract_strided_slice %230 {offsets = [0, 32], sizes = [2, 32], strides = [1, 1]} : vector<2x96xf32> to vector<2x32xf32>
      %233 = vector.extract_strided_slice %230 {offsets = [0, 64], sizes = [2, 32], strides = [1, 1]} : vector<2x96xf32> to vector<2x32xf32>
      %234 = arith.mulf %231, %189 : vector<2x32xf32>
      %235 = arith.mulf %232, %224 : vector<2x32xf32>
      %236 = arith.addf %234, %235 : vector<2x32xf32>
      %237 = math.tanh %236 : vector<2x32xf32>
      %238 = arith.mulf %233, %237 : vector<2x32xf32>
      %cst_83 = arith.constant dense<0.000000e+00> : vector<2x128xf32>
      %239 = tpu.matmul %238, %5, %cst_83 {dimension_numbers = #tpu.dot_dimension_numbers<[1], [0], [0], [1], [0, 0, 1, 1], [], []>} : vector<2x32xf32>, vector<32x128xf32>, vector<2x128xf32> -> vector<2x128xf32>
      %cst_84 = arith.constant dense<0.000000e+00> : vector<2x128xf32>
      %240 = tpu.matmul %212, %9, %cst_84 {dimension_numbers = #tpu.dot_dimension_numbers<[1], [0], [0], [1], [0, 0, 1, 1], [], []>} : vector<2x32xf32>, vector<32x128xf32>, vector<2x128xf32> -> vector<2x128xf32>
      %241 = arith.addf %239, %240 : vector<2x128xf32>
      %242 = vector.broadcast %13 : vector<1x128xf32> to vector<2x128xf32>
      %243 = arith.addf %241, %242 : vector<2x128xf32>
      %244 = vector.extract_strided_slice %243 {offsets = [0, 0], sizes = [2, 32], strides = [1, 1]} : vector<2x128xf32> to vector<2x32xf32>
      %245 = math.tanh %244 : vector<2x32xf32>
      %246 = vector.extract_strided_slice %243 {offsets = [0, 32], sizes = [2, 96], strides = [1, 1]} : vector<2x128xf32> to vector<2x96xf32>
      %247 = arith.negf %246 : vector<2x96xf32>
      %248 = math.exp %247 : vector<2x96xf32>
      %cst_85 = arith.constant 1.000000e+00 : f32
      %249 = vector.broadcast %cst_85 : f32 to vector<2x96xf32>
      %250 = arith.addf %249, %248 : vector<2x96xf32>
      %251 = arith.divf %249, %250 : vector<2x96xf32>
      %252 = vector.extract_strided_slice %251 {offsets = [0, 0], sizes = [2, 32], strides = [1, 1]} : vector<2x96xf32> to vector<2x32xf32>
      %253 = vector.extract_strided_slice %251 {offsets = [0, 32], sizes = [2, 32], strides = [1, 1]} : vector<2x96xf32> to vector<2x32xf32>
      %254 = vector.extract_strided_slice %251 {offsets = [0, 64], sizes = [2, 32], strides = [1, 1]} : vector<2x96xf32> to vector<2x32xf32>
      %255 = arith.mulf %252, %210 : vector<2x32xf32>
      %256 = arith.mulf %253, %245 : vector<2x32xf32>
      %257 = arith.addf %255, %256 : vector<2x32xf32>
      %258 = math.tanh %257 : vector<2x32xf32>
      %259 = arith.mulf %254, %258 : vector<2x32xf32>
      %c0_86 = arith.constant 0 : index
      %c4 = arith.constant 4 : index
      %c0_87 = arith.constant 0 : index
      %c0_88 = arith.constant 0 : index
      %260 = vector.load %arg7[%c0_86, %c4, %c0_87, %c0_88] : memref<1x8x2x32xf32, #tpu.memory_space<vmem>>, vector<1x1x2x32xf32>
      %261 = vector.shape_cast %260 : vector<1x1x2x32xf32> to vector<2x32xf32>
      %262 = vector.shape_cast %259 : vector<2x32xf32> to vector<1x1x2x32xf32>
      tpu.vector_store %arg7[%c0_86, %c4, %c0_87, %c0_88], %262 {strides = array<i32>} : memref<1x8x2x32xf32, #tpu.memory_space<vmem>>, vector<1x1x2x32xf32>,
      %263 = vector.extract_strided_slice %1 {offsets = [5, 0, 0], sizes = [1, 2, 32], strides = [1, 1, 1]} : vector<8x2x32xf32> to vector<1x2x32xf32>
      %264 = vector.shape_cast %263 : vector<1x2x32xf32> to vector<2x32xf32>
      %cst_89 = arith.constant dense<0.000000e+00> : vector<2x128xf32>
      %265 = tpu.matmul %264, %3, %cst_89 {dimension_numbers = #tpu.dot_dimension_numbers<[1], [0], [0], [1], [0, 0, 1, 1], [], []>} : vector<2x32xf32>, vector<32x128xf32>, vector<2x128xf32> -> vector<2x128xf32>
      %cst_90 = arith.constant dense<0.000000e+00> : vector<2x128xf32>
      %266 = tpu.matmul %238, %7, %cst_90 {dimension_numbers = #tpu.dot_dimension_numbers<[1], [0], [0], [1], [0, 0, 1, 1], [], []>} : vector<2x32xf32>, vector<32x128xf32>, vector<2x128xf32> -> vector<2x128xf32>
      %267 = arith.addf %265, %266 : vector<2x128xf32>
      %268 = vector.broadcast %11 : vector<1x128xf32> to vector<2x128xf32>
      %269 = arith.addf %267, %268 : vector<2x128xf32>
      %270 = vector.extract_strided_slice %269 {offsets = [0, 0], sizes = [2, 32], strides = [1, 1]} : vector<2x128xf32> to vector<2x32xf32>
      %271 = math.tanh %270 : vector<2x32xf32>
      %272 = vector.extract_strided_slice %269 {offsets = [0, 32], sizes = [2, 96], strides = [1, 1]} : vector<2x128xf32> to vector<2x96xf32>
      %273 = arith.negf %272 : vector<2x96xf32>
      %274 = math.exp %273 : vector<2x96xf32>
      %cst_91 = arith.constant 1.000000e+00 : f32
      %275 = vector.broadcast %cst_91 : f32 to vector<2x96xf32>
      %276 = arith.addf %275, %274 : vector<2x96xf32>
      %277 = arith.divf %275, %276 : vector<2x96xf32>
      %278 = vector.extract_strided_slice %277 {offsets = [0, 0], sizes = [2, 32], strides = [1, 1]} : vector<2x96xf32> to vector<2x32xf32>
      %279 = vector.extract_strided_slice %277 {offsets = [0, 32], sizes = [2, 32], strides = [1, 1]} : vector<2x96xf32> to vector<2x32xf32>
      %280 = vector.extract_strided_slice %277 {offsets = [0, 64], sizes = [2, 32], strides = [1, 1]} : vector<2x96xf32> to vector<2x32xf32>
      %281 = arith.mulf %278, %236 : vector<2x32xf32>
      %282 = arith.mulf %279, %271 : vector<2x32xf32>
      %283 = arith.addf %281, %282 : vector<2x32xf32>
      %284 = math.tanh %283 : vector<2x32xf32>
      %285 = arith.mulf %280, %284 : vector<2x32xf32>
      %cst_92 = arith.constant dense<0.000000e+00> : vector<2x128xf32>
      %286 = tpu.matmul %285, %5, %cst_92 {dimension_numbers = #tpu.dot_dimension_numbers<[1], [0], [0], [1], [0, 0, 1, 1], [], []>} : vector<2x32xf32>, vector<32x128xf32>, vector<2x128xf32> -> vector<2x128xf32>
      %cst_93 = arith.constant dense<0.000000e+00> : vector<2x128xf32>
      %287 = tpu.matmul %259, %9, %cst_93 {dimension_numbers = #tpu.dot_dimension_numbers<[1], [0], [0], [1], [0, 0, 1, 1], [], []>} : vector<2x32xf32>, vector<32x128xf32>, vector<2x128xf32> -> vector<2x128xf32>
      %288 = arith.addf %286, %287 : vector<2x128xf32>
      %289 = vector.broadcast %13 : vector<1x128xf32> to vector<2x128xf32>
      %290 = arith.addf %288, %289 : vector<2x128xf32>
      %291 = vector.extract_strided_slice %290 {offsets = [0, 0], sizes = [2, 32], strides = [1, 1]} : vector<2x128xf32> to vector<2x32xf32>
      %292 = math.tanh %291 : vector<2x32xf32>
      %293 = vector.extract_strided_slice %290 {offsets = [0, 32], sizes = [2, 96], strides = [1, 1]} : vector<2x128xf32> to vector<2x96xf32>
      %294 = arith.negf %293 : vector<2x96xf32>
      %295 = math.exp %294 : vector<2x96xf32>
      %cst_94 = arith.constant 1.000000e+00 : f32
      %296 = vector.broadcast %cst_94 : f32 to vector<2x96xf32>
      %297 = arith.addf %296, %295 : vector<2x96xf32>
      %298 = arith.divf %296, %297 : vector<2x96xf32>
      %299 = vector.extract_strided_slice %298 {offsets = [0, 0], sizes = [2, 32], strides = [1, 1]} : vector<2x96xf32> to vector<2x32xf32>
      %300 = vector.extract_strided_slice %298 {offsets = [0, 32], sizes = [2, 32], strides = [1, 1]} : vector<2x96xf32> to vector<2x32xf32>
      %301 = vector.extract_strided_slice %298 {offsets = [0, 64], sizes = [2, 32], strides = [1, 1]} : vector<2x96xf32> to vector<2x32xf32>
      %302 = arith.mulf %299, %257 : vector<2x32xf32>
      %303 = arith.mulf %300, %292 : vector<2x32xf32>
      %304 = arith.addf %302, %303 : vector<2x32xf32>
      %305 = math.tanh %304 : vector<2x32xf32>
      %306 = arith.mulf %301, %305 : vector<2x32xf32>
      %c0_95 = arith.constant 0 : index
      %c5 = arith.constant 5 : index
      %c0_96 = arith.constant 0 : index
      %c0_97 = arith.constant 0 : index
      %307 = vector.load %arg7[%c0_95, %c5, %c0_96, %c0_97] : memref<1x8x2x32xf32, #tpu.memory_space<vmem>>, vector<1x1x2x32xf32>
      %308 = vector.shape_cast %307 : vector<1x1x2x32xf32> to vector<2x32xf32>
      %309 = vector.shape_cast %306 : vector<2x32xf32> to vector<1x1x2x32xf32>
      tpu.vector_store %arg7[%c0_95, %c5, %c0_96, %c0_97], %309 {strides = array<i32>} : memref<1x8x2x32xf32, #tpu.memory_space<vmem>>, vector<1x1x2x32xf32>,
      %310 = vector.extract_strided_slice %1 {offsets = [6, 0, 0], sizes = [1, 2, 32], strides = [1, 1, 1]} : vector<8x2x32xf32> to vector<1x2x32xf32>
      %311 = vector.shape_cast %310 : vector<1x2x32xf32> to vector<2x32xf32>
      %cst_98 = arith.constant dense<0.000000e+00> : vector<2x128xf32>
      %312 = tpu.matmul %311, %3, %cst_98 {dimension_numbers = #tpu.dot_dimension_numbers<[1], [0], [0], [1], [0, 0, 1, 1], [], []>} : vector<2x32xf32>, vector<32x128xf32>, vector<2x128xf32> -> vector<2x128xf32>
      %cst_99 = arith.constant dense<0.000000e+00> : vector<2x128xf32>
      %313 = tpu.matmul %285, %7, %cst_99 {dimension_numbers = #tpu.dot_dimension_numbers<[1], [0], [0], [1], [0, 0, 1, 1], [], []>} : vector<2x32xf32>, vector<32x128xf32>, vector<2x128xf32> -> vector<2x128xf32>
      %314 = arith.addf %312, %313 : vector<2x128xf32>
      %315 = vector.broadcast %11 : vector<1x128xf32> to vector<2x128xf32>
      %316 = arith.addf %314, %315 : vector<2x128xf32>
      %317 = vector.extract_strided_slice %316 {offsets = [0, 0], sizes = [2, 32], strides = [1, 1]} : vector<2x128xf32> to vector<2x32xf32>
      %318 = math.tanh %317 : vector<2x32xf32>
      %319 = vector.extract_strided_slice %316 {offsets = [0, 32], sizes = [2, 96], strides = [1, 1]} : vector<2x128xf32> to vector<2x96xf32>
      %320 = arith.negf %319 : vector<2x96xf32>
      %321 = math.exp %320 : vector<2x96xf32>
      %cst_100 = arith.constant 1.000000e+00 : f32
      %322 = vector.broadcast %cst_100 : f32 to vector<2x96xf32>
      %323 = arith.addf %322, %321 : vector<2x96xf32>
      %324 = arith.divf %322, %323 : vector<2x96xf32>
      %325 = vector.extract_strided_slice %324 {offsets = [0, 0], sizes = [2, 32], strides = [1, 1]} : vector<2x96xf32> to vector<2x32xf32>
      %326 = vector.extract_strided_slice %324 {offsets = [0, 32], sizes = [2, 32], strides = [1, 1]} : vector<2x96xf32> to vector<2x32xf32>
      %327 = vector.extract_strided_slice %324 {offsets = [0, 64], sizes = [2, 32], strides = [1, 1]} : vector<2x96xf32> to vector<2x32xf32>
      %328 = arith.mulf %325, %283 : vector<2x32xf32>
      %329 = arith.mulf %326, %318 : vector<2x32xf32>
      %330 = arith.addf %328, %329 : vector<2x32xf32>
      %331 = math.tanh %330 : vector<2x32xf32>
      %332 = arith.mulf %327, %331 : vector<2x32xf32>
      %cst_101 = arith.constant dense<0.000000e+00> : vector<2x128xf32>
      %333 = tpu.matmul %332, %5, %cst_101 {dimension_numbers = #tpu.dot_dimension_numbers<[1], [0], [0], [1], [0, 0, 1, 1], [], []>} : vector<2x32xf32>, vector<32x128xf32>, vector<2x128xf32> -> vector<2x128xf32>
      %cst_102 = arith.constant dense<0.000000e+00> : vector<2x128xf32>
      %334 = tpu.matmul %306, %9, %cst_102 {dimension_numbers = #tpu.dot_dimension_numbers<[1], [0], [0], [1], [0, 0, 1, 1], [], []>} : vector<2x32xf32>, vector<32x128xf32>, vector<2x128xf32> -> vector<2x128xf32>
      %335 = arith.addf %333, %334 : vector<2x128xf32>
      %336 = vector.broadcast %13 : vector<1x128xf32> to vector<2x128xf32>
      %337 = arith.addf %335, %336 : vector<2x128xf32>
      %338 = vector.extract_strided_slice %337 {offsets = [0, 0], sizes = [2, 32], strides = [1, 1]} : vector<2x128xf32> to vector<2x32xf32>
      %339 = math.tanh %338 : vector<2x32xf32>
      %340 = vector.extract_strided_slice %337 {offsets = [0, 32], sizes = [2, 96], strides = [1, 1]} : vector<2x128xf32> to vector<2x96xf32>
      %341 = arith.negf %340 : vector<2x96xf32>
      %342 = math.exp %341 : vector<2x96xf32>
      %cst_103 = arith.constant 1.000000e+00 : f32
      %343 = vector.broadcast %cst_103 : f32 to vector<2x96xf32>
      %344 = arith.addf %343, %342 : vector<2x96xf32>
      %345 = arith.divf %343, %344 : vector<2x96xf32>
      %346 = vector.extract_strided_slice %345 {offsets = [0, 0], sizes = [2, 32], strides = [1, 1]} : vector<2x96xf32> to vector<2x32xf32>
      %347 = vector.extract_strided_slice %345 {offsets = [0, 32], sizes = [2, 32], strides = [1, 1]} : vector<2x96xf32> to vector<2x32xf32>
      %348 = vector.extract_strided_slice %345 {offsets = [0, 64], sizes = [2, 32], strides = [1, 1]} : vector<2x96xf32> to vector<2x32xf32>
      %349 = arith.mulf %346, %304 : vector<2x32xf32>
      %350 = arith.mulf %347, %339 : vector<2x32xf32>
      %351 = arith.addf %349, %350 : vector<2x32xf32>
      %352 = math.tanh %351 : vector<2x32xf32>
      %353 = arith.mulf %348, %352 : vector<2x32xf32>
      %c0_104 = arith.constant 0 : index
      %c6 = arith.constant 6 : index
      %c0_105 = arith.constant 0 : index
      %c0_106 = arith.constant 0 : index
      %354 = vector.load %arg7[%c0_104, %c6, %c0_105, %c0_106] : memref<1x8x2x32xf32, #tpu.memory_space<vmem>>, vector<1x1x2x32xf32>
      %355 = vector.shape_cast %354 : vector<1x1x2x32xf32> to vector<2x32xf32>
      %356 = vector.shape_cast %353 : vector<2x32xf32> to vector<1x1x2x32xf32>
      tpu.vector_store %arg7[%c0_104, %c6, %c0_105, %c0_106], %356 {strides = array<i32>} : memref<1x8x2x32xf32, #tpu.memory_space<vmem>>, vector<1x1x2x32xf32>,
      %357 = vector.extract_strided_slice %1 {offsets = [7, 0, 0], sizes = [1, 2, 32], strides = [1, 1, 1]} : vector<8x2x32xf32> to vector<1x2x32xf32>
      %358 = vector.shape_cast %357 : vector<1x2x32xf32> to vector<2x32xf32>
      %cst_107 = arith.constant dense<0.000000e+00> : vector<2x128xf32>
      %359 = tpu.matmul %358, %3, %cst_107 {dimension_numbers = #tpu.dot_dimension_numbers<[1], [0], [0], [1], [0, 0, 1, 1], [], []>} : vector<2x32xf32>, vector<32x128xf32>, vector<2x128xf32> -> vector<2x128xf32>
      %cst_108 = arith.constant dense<0.000000e+00> : vector<2x128xf32>
      %360 = tpu.matmul %332, %7, %cst_108 {dimension_numbers = #tpu.dot_dimension_numbers<[1], [0], [0], [1], [0, 0, 1, 1], [], []>} : vector<2x32xf32>, vector<32x128xf32>, vector<2x128xf32> -> vector<2x128xf32>
      %361 = arith.addf %359, %360 : vector<2x128xf32>
      %362 = vector.broadcast %11 : vector<1x128xf32> to vector<2x128xf32>
      %363 = arith.addf %361, %362 : vector<2x128xf32>
      %364 = vector.extract_strided_slice %363 {offsets = [0, 0], sizes = [2, 32], strides = [1, 1]} : vector<2x128xf32> to vector<2x32xf32>
      %365 = math.tanh %364 : vector<2x32xf32>
      %366 = vector.extract_strided_slice %363 {offsets = [0, 32], sizes = [2, 96], strides = [1, 1]} : vector<2x128xf32> to vector<2x96xf32>
      %367 = arith.negf %366 : vector<2x96xf32>
      %368 = math.exp %367 : vector<2x96xf32>
      %cst_109 = arith.constant 1.000000e+00 : f32
      %369 = vector.broadcast %cst_109 : f32 to vector<2x96xf32>
      %370 = arith.addf %369, %368 : vector<2x96xf32>
      %371 = arith.divf %369, %370 : vector<2x96xf32>
      %372 = vector.extract_strided_slice %371 {offsets = [0, 0], sizes = [2, 32], strides = [1, 1]} : vector<2x96xf32> to vector<2x32xf32>
      %373 = vector.extract_strided_slice %371 {offsets = [0, 32], sizes = [2, 32], strides = [1, 1]} : vector<2x96xf32> to vector<2x32xf32>
      %374 = vector.extract_strided_slice %371 {offsets = [0, 64], sizes = [2, 32], strides = [1, 1]} : vector<2x96xf32> to vector<2x32xf32>
      %375 = arith.mulf %372, %330 : vector<2x32xf32>
      %376 = arith.mulf %373, %365 : vector<2x32xf32>
      %377 = arith.addf %375, %376 : vector<2x32xf32>
      %378 = math.tanh %377 : vector<2x32xf32>
      %379 = arith.mulf %374, %378 : vector<2x32xf32>
      %cst_110 = arith.constant dense<0.000000e+00> : vector<2x128xf32>
      %380 = tpu.matmul %379, %5, %cst_110 {dimension_numbers = #tpu.dot_dimension_numbers<[1], [0], [0], [1], [0, 0, 1, 1], [], []>} : vector<2x32xf32>, vector<32x128xf32>, vector<2x128xf32> -> vector<2x128xf32>
      %cst_111 = arith.constant dense<0.000000e+00> : vector<2x128xf32>
      %381 = tpu.matmul %353, %9, %cst_111 {dimension_numbers = #tpu.dot_dimension_numbers<[1], [0], [0], [1], [0, 0, 1, 1], [], []>} : vector<2x32xf32>, vector<32x128xf32>, vector<2x128xf32> -> vector<2x128xf32>
      %382 = arith.addf %380, %381 : vector<2x128xf32>
      %383 = vector.broadcast %13 : vector<1x128xf32> to vector<2x128xf32>
      %384 = arith.addf %382, %383 : vector<2x128xf32>
      %385 = vector.extract_strided_slice %384 {offsets = [0, 0], sizes = [2, 32], strides = [1, 1]} : vector<2x128xf32> to vector<2x32xf32>
      %386 = math.tanh %385 : vector<2x32xf32>
      %387 = vector.extract_strided_slice %384 {offsets = [0, 32], sizes = [2, 96], strides = [1, 1]} : vector<2x128xf32> to vector<2x96xf32>
      %388 = arith.negf %387 : vector<2x96xf32>
      %389 = math.exp %388 : vector<2x96xf32>
      %cst_112 = arith.constant 1.000000e+00 : f32
      %390 = vector.broadcast %cst_112 : f32 to vector<2x96xf32>
      %391 = arith.addf %390, %389 : vector<2x96xf32>
      %392 = arith.divf %390, %391 : vector<2x96xf32>
      %393 = vector.extract_strided_slice %392 {offsets = [0, 0], sizes = [2, 32], strides = [1, 1]} : vector<2x96xf32> to vector<2x32xf32>
      %394 = vector.extract_strided_slice %392 {offsets = [0, 32], sizes = [2, 32], strides = [1, 1]} : vector<2x96xf32> to vector<2x32xf32>
      %395 = vector.extract_strided_slice %392 {offsets = [0, 64], sizes = [2, 32], strides = [1, 1]} : vector<2x96xf32> to vector<2x32xf32>
      %396 = arith.mulf %393, %351 : vector<2x32xf32>
      %397 = arith.mulf %394, %386 : vector<2x32xf32>
      %398 = arith.addf %396, %397 : vector<2x32xf32>
      %399 = math.tanh %398 : vector<2x32xf32>
      %400 = arith.mulf %395, %399 : vector<2x32xf32>
      %c0_113 = arith.constant 0 : index
      %c7 = arith.constant 7 : index
      %c0_114 = arith.constant 0 : index
      %c0_115 = arith.constant 0 : index
      %401 = vector.load %arg7[%c0_113, %c7, %c0_114, %c0_115] : memref<1x8x2x32xf32, #tpu.memory_space<vmem>>, vector<1x1x2x32xf32>
      %402 = vector.shape_cast %401 : vector<1x1x2x32xf32> to vector<2x32xf32>
      %403 = vector.shape_cast %400 : vector<2x32xf32> to vector<1x1x2x32xf32>
      tpu.vector_store %arg7[%c0_113, %c7, %c0_114, %c0_115], %403 {strides = array<i32>} : memref<1x8x2x32xf32, #tpu.memory_space<vmem>>, vector<1x1x2x32xf32>,
      %c0_116 = arith.constant 0 : index
      %c0_117 = arith.constant 0 : index
      %c0_118 = arith.constant 0 : index
      %c0_119 = arith.constant 0 : index
      %404 = vector.load %arg8[%c0_116, %c0_117, %c0_118, %c0_119] : memref<1x2x2x32xf32, #tpu.memory_space<vmem>>, vector<1x1x2x32xf32>
      %405 = vector.shape_cast %404 : vector<1x1x2x32xf32> to vector<2x32xf32>
      %406 = vector.shape_cast %379 : vector<2x32xf32> to vector<1x1x2x32xf32>
      tpu.vector_store %arg8[%c0_116, %c0_117, %c0_118, %c0_119], %406 {strides = array<i32>} : memref<1x2x2x32xf32, #tpu.memory_space<vmem>>, vector<1x1x2x32xf32>,
      %c0_120 = arith.constant 0 : index
      %c0_121 = arith.constant 0 : index
      %c0_122 = arith.constant 0 : index
      %c0_123 = arith.constant 0 : index
      %407 = vector.load %arg9[%c0_120, %c0_121, %c0_122, %c0_123] : memref<1x2x2x32xf32, #tpu.memory_space<vmem>>, vector<1x1x2x32xf32>
      %408 = vector.shape_cast %407 : vector<1x1x2x32xf32> to vector<2x32xf32>
      %409 = vector.shape_cast %377 : vector<2x32xf32> to vector<1x1x2x32xf32>
      tpu.vector_store %arg9[%c0_120, %c0_121, %c0_122, %c0_123], %409 {strides = array<i32>} : memref<1x2x2x32xf32, #tpu.memory_space<vmem>>, vector<1x1x2x32xf32>,
      %c0_124 = arith.constant 0 : index
      %c1_125 = arith.constant 1 : index
      %c0_126 = arith.constant 0 : index
      %c0_127 = arith.constant 0 : index
      %410 = vector.load %arg8[%c0_124, %c1_125, %c0_126, %c0_127] : memref<1x2x2x32xf32, #tpu.memory_space<vmem>>, vector<1x1x2x32xf32>
      %411 = vector.shape_cast %410 : vector<1x1x2x32xf32> to vector<2x32xf32>
      %412 = vector.shape_cast %400 : vector<2x32xf32> to vector<1x1x2x32xf32>
      tpu.vector_store %arg8[%c0_124, %c1_125, %c0_126, %c0_127], %412 {strides = array<i32>} : memref<1x2x2x32xf32, #tpu.memory_space<vmem>>, vector<1x1x2x32xf32>,
      %c0_128 = arith.constant 0 : index
      %c1_129 = arith.constant 1 : index
      %c0_130 = arith.constant 0 : index
      %c0_131 = arith.constant 0 : index
      %413 = vector.load %arg9[%c0_128, %c1_129, %c0_130, %c0_131] : memref<1x2x2x32xf32, #tpu.memory_space<vmem>>, vector<1x1x2x32xf32>
      %414 = vector.shape_cast %413 : vector<1x1x2x32xf32> to vector<2x32xf32>
      %415 = vector.shape_cast %398 : vector<2x32xf32> to vector<1x1x2x32xf32>
      tpu.vector_store %arg9[%c0_128, %c1_129, %c0_130, %c0_131], %415 {strides = array<i32>} : memref<1x2x2x32xf32, #tpu.memory_space<vmem>>, vector<1x1x2x32xf32>,
    } else {
    }
    %c1_i32 = arith.constant 1 : i32
    %17 = arith.cmpi eq, %arg0, %c1_i32 : i32
    %18 = arith.extui %17 : i1 to i32
    %c0_i32_26 = arith.constant 0 : i32
    %19 = arith.cmpi ne, %18, %c0_i32_26 : i32
    scf.if %19 {
      %c0_27 = arith.constant 0 : index
      %c0_28 = arith.constant 0 : index
      %c0_29 = arith.constant 0 : index
      %c0_30 = arith.constant 0 : index
      %20 = vector.load %arg5[%c0_27, %c0_28, %c0_29, %c0_30] : memref<1x2x2x32xf32, #tpu.memory_space<vmem>>, vector<1x1x2x32xf32>
      %21 = vector.shape_cast %20 : vector<1x1x2x32xf32> to vector<2x32xf32>
      %c0_31 = arith.constant 0 : index
      %c1_32 = arith.constant 1 : index
      %c0_33 = arith.constant 0 : index
      %c0_34 = arith.constant 0 : index
      %22 = vector.load %arg5[%c0_31, %c1_32, %c0_33, %c0_34] : memref<1x2x2x32xf32, #tpu.memory_space<vmem>>, vector<1x1x2x32xf32>
      %23 = vector.shape_cast %22 : vector<1x1x2x32xf32> to vector<2x32xf32>
      %c0_35 = arith.constant 0 : index
      %c0_36 = arith.constant 0 : index
      %c0_37 = arith.constant 0 : index
      %c0_38 = arith.constant 0 : index
      %24 = vector.load %arg6[%c0_35, %c0_36, %c0_37, %c0_38] : memref<1x2x2x32xf32, #tpu.memory_space<vmem>>, vector<1x1x2x32xf32>
      %25 = vector.shape_cast %24 : vector<1x1x2x32xf32> to vector<2x32xf32>
      %c0_39 = arith.constant 0 : index
      %c1_40 = arith.constant 1 : index
      %c0_41 = arith.constant 0 : index
      %c0_42 = arith.constant 0 : index
      %26 = vector.load %arg6[%c0_39, %c1_40, %c0_41, %c0_42] : memref<1x2x2x32xf32, #tpu.memory_space<vmem>>, vector<1x1x2x32xf32>
      %27 = vector.shape_cast %26 : vector<1x1x2x32xf32> to vector<2x32xf32>
      %28 = vector.extract_strided_slice %1 {offsets = [7, 0, 0], sizes = [1, 2, 32], strides = [1, 1, 1]} : vector<8x2x32xf32> to vector<1x2x32xf32>
      %29 = vector.shape_cast %28 : vector<1x2x32xf32> to vector<2x32xf32>
      %cst = arith.constant dense<0.000000e+00> : vector<2x128xf32>
      %30 = tpu.matmul %29, %3, %cst {dimension_numbers = #tpu.dot_dimension_numbers<[1], [0], [0], [1], [0, 0, 1, 1], [], []>} : vector<2x32xf32>, vector<32x128xf32>, vector<2x128xf32> -> vector<2x128xf32>
      %cst_43 = arith.constant dense<0.000000e+00> : vector<2x128xf32>
      %31 = tpu.matmul %21, %7, %cst_43 {dimension_numbers = #tpu.dot_dimension_numbers<[1], [0], [0], [1], [0, 0, 1, 1], [], []>} : vector<2x32xf32>, vector<32x128xf32>, vector<2x128xf32> -> vector<2x128xf32>
      %32 = arith.addf %30, %31 : vector<2x128xf32>
      %33 = vector.broadcast %11 : vector<1x128xf32> to vector<2x128xf32>
      %34 = arith.addf %32, %33 : vector<2x128xf32>
      %35 = vector.extract_strided_slice %34 {offsets = [0, 0], sizes = [2, 32], strides = [1, 1]} : vector<2x128xf32> to vector<2x32xf32>
      %36 = math.tanh %35 : vector<2x32xf32>
      %37 = vector.extract_strided_slice %34 {offsets = [0, 32], sizes = [2, 96], strides = [1, 1]} : vector<2x128xf32> to vector<2x96xf32>
      %38 = arith.negf %37 : vector<2x96xf32>
      %39 = math.exp %38 : vector<2x96xf32>
      %cst_44 = arith.constant 1.000000e+00 : f32
      %40 = vector.broadcast %cst_44 : f32 to vector<2x96xf32>
      %41 = arith.addf %40, %39 : vector<2x96xf32>
      %42 = arith.divf %40, %41 : vector<2x96xf32>
      %43 = vector.extract_strided_slice %42 {offsets = [0, 0], sizes = [2, 32], strides = [1, 1]} : vector<2x96xf32> to vector<2x32xf32>
      %44 = vector.extract_strided_slice %42 {offsets = [0, 32], sizes = [2, 32], strides = [1, 1]} : vector<2x96xf32> to vector<2x32xf32>
      %45 = vector.extract_strided_slice %42 {offsets = [0, 64], sizes = [2, 32], strides = [1, 1]} : vector<2x96xf32> to vector<2x32xf32>
      %46 = arith.mulf %43, %25 : vector<2x32xf32>
      %47 = arith.mulf %44, %36 : vector<2x32xf32>
      %48 = arith.addf %46, %47 : vector<2x32xf32>
      %49 = math.tanh %48 : vector<2x32xf32>
      %50 = arith.mulf %45, %49 : vector<2x32xf32>
      %cst_45 = arith.constant dense<0.000000e+00> : vector<2x128xf32>
      %51 = tpu.matmul %50, %5, %cst_45 {dimension_numbers = #tpu.dot_dimension_numbers<[1], [0], [0], [1], [0, 0, 1, 1], [], []>} : vector<2x32xf32>, vector<32x128xf32>, vector<2x128xf32> -> vector<2x128xf32>
      %cst_46 = arith.constant dense<0.000000e+00> : vector<2x128xf32>
      %52 = tpu.matmul %23, %9, %cst_46 {dimension_numbers = #tpu.dot_dimension_numbers<[1], [0], [0], [1], [0, 0, 1, 1], [], []>} : vector<2x32xf32>, vector<32x128xf32>, vector<2x128xf32> -> vector<2x128xf32>
      %53 = arith.addf %51, %52 : vector<2x128xf32>
      %54 = vector.broadcast %13 : vector<1x128xf32> to vector<2x128xf32>
      %55 = arith.addf %53, %54 : vector<2x128xf32>
      %56 = vector.extract_strided_slice %55 {offsets = [0, 0], sizes = [2, 32], strides = [1, 1]} : vector<2x128xf32> to vector<2x32xf32>
      %57 = math.tanh %56 : vector<2x32xf32>
      %58 = vector.extract_strided_slice %55 {offsets = [0, 32], sizes = [2, 96], strides = [1, 1]} : vector<2x128xf32> to vector<2x96xf32>
      %59 = arith.negf %58 : vector<2x96xf32>
      %60 = math.exp %59 : vector<2x96xf32>
      %cst_47 = arith.constant 1.000000e+00 : f32
      %61 = vector.broadcast %cst_47 : f32 to vector<2x96xf32>
      %62 = arith.addf %61, %60 : vector<2x96xf32>
      %63 = arith.divf %61, %62 : vector<2x96xf32>
      %64 = vector.extract_strided_slice %63 {offsets = [0, 0], sizes = [2, 32], strides = [1, 1]} : vector<2x96xf32> to vector<2x32xf32>
      %65 = vector.extract_strided_slice %63 {offsets = [0, 32], sizes = [2, 32], strides = [1, 1]} : vector<2x96xf32> to vector<2x32xf32>
      %66 = vector.extract_strided_slice %63 {offsets = [0, 64], sizes = [2, 32], strides = [1, 1]} : vector<2x96xf32> to vector<2x32xf32>
      %67 = arith.mulf %64, %27 : vector<2x32xf32>
      %68 = arith.mulf %65, %57 : vector<2x32xf32>
      %69 = arith.addf %67, %68 : vector<2x32xf32>
      %70 = math.tanh %69 : vector<2x32xf32>
      %71 = arith.mulf %66, %70 : vector<2x32xf32>
      %c0_48 = arith.constant 0 : index
      %c7 = arith.constant 7 : index
      %c0_49 = arith.constant 0 : index
      %c0_50 = arith.constant 0 : index
      %72 = vector.load %arg7[%c0_48, %c7, %c0_49, %c0_50] : memref<1x8x2x32xf32, #tpu.memory_space<vmem>>, vector<1x1x2x32xf32>
      %73 = vector.shape_cast %72 : vector<1x1x2x32xf32> to vector<2x32xf32>
      %74 = vector.shape_cast %71 : vector<2x32xf32> to vector<1x1x2x32xf32>
      tpu.vector_store %arg7[%c0_48, %c7, %c0_49, %c0_50], %74 {strides = array<i32>} : memref<1x8x2x32xf32, #tpu.memory_space<vmem>>, vector<1x1x2x32xf32>,
      %75 = vector.extract_strided_slice %1 {offsets = [6, 0, 0], sizes = [1, 2, 32], strides = [1, 1, 1]} : vector<8x2x32xf32> to vector<1x2x32xf32>
      %76 = vector.shape_cast %75 : vector<1x2x32xf32> to vector<2x32xf32>
      %cst_51 = arith.constant dense<0.000000e+00> : vector<2x128xf32>
      %77 = tpu.matmul %76, %3, %cst_51 {dimension_numbers = #tpu.dot_dimension_numbers<[1], [0], [0], [1], [0, 0, 1, 1], [], []>} : vector<2x32xf32>, vector<32x128xf32>, vector<2x128xf32> -> vector<2x128xf32>
      %cst_52 = arith.constant dense<0.000000e+00> : vector<2x128xf32>
      %78 = tpu.matmul %50, %7, %cst_52 {dimension_numbers = #tpu.dot_dimension_numbers<[1], [0], [0], [1], [0, 0, 1, 1], [], []>} : vector<2x32xf32>, vector<32x128xf32>, vector<2x128xf32> -> vector<2x128xf32>
      %79 = arith.addf %77, %78 : vector<2x128xf32>
      %80 = vector.broadcast %11 : vector<1x128xf32> to vector<2x128xf32>
      %81 = arith.addf %79, %80 : vector<2x128xf32>
      %82 = vector.extract_strided_slice %81 {offsets = [0, 0], sizes = [2, 32], strides = [1, 1]} : vector<2x128xf32> to vector<2x32xf32>
      %83 = math.tanh %82 : vector<2x32xf32>
      %84 = vector.extract_strided_slice %81 {offsets = [0, 32], sizes = [2, 96], strides = [1, 1]} : vector<2x128xf32> to vector<2x96xf32>
      %85 = arith.negf %84 : vector<2x96xf32>
      %86 = math.exp %85 : vector<2x96xf32>
      %cst_53 = arith.constant 1.000000e+00 : f32
      %87 = vector.broadcast %cst_53 : f32 to vector<2x96xf32>
      %88 = arith.addf %87, %86 : vector<2x96xf32>
      %89 = arith.divf %87, %88 : vector<2x96xf32>
      %90 = vector.extract_strided_slice %89 {offsets = [0, 0], sizes = [2, 32], strides = [1, 1]} : vector<2x96xf32> to vector<2x32xf32>
      %91 = vector.extract_strided_slice %89 {offsets = [0, 32], sizes = [2, 32], strides = [1, 1]} : vector<2x96xf32> to vector<2x32xf32>
      %92 = vector.extract_strided_slice %89 {offsets = [0, 64], sizes = [2, 32], strides = [1, 1]} : vector<2x96xf32> to vector<2x32xf32>
      %93 = arith.mulf %90, %48 : vector<2x32xf32>
      %94 = arith.mulf %91, %83 : vector<2x32xf32>
      %95 = arith.addf %93, %94 : vector<2x32xf32>
      %96 = math.tanh %95 : vector<2x32xf32>
      %97 = arith.mulf %92, %96 : vector<2x32xf32>
      %cst_54 = arith.constant dense<0.000000e+00> : vector<2x128xf32>
      %98 = tpu.matmul %97, %5, %cst_54 {dimension_numbers = #tpu.dot_dimension_numbers<[1], [0], [0], [1], [0, 0, 1, 1], [], []>} : vector<2x32xf32>, vector<32x128xf32>, vector<2x128xf32> -> vector<2x128xf32>
      %cst_55 = arith.constant dense<0.000000e+00> : vector<2x128xf32>
      %99 = tpu.matmul %71, %9, %cst_55 {dimension_numbers = #tpu.dot_dimension_numbers<[1], [0], [0], [1], [0, 0, 1, 1], [], []>} : vector<2x32xf32>, vector<32x128xf32>, vector<2x128xf32> -> vector<2x128xf32>
      %100 = arith.addf %98, %99 : vector<2x128xf32>
      %101 = vector.broadcast %13 : vector<1x128xf32> to vector<2x128xf32>
      %102 = arith.addf %100, %101 : vector<2x128xf32>
      %103 = vector.extract_strided_slice %102 {offsets = [0, 0], sizes = [2, 32], strides = [1, 1]} : vector<2x128xf32> to vector<2x32xf32>
      %104 = math.tanh %103 : vector<2x32xf32>
      %105 = vector.extract_strided_slice %102 {offsets = [0, 32], sizes = [2, 96], strides = [1, 1]} : vector<2x128xf32> to vector<2x96xf32>
      %106 = arith.negf %105 : vector<2x96xf32>
      %107 = math.exp %106 : vector<2x96xf32>
      %cst_56 = arith.constant 1.000000e+00 : f32
      %108 = vector.broadcast %cst_56 : f32 to vector<2x96xf32>
      %109 = arith.addf %108, %107 : vector<2x96xf32>
      %110 = arith.divf %108, %109 : vector<2x96xf32>
      %111 = vector.extract_strided_slice %110 {offsets = [0, 0], sizes = [2, 32], strides = [1, 1]} : vector<2x96xf32> to vector<2x32xf32>
      %112 = vector.extract_strided_slice %110 {offsets = [0, 32], sizes = [2, 32], strides = [1, 1]} : vector<2x96xf32> to vector<2x32xf32>
      %113 = vector.extract_strided_slice %110 {offsets = [0, 64], sizes = [2, 32], strides = [1, 1]} : vector<2x96xf32> to vector<2x32xf32>
      %114 = arith.mulf %111, %69 : vector<2x32xf32>
      %115 = arith.mulf %112, %104 : vector<2x32xf32>
      %116 = arith.addf %114, %115 : vector<2x32xf32>
      %117 = math.tanh %116 : vector<2x32xf32>
      %118 = arith.mulf %113, %117 : vector<2x32xf32>
      %c0_57 = arith.constant 0 : index
      %c6 = arith.constant 6 : index
      %c0_58 = arith.constant 0 : index
      %c0_59 = arith.constant 0 : index
      %119 = vector.load %arg7[%c0_57, %c6, %c0_58, %c0_59] : memref<1x8x2x32xf32, #tpu.memory_space<vmem>>, vector<1x1x2x32xf32>
      %120 = vector.shape_cast %119 : vector<1x1x2x32xf32> to vector<2x32xf32>
      %121 = vector.shape_cast %118 : vector<2x32xf32> to vector<1x1x2x32xf32>
      tpu.vector_store %arg7[%c0_57, %c6, %c0_58, %c0_59], %121 {strides = array<i32>} : memref<1x8x2x32xf32, #tpu.memory_space<vmem>>, vector<1x1x2x32xf32>,
      %122 = vector.extract_strided_slice %1 {offsets = [5, 0, 0], sizes = [1, 2, 32], strides = [1, 1, 1]} : vector<8x2x32xf32> to vector<1x2x32xf32>
      %123 = vector.shape_cast %122 : vector<1x2x32xf32> to vector<2x32xf32>
      %cst_60 = arith.constant dense<0.000000e+00> : vector<2x128xf32>
      %124 = tpu.matmul %123, %3, %cst_60 {dimension_numbers = #tpu.dot_dimension_numbers<[1], [0], [0], [1], [0, 0, 1, 1], [], []>} : vector<2x32xf32>, vector<32x128xf32>, vector<2x128xf32> -> vector<2x128xf32>
      %cst_61 = arith.constant dense<0.000000e+00> : vector<2x128xf32>
      %125 = tpu.matmul %97, %7, %cst_61 {dimension_numbers = #tpu.dot_dimension_numbers<[1], [0], [0], [1], [0, 0, 1, 1], [], []>} : vector<2x32xf32>, vector<32x128xf32>, vector<2x128xf32> -> vector<2x128xf32>
      %126 = arith.addf %124, %125 : vector<2x128xf32>
      %127 = vector.broadcast %11 : vector<1x128xf32> to vector<2x128xf32>
      %128 = arith.addf %126, %127 : vector<2x128xf32>
      %129 = vector.extract_strided_slice %128 {offsets = [0, 0], sizes = [2, 32], strides = [1, 1]} : vector<2x128xf32> to vector<2x32xf32>
      %130 = math.tanh %129 : vector<2x32xf32>
      %131 = vector.extract_strided_slice %128 {offsets = [0, 32], sizes = [2, 96], strides = [1, 1]} : vector<2x128xf32> to vector<2x96xf32>
      %132 = arith.negf %131 : vector<2x96xf32>
      %133 = math.exp %132 : vector<2x96xf32>
      %cst_62 = arith.constant 1.000000e+00 : f32
      %134 = vector.broadcast %cst_62 : f32 to vector<2x96xf32>
      %135 = arith.addf %134, %133 : vector<2x96xf32>
      %136 = arith.divf %134, %135 : vector<2x96xf32>
      %137 = vector.extract_strided_slice %136 {offsets = [0, 0], sizes = [2, 32], strides = [1, 1]} : vector<2x96xf32> to vector<2x32xf32>
      %138 = vector.extract_strided_slice %136 {offsets = [0, 32], sizes = [2, 32], strides = [1, 1]} : vector<2x96xf32> to vector<2x32xf32>
      %139 = vector.extract_strided_slice %136 {offsets = [0, 64], sizes = [2, 32], strides = [1, 1]} : vector<2x96xf32> to vector<2x32xf32>
      %140 = arith.mulf %137, %95 : vector<2x32xf32>
      %141 = arith.mulf %138, %130 : vector<2x32xf32>
      %142 = arith.addf %140, %141 : vector<2x32xf32>
      %143 = math.tanh %142 : vector<2x32xf32>
      %144 = arith.mulf %139, %143 : vector<2x32xf32>
      %cst_63 = arith.constant dense<0.000000e+00> : vector<2x128xf32>
      %145 = tpu.matmul %144, %5, %cst_63 {dimension_numbers = #tpu.dot_dimension_numbers<[1], [0], [0], [1], [0, 0, 1, 1], [], []>} : vector<2x32xf32>, vector<32x128xf32>, vector<2x128xf32> -> vector<2x128xf32>
      %cst_64 = arith.constant dense<0.000000e+00> : vector<2x128xf32>
      %146 = tpu.matmul %118, %9, %cst_64 {dimension_numbers = #tpu.dot_dimension_numbers<[1], [0], [0], [1], [0, 0, 1, 1], [], []>} : vector<2x32xf32>, vector<32x128xf32>, vector<2x128xf32> -> vector<2x128xf32>
      %147 = arith.addf %145, %146 : vector<2x128xf32>
      %148 = vector.broadcast %13 : vector<1x128xf32> to vector<2x128xf32>
      %149 = arith.addf %147, %148 : vector<2x128xf32>
      %150 = vector.extract_strided_slice %149 {offsets = [0, 0], sizes = [2, 32], strides = [1, 1]} : vector<2x128xf32> to vector<2x32xf32>
      %151 = math.tanh %150 : vector<2x32xf32>
      %152 = vector.extract_strided_slice %149 {offsets = [0, 32], sizes = [2, 96], strides = [1, 1]} : vector<2x128xf32> to vector<2x96xf32>
      %153 = arith.negf %152 : vector<2x96xf32>
      %154 = math.exp %153 : vector<2x96xf32>
      %cst_65 = arith.constant 1.000000e+00 : f32
      %155 = vector.broadcast %cst_65 : f32 to vector<2x96xf32>
      %156 = arith.addf %155, %154 : vector<2x96xf32>
      %157 = arith.divf %155, %156 : vector<2x96xf32>
      %158 = vector.extract_strided_slice %157 {offsets = [0, 0], sizes = [2, 32], strides = [1, 1]} : vector<2x96xf32> to vector<2x32xf32>
      %159 = vector.extract_strided_slice %157 {offsets = [0, 32], sizes = [2, 32], strides = [1, 1]} : vector<2x96xf32> to vector<2x32xf32>
      %160 = vector.extract_strided_slice %157 {offsets = [0, 64], sizes = [2, 32], strides = [1, 1]} : vector<2x96xf32> to vector<2x32xf32>
      %161 = arith.mulf %158, %116 : vector<2x32xf32>
      %162 = arith.mulf %159, %151 : vector<2x32xf32>
      %163 = arith.addf %161, %162 : vector<2x32xf32>
      %164 = math.tanh %163 : vector<2x32xf32>
      %165 = arith.mulf %160, %164 : vector<2x32xf32>
      %c0_66 = arith.constant 0 : index
      %c5 = arith.constant 5 : index
      %c0_67 = arith.constant 0 : index
      %c0_68 = arith.constant 0 : index
      %166 = vector.load %arg7[%c0_66, %c5, %c0_67, %c0_68] : memref<1x8x2x32xf32, #tpu.memory_space<vmem>>, vector<1x1x2x32xf32>
      %167 = vector.shape_cast %166 : vector<1x1x2x32xf32> to vector<2x32xf32>
      %168 = vector.shape_cast %165 : vector<2x32xf32> to vector<1x1x2x32xf32>
      tpu.vector_store %arg7[%c0_66, %c5, %c0_67, %c0_68], %168 {strides = array<i32>} : memref<1x8x2x32xf32, #tpu.memory_space<vmem>>, vector<1x1x2x32xf32>,
      %169 = vector.extract_strided_slice %1 {offsets = [4, 0, 0], sizes = [1, 2, 32], strides = [1, 1, 1]} : vector<8x2x32xf32> to vector<1x2x32xf32>
      %170 = vector.shape_cast %169 : vector<1x2x32xf32> to vector<2x32xf32>
      %cst_69 = arith.constant dense<0.000000e+00> : vector<2x128xf32>
      %171 = tpu.matmul %170, %3, %cst_69 {dimension_numbers = #tpu.dot_dimension_numbers<[1], [0], [0], [1], [0, 0, 1, 1], [], []>} : vector<2x32xf32>, vector<32x128xf32>, vector<2x128xf32> -> vector<2x128xf32>
      %cst_70 = arith.constant dense<0.000000e+00> : vector<2x128xf32>
      %172 = tpu.matmul %144, %7, %cst_70 {dimension_numbers = #tpu.dot_dimension_numbers<[1], [0], [0], [1], [0, 0, 1, 1], [], []>} : vector<2x32xf32>, vector<32x128xf32>, vector<2x128xf32> -> vector<2x128xf32>
      %173 = arith.addf %171, %172 : vector<2x128xf32>
      %174 = vector.broadcast %11 : vector<1x128xf32> to vector<2x128xf32>
      %175 = arith.addf %173, %174 : vector<2x128xf32>
      %176 = vector.extract_strided_slice %175 {offsets = [0, 0], sizes = [2, 32], strides = [1, 1]} : vector<2x128xf32> to vector<2x32xf32>
      %177 = math.tanh %176 : vector<2x32xf32>
      %178 = vector.extract_strided_slice %175 {offsets = [0, 32], sizes = [2, 96], strides = [1, 1]} : vector<2x128xf32> to vector<2x96xf32>
      %179 = arith.negf %178 : vector<2x96xf32>
      %180 = math.exp %179 : vector<2x96xf32>
      %cst_71 = arith.constant 1.000000e+00 : f32
      %181 = vector.broadcast %cst_71 : f32 to vector<2x96xf32>
      %182 = arith.addf %181, %180 : vector<2x96xf32>
      %183 = arith.divf %181, %182 : vector<2x96xf32>
      %184 = vector.extract_strided_slice %183 {offsets = [0, 0], sizes = [2, 32], strides = [1, 1]} : vector<2x96xf32> to vector<2x32xf32>
      %185 = vector.extract_strided_slice %183 {offsets = [0, 32], sizes = [2, 32], strides = [1, 1]} : vector<2x96xf32> to vector<2x32xf32>
      %186 = vector.extract_strided_slice %183 {offsets = [0, 64], sizes = [2, 32], strides = [1, 1]} : vector<2x96xf32> to vector<2x32xf32>
      %187 = arith.mulf %184, %142 : vector<2x32xf32>
      %188 = arith.mulf %185, %177 : vector<2x32xf32>
      %189 = arith.addf %187, %188 : vector<2x32xf32>
      %190 = math.tanh %189 : vector<2x32xf32>
      %191 = arith.mulf %186, %190 : vector<2x32xf32>
      %cst_72 = arith.constant dense<0.000000e+00> : vector<2x128xf32>
      %192 = tpu.matmul %191, %5, %cst_72 {dimension_numbers = #tpu.dot_dimension_numbers<[1], [0], [0], [1], [0, 0, 1, 1], [], []>} : vector<2x32xf32>, vector<32x128xf32>, vector<2x128xf32> -> vector<2x128xf32>
      %cst_73 = arith.constant dense<0.000000e+00> : vector<2x128xf32>
      %193 = tpu.matmul %165, %9, %cst_73 {dimension_numbers = #tpu.dot_dimension_numbers<[1], [0], [0], [1], [0, 0, 1, 1], [], []>} : vector<2x32xf32>, vector<32x128xf32>, vector<2x128xf32> -> vector<2x128xf32>
      %194 = arith.addf %192, %193 : vector<2x128xf32>
      %195 = vector.broadcast %13 : vector<1x128xf32> to vector<2x128xf32>
      %196 = arith.addf %194, %195 : vector<2x128xf32>
      %197 = vector.extract_strided_slice %196 {offsets = [0, 0], sizes = [2, 32], strides = [1, 1]} : vector<2x128xf32> to vector<2x32xf32>
      %198 = math.tanh %197 : vector<2x32xf32>
      %199 = vector.extract_strided_slice %196 {offsets = [0, 32], sizes = [2, 96], strides = [1, 1]} : vector<2x128xf32> to vector<2x96xf32>
      %200 = arith.negf %199 : vector<2x96xf32>
      %201 = math.exp %200 : vector<2x96xf32>
      %cst_74 = arith.constant 1.000000e+00 : f32
      %202 = vector.broadcast %cst_74 : f32 to vector<2x96xf32>
      %203 = arith.addf %202, %201 : vector<2x96xf32>
      %204 = arith.divf %202, %203 : vector<2x96xf32>
      %205 = vector.extract_strided_slice %204 {offsets = [0, 0], sizes = [2, 32], strides = [1, 1]} : vector<2x96xf32> to vector<2x32xf32>
      %206 = vector.extract_strided_slice %204 {offsets = [0, 32], sizes = [2, 32], strides = [1, 1]} : vector<2x96xf32> to vector<2x32xf32>
      %207 = vector.extract_strided_slice %204 {offsets = [0, 64], sizes = [2, 32], strides = [1, 1]} : vector<2x96xf32> to vector<2x32xf32>
      %208 = arith.mulf %205, %163 : vector<2x32xf32>
      %209 = arith.mulf %206, %198 : vector<2x32xf32>
      %210 = arith.addf %208, %209 : vector<2x32xf32>
      %211 = math.tanh %210 : vector<2x32xf32>
      %212 = arith.mulf %207, %211 : vector<2x32xf32>
      %c0_75 = arith.constant 0 : index
      %c4 = arith.constant 4 : index
      %c0_76 = arith.constant 0 : index
      %c0_77 = arith.constant 0 : index
      %213 = vector.load %arg7[%c0_75, %c4, %c0_76, %c0_77] : memref<1x8x2x32xf32, #tpu.memory_space<vmem>>, vector<1x1x2x32xf32>
      %214 = vector.shape_cast %213 : vector<1x1x2x32xf32> to vector<2x32xf32>
      %215 = vector.shape_cast %212 : vector<2x32xf32> to vector<1x1x2x32xf32>
      tpu.vector_store %arg7[%c0_75, %c4, %c0_76, %c0_77], %215 {strides = array<i32>} : memref<1x8x2x32xf32, #tpu.memory_space<vmem>>, vector<1x1x2x32xf32>,
      %216 = vector.extract_strided_slice %1 {offsets = [3, 0, 0], sizes = [1, 2, 32], strides = [1, 1, 1]} : vector<8x2x32xf32> to vector<1x2x32xf32>
      %217 = vector.shape_cast %216 : vector<1x2x32xf32> to vector<2x32xf32>
      %cst_78 = arith.constant dense<0.000000e+00> : vector<2x128xf32>
      %218 = tpu.matmul %217, %3, %cst_78 {dimension_numbers = #tpu.dot_dimension_numbers<[1], [0], [0], [1], [0, 0, 1, 1], [], []>} : vector<2x32xf32>, vector<32x128xf32>, vector<2x128xf32> -> vector<2x128xf32>
      %cst_79 = arith.constant dense<0.000000e+00> : vector<2x128xf32>
      %219 = tpu.matmul %191, %7, %cst_79 {dimension_numbers = #tpu.dot_dimension_numbers<[1], [0], [0], [1], [0, 0, 1, 1], [], []>} : vector<2x32xf32>, vector<32x128xf32>, vector<2x128xf32> -> vector<2x128xf32>
      %220 = arith.addf %218, %219 : vector<2x128xf32>
      %221 = vector.broadcast %11 : vector<1x128xf32> to vector<2x128xf32>
      %222 = arith.addf %220, %221 : vector<2x128xf32>
      %223 = vector.extract_strided_slice %222 {offsets = [0, 0], sizes = [2, 32], strides = [1, 1]} : vector<2x128xf32> to vector<2x32xf32>
      %224 = math.tanh %223 : vector<2x32xf32>
      %225 = vector.extract_strided_slice %222 {offsets = [0, 32], sizes = [2, 96], strides = [1, 1]} : vector<2x128xf32> to vector<2x96xf32>
      %226 = arith.negf %225 : vector<2x96xf32>
      %227 = math.exp %226 : vector<2x96xf32>
      %cst_80 = arith.constant 1.000000e+00 : f32
      %228 = vector.broadcast %cst_80 : f32 to vector<2x96xf32>
      %229 = arith.addf %228, %227 : vector<2x96xf32>
      %230 = arith.divf %228, %229 : vector<2x96xf32>
      %231 = vector.extract_strided_slice %230 {offsets = [0, 0], sizes = [2, 32], strides = [1, 1]} : vector<2x96xf32> to vector<2x32xf32>
      %232 = vector.extract_strided_slice %230 {offsets = [0, 32], sizes = [2, 32], strides = [1, 1]} : vector<2x96xf32> to vector<2x32xf32>
      %233 = vector.extract_strided_slice %230 {offsets = [0, 64], sizes = [2, 32], strides = [1, 1]} : vector<2x96xf32> to vector<2x32xf32>
      %234 = arith.mulf %231, %189 : vector<2x32xf32>
      %235 = arith.mulf %232, %224 : vector<2x32xf32>
      %236 = arith.addf %234, %235 : vector<2x32xf32>
      %237 = math.tanh %236 : vector<2x32xf32>
      %238 = arith.mulf %233, %237 : vector<2x32xf32>
      %cst_81 = arith.constant dense<0.000000e+00> : vector<2x128xf32>
      %239 = tpu.matmul %238, %5, %cst_81 {dimension_numbers = #tpu.dot_dimension_numbers<[1], [0], [0], [1], [0, 0, 1, 1], [], []>} : vector<2x32xf32>, vector<32x128xf32>, vector<2x128xf32> -> vector<2x128xf32>
      %cst_82 = arith.constant dense<0.000000e+00> : vector<2x128xf32>
      %240 = tpu.matmul %212, %9, %cst_82 {dimension_numbers = #tpu.dot_dimension_numbers<[1], [0], [0], [1], [0, 0, 1, 1], [], []>} : vector<2x32xf32>, vector<32x128xf32>, vector<2x128xf32> -> vector<2x128xf32>
      %241 = arith.addf %239, %240 : vector<2x128xf32>
      %242 = vector.broadcast %13 : vector<1x128xf32> to vector<2x128xf32>
      %243 = arith.addf %241, %242 : vector<2x128xf32>
      %244 = vector.extract_strided_slice %243 {offsets = [0, 0], sizes = [2, 32], strides = [1, 1]} : vector<2x128xf32> to vector<2x32xf32>
      %245 = math.tanh %244 : vector<2x32xf32>
      %246 = vector.extract_strided_slice %243 {offsets = [0, 32], sizes = [2, 96], strides = [1, 1]} : vector<2x128xf32> to vector<2x96xf32>
      %247 = arith.negf %246 : vector<2x96xf32>
      %248 = math.exp %247 : vector<2x96xf32>
      %cst_83 = arith.constant 1.000000e+00 : f32
      %249 = vector.broadcast %cst_83 : f32 to vector<2x96xf32>
      %250 = arith.addf %249, %248 : vector<2x96xf32>
      %251 = arith.divf %249, %250 : vector<2x96xf32>
      %252 = vector.extract_strided_slice %251 {offsets = [0, 0], sizes = [2, 32], strides = [1, 1]} : vector<2x96xf32> to vector<2x32xf32>
      %253 = vector.extract_strided_slice %251 {offsets = [0, 32], sizes = [2, 32], strides = [1, 1]} : vector<2x96xf32> to vector<2x32xf32>
      %254 = vector.extract_strided_slice %251 {offsets = [0, 64], sizes = [2, 32], strides = [1, 1]} : vector<2x96xf32> to vector<2x32xf32>
      %255 = arith.mulf %252, %210 : vector<2x32xf32>
      %256 = arith.mulf %253, %245 : vector<2x32xf32>
      %257 = arith.addf %255, %256 : vector<2x32xf32>
      %258 = math.tanh %257 : vector<2x32xf32>
      %259 = arith.mulf %254, %258 : vector<2x32xf32>
      %c0_84 = arith.constant 0 : index
      %c3 = arith.constant 3 : index
      %c0_85 = arith.constant 0 : index
      %c0_86 = arith.constant 0 : index
      %260 = vector.load %arg7[%c0_84, %c3, %c0_85, %c0_86] : memref<1x8x2x32xf32, #tpu.memory_space<vmem>>, vector<1x1x2x32xf32>
      %261 = vector.shape_cast %260 : vector<1x1x2x32xf32> to vector<2x32xf32>
      %262 = vector.shape_cast %259 : vector<2x32xf32> to vector<1x1x2x32xf32>
      tpu.vector_store %arg7[%c0_84, %c3, %c0_85, %c0_86], %262 {strides = array<i32>} : memref<1x8x2x32xf32, #tpu.memory_space<vmem>>, vector<1x1x2x32xf32>,
      %263 = vector.extract_strided_slice %1 {offsets = [2, 0, 0], sizes = [1, 2, 32], strides = [1, 1, 1]} : vector<8x2x32xf32> to vector<1x2x32xf32>
      %264 = vector.shape_cast %263 : vector<1x2x32xf32> to vector<2x32xf32>
      %cst_87 = arith.constant dense<0.000000e+00> : vector<2x128xf32>
      %265 = tpu.matmul %264, %3, %cst_87 {dimension_numbers = #tpu.dot_dimension_numbers<[1], [0], [0], [1], [0, 0, 1, 1], [], []>} : vector<2x32xf32>, vector<32x128xf32>, vector<2x128xf32> -> vector<2x128xf32>
      %cst_88 = arith.constant dense<0.000000e+00> : vector<2x128xf32>
      %266 = tpu.matmul %238, %7, %cst_88 {dimension_numbers = #tpu.dot_dimension_numbers<[1], [0], [0], [1], [0, 0, 1, 1], [], []>} : vector<2x32xf32>, vector<32x128xf32>, vector<2x128xf32> -> vector<2x128xf32>
      %267 = arith.addf %265, %266 : vector<2x128xf32>
      %268 = vector.broadcast %11 : vector<1x128xf32> to vector<2x128xf32>
      %269 = arith.addf %267, %268 : vector<2x128xf32>
      %270 = vector.extract_strided_slice %269 {offsets = [0, 0], sizes = [2, 32], strides = [1, 1]} : vector<2x128xf32> to vector<2x32xf32>
      %271 = math.tanh %270 : vector<2x32xf32>
      %272 = vector.extract_strided_slice %269 {offsets = [0, 32], sizes = [2, 96], strides = [1, 1]} : vector<2x128xf32> to vector<2x96xf32>
      %273 = arith.negf %272 : vector<2x96xf32>
      %274 = math.exp %273 : vector<2x96xf32>
      %cst_89 = arith.constant 1.000000e+00 : f32
      %275 = vector.broadcast %cst_89 : f32 to vector<2x96xf32>
      %276 = arith.addf %275, %274 : vector<2x96xf32>
      %277 = arith.divf %275, %276 : vector<2x96xf32>
      %278 = vector.extract_strided_slice %277 {offsets = [0, 0], sizes = [2, 32], strides = [1, 1]} : vector<2x96xf32> to vector<2x32xf32>
      %279 = vector.extract_strided_slice %277 {offsets = [0, 32], sizes = [2, 32], strides = [1, 1]} : vector<2x96xf32> to vector<2x32xf32>
      %280 = vector.extract_strided_slice %277 {offsets = [0, 64], sizes = [2, 32], strides = [1, 1]} : vector<2x96xf32> to vector<2x32xf32>
      %281 = arith.mulf %278, %236 : vector<2x32xf32>
      %282 = arith.mulf %279, %271 : vector<2x32xf32>
      %283 = arith.addf %281, %282 : vector<2x32xf32>
      %284 = math.tanh %283 : vector<2x32xf32>
      %285 = arith.mulf %280, %284 : vector<2x32xf32>
      %cst_90 = arith.constant dense<0.000000e+00> : vector<2x128xf32>
      %286 = tpu.matmul %285, %5, %cst_90 {dimension_numbers = #tpu.dot_dimension_numbers<[1], [0], [0], [1], [0, 0, 1, 1], [], []>} : vector<2x32xf32>, vector<32x128xf32>, vector<2x128xf32> -> vector<2x128xf32>
      %cst_91 = arith.constant dense<0.000000e+00> : vector<2x128xf32>
      %287 = tpu.matmul %259, %9, %cst_91 {dimension_numbers = #tpu.dot_dimension_numbers<[1], [0], [0], [1], [0, 0, 1, 1], [], []>} : vector<2x32xf32>, vector<32x128xf32>, vector<2x128xf32> -> vector<2x128xf32>
      %288 = arith.addf %286, %287 : vector<2x128xf32>
      %289 = vector.broadcast %13 : vector<1x128xf32> to vector<2x128xf32>
      %290 = arith.addf %288, %289 : vector<2x128xf32>
      %291 = vector.extract_strided_slice %290 {offsets = [0, 0], sizes = [2, 32], strides = [1, 1]} : vector<2x128xf32> to vector<2x32xf32>
      %292 = math.tanh %291 : vector<2x32xf32>
      %293 = vector.extract_strided_slice %290 {offsets = [0, 32], sizes = [2, 96], strides = [1, 1]} : vector<2x128xf32> to vector<2x96xf32>
      %294 = arith.negf %293 : vector<2x96xf32>
      %295 = math.exp %294 : vector<2x96xf32>
      %cst_92 = arith.constant 1.000000e+00 : f32
      %296 = vector.broadcast %cst_92 : f32 to vector<2x96xf32>
      %297 = arith.addf %296, %295 : vector<2x96xf32>
      %298 = arith.divf %296, %297 : vector<2x96xf32>
      %299 = vector.extract_strided_slice %298 {offsets = [0, 0], sizes = [2, 32], strides = [1, 1]} : vector<2x96xf32> to vector<2x32xf32>
      %300 = vector.extract_strided_slice %298 {offsets = [0, 32], sizes = [2, 32], strides = [1, 1]} : vector<2x96xf32> to vector<2x32xf32>
      %301 = vector.extract_strided_slice %298 {offsets = [0, 64], sizes = [2, 32], strides = [1, 1]} : vector<2x96xf32> to vector<2x32xf32>
      %302 = arith.mulf %299, %257 : vector<2x32xf32>
      %303 = arith.mulf %300, %292 : vector<2x32xf32>
      %304 = arith.addf %302, %303 : vector<2x32xf32>
      %305 = math.tanh %304 : vector<2x32xf32>
      %306 = arith.mulf %301, %305 : vector<2x32xf32>
      %c0_93 = arith.constant 0 : index
      %c2 = arith.constant 2 : index
      %c0_94 = arith.constant 0 : index
      %c0_95 = arith.constant 0 : index
      %307 = vector.load %arg7[%c0_93, %c2, %c0_94, %c0_95] : memref<1x8x2x32xf32, #tpu.memory_space<vmem>>, vector<1x1x2x32xf32>
      %308 = vector.shape_cast %307 : vector<1x1x2x32xf32> to vector<2x32xf32>
      %309 = vector.shape_cast %306 : vector<2x32xf32> to vector<1x1x2x32xf32>
      tpu.vector_store %arg7[%c0_93, %c2, %c0_94, %c0_95], %309 {strides = array<i32>} : memref<1x8x2x32xf32, #tpu.memory_space<vmem>>, vector<1x1x2x32xf32>,
      %310 = vector.extract_strided_slice %1 {offsets = [1, 0, 0], sizes = [1, 2, 32], strides = [1, 1, 1]} : vector<8x2x32xf32> to vector<1x2x32xf32>
      %311 = vector.shape_cast %310 : vector<1x2x32xf32> to vector<2x32xf32>
      %cst_96 = arith.constant dense<0.000000e+00> : vector<2x128xf32>
      %312 = tpu.matmul %311, %3, %cst_96 {dimension_numbers = #tpu.dot_dimension_numbers<[1], [0], [0], [1], [0, 0, 1, 1], [], []>} : vector<2x32xf32>, vector<32x128xf32>, vector<2x128xf32> -> vector<2x128xf32>
      %cst_97 = arith.constant dense<0.000000e+00> : vector<2x128xf32>
      %313 = tpu.matmul %285, %7, %cst_97 {dimension_numbers = #tpu.dot_dimension_numbers<[1], [0], [0], [1], [0, 0, 1, 1], [], []>} : vector<2x32xf32>, vector<32x128xf32>, vector<2x128xf32> -> vector<2x128xf32>
      %314 = arith.addf %312, %313 : vector<2x128xf32>
      %315 = vector.broadcast %11 : vector<1x128xf32> to vector<2x128xf32>
      %316 = arith.addf %314, %315 : vector<2x128xf32>
      %317 = vector.extract_strided_slice %316 {offsets = [0, 0], sizes = [2, 32], strides = [1, 1]} : vector<2x128xf32> to vector<2x32xf32>
      %318 = math.tanh %317 : vector<2x32xf32>
      %319 = vector.extract_strided_slice %316 {offsets = [0, 32], sizes = [2, 96], strides = [1, 1]} : vector<2x128xf32> to vector<2x96xf32>
      %320 = arith.negf %319 : vector<2x96xf32>
      %321 = math.exp %320 : vector<2x96xf32>
      %cst_98 = arith.constant 1.000000e+00 : f32
      %322 = vector.broadcast %cst_98 : f32 to vector<2x96xf32>
      %323 = arith.addf %322, %321 : vector<2x96xf32>
      %324 = arith.divf %322, %323 : vector<2x96xf32>
      %325 = vector.extract_strided_slice %324 {offsets = [0, 0], sizes = [2, 32], strides = [1, 1]} : vector<2x96xf32> to vector<2x32xf32>
      %326 = vector.extract_strided_slice %324 {offsets = [0, 32], sizes = [2, 32], strides = [1, 1]} : vector<2x96xf32> to vector<2x32xf32>
      %327 = vector.extract_strided_slice %324 {offsets = [0, 64], sizes = [2, 32], strides = [1, 1]} : vector<2x96xf32> to vector<2x32xf32>
      %328 = arith.mulf %325, %283 : vector<2x32xf32>
      %329 = arith.mulf %326, %318 : vector<2x32xf32>
      %330 = arith.addf %328, %329 : vector<2x32xf32>
      %331 = math.tanh %330 : vector<2x32xf32>
      %332 = arith.mulf %327, %331 : vector<2x32xf32>
      %cst_99 = arith.constant dense<0.000000e+00> : vector<2x128xf32>
      %333 = tpu.matmul %332, %5, %cst_99 {dimension_numbers = #tpu.dot_dimension_numbers<[1], [0], [0], [1], [0, 0, 1, 1], [], []>} : vector<2x32xf32>, vector<32x128xf32>, vector<2x128xf32> -> vector<2x128xf32>
      %cst_100 = arith.constant dense<0.000000e+00> : vector<2x128xf32>
      %334 = tpu.matmul %306, %9, %cst_100 {dimension_numbers = #tpu.dot_dimension_numbers<[1], [0], [0], [1], [0, 0, 1, 1], [], []>} : vector<2x32xf32>, vector<32x128xf32>, vector<2x128xf32> -> vector<2x128xf32>
      %335 = arith.addf %333, %334 : vector<2x128xf32>
      %336 = vector.broadcast %13 : vector<1x128xf32> to vector<2x128xf32>
      %337 = arith.addf %335, %336 : vector<2x128xf32>
      %338 = vector.extract_strided_slice %337 {offsets = [0, 0], sizes = [2, 32], strides = [1, 1]} : vector<2x128xf32> to vector<2x32xf32>
      %339 = math.tanh %338 : vector<2x32xf32>
      %340 = vector.extract_strided_slice %337 {offsets = [0, 32], sizes = [2, 96], strides = [1, 1]} : vector<2x128xf32> to vector<2x96xf32>
      %341 = arith.negf %340 : vector<2x96xf32>
      %342 = math.exp %341 : vector<2x96xf32>
      %cst_101 = arith.constant 1.000000e+00 : f32
      %343 = vector.broadcast %cst_101 : f32 to vector<2x96xf32>
      %344 = arith.addf %343, %342 : vector<2x96xf32>
      %345 = arith.divf %343, %344 : vector<2x96xf32>
      %346 = vector.extract_strided_slice %345 {offsets = [0, 0], sizes = [2, 32], strides = [1, 1]} : vector<2x96xf32> to vector<2x32xf32>
      %347 = vector.extract_strided_slice %345 {offsets = [0, 32], sizes = [2, 32], strides = [1, 1]} : vector<2x96xf32> to vector<2x32xf32>
      %348 = vector.extract_strided_slice %345 {offsets = [0, 64], sizes = [2, 32], strides = [1, 1]} : vector<2x96xf32> to vector<2x32xf32>
      %349 = arith.mulf %346, %304 : vector<2x32xf32>
      %350 = arith.mulf %347, %339 : vector<2x32xf32>
      %351 = arith.addf %349, %350 : vector<2x32xf32>
      %352 = math.tanh %351 : vector<2x32xf32>
      %353 = arith.mulf %348, %352 : vector<2x32xf32>
      %c0_102 = arith.constant 0 : index
      %c1_103 = arith.constant 1 : index
      %c0_104 = arith.constant 0 : index
      %c0_105 = arith.constant 0 : index
      %354 = vector.load %arg7[%c0_102, %c1_103, %c0_104, %c0_105] : memref<1x8x2x32xf32, #tpu.memory_space<vmem>>, vector<1x1x2x32xf32>
      %355 = vector.shape_cast %354 : vector<1x1x2x32xf32> to vector<2x32xf32>
      %356 = vector.shape_cast %353 : vector<2x32xf32> to vector<1x1x2x32xf32>
      tpu.vector_store %arg7[%c0_102, %c1_103, %c0_104, %c0_105], %356 {strides = array<i32>} : memref<1x8x2x32xf32, #tpu.memory_space<vmem>>, vector<1x1x2x32xf32>,
      %357 = vector.extract_strided_slice %1 {offsets = [0, 0, 0], sizes = [1, 2, 32], strides = [1, 1, 1]} : vector<8x2x32xf32> to vector<1x2x32xf32>
      %358 = vector.shape_cast %357 : vector<1x2x32xf32> to vector<2x32xf32>
      %cst_106 = arith.constant dense<0.000000e+00> : vector<2x128xf32>
      %359 = tpu.matmul %358, %3, %cst_106 {dimension_numbers = #tpu.dot_dimension_numbers<[1], [0], [0], [1], [0, 0, 1, 1], [], []>} : vector<2x32xf32>, vector<32x128xf32>, vector<2x128xf32> -> vector<2x128xf32>
      %cst_107 = arith.constant dense<0.000000e+00> : vector<2x128xf32>
      %360 = tpu.matmul %332, %7, %cst_107 {dimension_numbers = #tpu.dot_dimension_numbers<[1], [0], [0], [1], [0, 0, 1, 1], [], []>} : vector<2x32xf32>, vector<32x128xf32>, vector<2x128xf32> -> vector<2x128xf32>
      %361 = arith.addf %359, %360 : vector<2x128xf32>
      %362 = vector.broadcast %11 : vector<1x128xf32> to vector<2x128xf32>
      %363 = arith.addf %361, %362 : vector<2x128xf32>
      %364 = vector.extract_strided_slice %363 {offsets = [0, 0], sizes = [2, 32], strides = [1, 1]} : vector<2x128xf32> to vector<2x32xf32>
      %365 = math.tanh %364 : vector<2x32xf32>
      %366 = vector.extract_strided_slice %363 {offsets = [0, 32], sizes = [2, 96], strides = [1, 1]} : vector<2x128xf32> to vector<2x96xf32>
      %367 = arith.negf %366 : vector<2x96xf32>
      %368 = math.exp %367 : vector<2x96xf32>
      %cst_108 = arith.constant 1.000000e+00 : f32
      %369 = vector.broadcast %cst_108 : f32 to vector<2x96xf32>
      %370 = arith.addf %369, %368 : vector<2x96xf32>
      %371 = arith.divf %369, %370 : vector<2x96xf32>
      %372 = vector.extract_strided_slice %371 {offsets = [0, 0], sizes = [2, 32], strides = [1, 1]} : vector<2x96xf32> to vector<2x32xf32>
      %373 = vector.extract_strided_slice %371 {offsets = [0, 32], sizes = [2, 32], strides = [1, 1]} : vector<2x96xf32> to vector<2x32xf32>
      %374 = vector.extract_strided_slice %371 {offsets = [0, 64], sizes = [2, 32], strides = [1, 1]} : vector<2x96xf32> to vector<2x32xf32>
      %375 = arith.mulf %372, %330 : vector<2x32xf32>
      %376 = arith.mulf %373, %365 : vector<2x32xf32>
      %377 = arith.addf %375, %376 : vector<2x32xf32>
      %378 = math.tanh %377 : vector<2x32xf32>
      %379 = arith.mulf %374, %378 : vector<2x32xf32>
      %cst_109 = arith.constant dense<0.000000e+00> : vector<2x128xf32>
      %380 = tpu.matmul %379, %5, %cst_109 {dimension_numbers = #tpu.dot_dimension_numbers<[1], [0], [0], [1], [0, 0, 1, 1], [], []>} : vector<2x32xf32>, vector<32x128xf32>, vector<2x128xf32> -> vector<2x128xf32>
      %cst_110 = arith.constant dense<0.000000e+00> : vector<2x128xf32>
      %381 = tpu.matmul %353, %9, %cst_110 {dimension_numbers = #tpu.dot_dimension_numbers<[1], [0], [0], [1], [0, 0, 1, 1], [], []>} : vector<2x32xf32>, vector<32x128xf32>, vector<2x128xf32> -> vector<2x128xf32>
      %382 = arith.addf %380, %381 : vector<2x128xf32>
      %383 = vector.broadcast %13 : vector<1x128xf32> to vector<2x128xf32>
      %384 = arith.addf %382, %383 : vector<2x128xf32>
      %385 = vector.extract_strided_slice %384 {offsets = [0, 0], sizes = [2, 32], strides = [1, 1]} : vector<2x128xf32> to vector<2x32xf32>
      %386 = math.tanh %385 : vector<2x32xf32>
      %387 = vector.extract_strided_slice %384 {offsets = [0, 32], sizes = [2, 96], strides = [1, 1]} : vector<2x128xf32> to vector<2x96xf32>
      %388 = arith.negf %387 : vector<2x96xf32>
      %389 = math.exp %388 : vector<2x96xf32>
      %cst_111 = arith.constant 1.000000e+00 : f32
      %390 = vector.broadcast %cst_111 : f32 to vector<2x96xf32>
      %391 = arith.addf %390, %389 : vector<2x96xf32>
      %392 = arith.divf %390, %391 : vector<2x96xf32>
      %393 = vector.extract_strided_slice %392 {offsets = [0, 0], sizes = [2, 32], strides = [1, 1]} : vector<2x96xf32> to vector<2x32xf32>
      %394 = vector.extract_strided_slice %392 {offsets = [0, 32], sizes = [2, 32], strides = [1, 1]} : vector<2x96xf32> to vector<2x32xf32>
      %395 = vector.extract_strided_slice %392 {offsets = [0, 64], sizes = [2, 32], strides = [1, 1]} : vector<2x96xf32> to vector<2x32xf32>
      %396 = arith.mulf %393, %351 : vector<2x32xf32>
      %397 = arith.mulf %394, %386 : vector<2x32xf32>
      %398 = arith.addf %396, %397 : vector<2x32xf32>
      %399 = math.tanh %398 : vector<2x32xf32>
      %400 = arith.mulf %395, %399 : vector<2x32xf32>
      %c0_112 = arith.constant 0 : index
      %c0_113 = arith.constant 0 : index
      %c0_114 = arith.constant 0 : index
      %c0_115 = arith.constant 0 : index
      %401 = vector.load %arg7[%c0_112, %c0_113, %c0_114, %c0_115] : memref<1x8x2x32xf32, #tpu.memory_space<vmem>>, vector<1x1x2x32xf32>
      %402 = vector.shape_cast %401 : vector<1x1x2x32xf32> to vector<2x32xf32>
      %403 = vector.shape_cast %400 : vector<2x32xf32> to vector<1x1x2x32xf32>
      tpu.vector_store %arg7[%c0_112, %c0_113, %c0_114, %c0_115], %403 {strides = array<i32>} : memref<1x8x2x32xf32, #tpu.memory_space<vmem>>, vector<1x1x2x32xf32>,
      %c0_116 = arith.constant 0 : index
      %c0_117 = arith.constant 0 : index
      %c0_118 = arith.constant 0 : index
      %c0_119 = arith.constant 0 : index
      %404 = vector.load %arg8[%c0_116, %c0_117, %c0_118, %c0_119] : memref<1x2x2x32xf32, #tpu.memory_space<vmem>>, vector<1x1x2x32xf32>
      %405 = vector.shape_cast %404 : vector<1x1x2x32xf32> to vector<2x32xf32>
      %406 = vector.shape_cast %379 : vector<2x32xf32> to vector<1x1x2x32xf32>
      tpu.vector_store %arg8[%c0_116, %c0_117, %c0_118, %c0_119], %406 {strides = array<i32>} : memref<1x2x2x32xf32, #tpu.memory_space<vmem>>, vector<1x1x2x32xf32>,
      %c0_120 = arith.constant 0 : index
      %c0_121 = arith.constant 0 : index
      %c0_122 = arith.constant 0 : index
      %c0_123 = arith.constant 0 : index
      %407 = vector.load %arg9[%c0_120, %c0_121, %c0_122, %c0_123] : memref<1x2x2x32xf32, #tpu.memory_space<vmem>>, vector<1x1x2x32xf32>
      %408 = vector.shape_cast %407 : vector<1x1x2x32xf32> to vector<2x32xf32>
      %409 = vector.shape_cast %377 : vector<2x32xf32> to vector<1x1x2x32xf32>
      tpu.vector_store %arg9[%c0_120, %c0_121, %c0_122, %c0_123], %409 {strides = array<i32>} : memref<1x2x2x32xf32, #tpu.memory_space<vmem>>, vector<1x1x2x32xf32>,
      %c0_124 = arith.constant 0 : index
      %c1_125 = arith.constant 1 : index
      %c0_126 = arith.constant 0 : index
      %c0_127 = arith.constant 0 : index
      %410 = vector.load %arg8[%c0_124, %c1_125, %c0_126, %c0_127] : memref<1x2x2x32xf32, #tpu.memory_space<vmem>>, vector<1x1x2x32xf32>
      %411 = vector.shape_cast %410 : vector<1x1x2x32xf32> to vector<2x32xf32>
      %412 = vector.shape_cast %400 : vector<2x32xf32> to vector<1x1x2x32xf32>
      tpu.vector_store %arg8[%c0_124, %c1_125, %c0_126, %c0_127], %412 {strides = array<i32>} : memref<1x2x2x32xf32, #tpu.memory_space<vmem>>, vector<1x1x2x32xf32>,
      %c0_128 = arith.constant 0 : index
      %c1_129 = arith.constant 1 : index
      %c0_130 = arith.constant 0 : index
      %c0_131 = arith.constant 0 : index
      %413 = vector.load %arg9[%c0_128, %c1_129, %c0_130, %c0_131] : memref<1x2x2x32xf32, #tpu.memory_space<vmem>>, vector<1x1x2x32xf32>
      %414 = vector.shape_cast %413 : vector<1x1x2x32xf32> to vector<2x32xf32>
      %415 = vector.shape_cast %398 : vector<2x32xf32> to vector<1x1x2x32xf32>
      tpu.vector_store %arg9[%c0_128, %c1_129, %c0_130, %c0_131], %415 {strides = array<i32>} : memref<1x2x2x32xf32, #tpu.memory_space<vmem>>, vector<1x1x2x32xf32>,
    } else {
    }
    return
  }
  func.func @transform_0(%arg0: i32) -> (i32, i32, i32) {
    %c0_i32 = arith.constant 0 : i32
    %c0_i32_0 = arith.constant 0 : i32
    %c0_i32_1 = arith.constant 0 : i32
    %c0_i32_2 = arith.constant 0 : i32
    return %c0_i32, %c0_i32_0, %c0_i32_1 : i32, i32, i32
  }
  func.func @transform_1(%arg0: i32) -> (i32, i32, i32, i32) {
    %c0_i32 = arith.constant 0 : i32
    %c0_i32_0 = arith.constant 0 : i32
    %c0_i32_1 = arith.constant 0 : i32
    %c0_i32_2 = arith.constant 0 : i32
    return %arg0, %c0_i32, %c0_i32_0, %c0_i32_1 : i32, i32, i32, i32
  }
  func.func @transform_2(%arg0: i32) -> (i32, i32, i32, i32) {
    %c0_i32 = arith.constant 0 : i32
    %c0_i32_0 = arith.constant 0 : i32
    %c0_i32_1 = arith.constant 0 : i32
    %c0_i32_2 = arith.constant 0 : i32
    return %arg0, %c0_i32, %c0_i32_0, %c0_i32_1 : i32, i32, i32, i32
  }
  func.func @transform_3(%arg0: i32) -> (i32, i32, i32, i32) {
    %c0_i32 = arith.constant 0 : i32
    %c0_i32_0 = arith.constant 0 : i32
    %c0_i32_1 = arith.constant 0 : i32
    %c0_i32_2 = arith.constant 0 : i32
    return %arg0, %c0_i32, %c0_i32_0, %c0_i32_1 : i32, i32, i32, i32
  }
  func.func @transform_4(%arg0: i32) -> (i32, i32, i32, i32) {
    %c0_i32 = arith.constant 0 : i32
    %c0_i32_0 = arith.constant 0 : i32
    %c0_i32_1 = arith.constant 0 : i32
    %c0_i32_2 = arith.constant 0 : i32
    return %arg0, %c0_i32, %c0_i32_0, %c0_i32_1 : i32, i32, i32, i32
  }
  func.func @transform_5(%arg0: i32) -> (i32, i32, i32, i32) {
    %c0_i32 = arith.constant 0 : i32
    %c0_i32_0 = arith.constant 0 : i32
    %c0_i32_1 = arith.constant 0 : i32
    %c0_i32_2 = arith.constant 0 : i32
    return %arg0, %c0_i32, %c0_i32_0, %c0_i32_1 : i32, i32, i32, i32
  }
  func.func @transform_6(%arg0: i32) -> (i32, i32, i32, i32) {
    %c0_i32 = arith.constant 0 : i32
    %c0_i32_0 = arith.constant 0 : i32
    %c0_i32_1 = arith.constant 0 : i32
    %c0_i32_2 = arith.constant 0 : i32
    return %arg0, %c0_i32, %c0_i32_0, %c0_i32_1 : i32, i32, i32, i32
  }
  func.func @transform_7(%arg0: i32) -> (i32, i32, i32, i32) {
    %c0_i32 = arith.constant 0 : i32
    %c0_i32_0 = arith.constant 0 : i32
    %c0_i32_1 = arith.constant 0 : i32
    %c0_i32_2 = arith.constant 0 : i32
    return %arg0, %c0_i32, %c0_i32_0, %c0_i32_1 : i32, i32, i32, i32
  }
  func.func @transform_8(%arg0: i32) -> (i32, i32, i32, i32) {
    %c0_i32 = arith.constant 0 : i32
    %c0_i32_0 = arith.constant 0 : i32
    %c0_i32_1 = arith.constant 0 : i32
    %c0_i32_2 = arith.constant 0 : i32
    return %arg0, %c0_i32, %c0_i32_0, %c0_i32_1 : i32, i32, i32, i32
  }
}

</mosaic_0001>

<bundles_post_ra>
// kernel: tpu_custom_call.1
= control target key start
LH: loop header
LB: loop body
LE: loop exit
PB: predicated region body
PF: predicated region fallthrough
CT: control target
= control target key end

     0   :  { %s5724_s0 = inlined_call_operand.hbm [shape: f32[8,2,32], index: 0, kind: input, shape index: {}]   ;;  %s5725_s1 = inlined_call_operand.hbm [shape: f32[2,2,32,128], index: 1, kind: input, shape index: {}]   ;;  %s5726_s2 = inlined_call_operand.hbm [shape: f32[2,2,32,128], index: 2, kind: input, shape index: {}]   ;;  %s5727_s3 = inlined_call_operand.hbm [shape: f32[2,2,1,128], index: 3, kind: input, shape index: {}]   ;;  %s5728_s4 = inlined_call_operand.hbm [shape: f32[2,2,2,32], index: 4, kind: input, shape index: {}]   ;;  %s5729_s5 = inlined_call_operand.hbm [shape: f32[2,2,2,32], index: 5, kind: input, shape index: {}]   ;;  %s5730_s6 = inlined_call_operand.hbm [shape: f32[2,8,2,32], index: 6, kind: output, shape index: {0}]   ;;  %s5731_s7 = inlined_call_operand.hbm [shape: f32[2,2,2,32], index: 7, kind: output, shape index: {1}]   ;;  %s5732_s8 = inlined_call_operand.hbm [shape: f32[2,2,2,32], index: 8, kind: output, shape index: {2}]  }
   0x1   :  { %5747 = sst [smem:[#allocation28_spill]] %s5724_s0 }
   0x2   :  { %5748 = sst [smem:[#allocation29_spill]] %s5725_s1 }
   0x3   :  { %5749 = sst [smem:[#allocation30_spill]] %s5726_s2 }
   0x4   :  { %5750 = sst [smem:[#allocation31_spill]] %s5727_s3 }
   0x5   :  { %5751 = sst [smem:[#allocation32_spill]] %s5730_s6 }
   0x6   :  { %5752 = sst [smem:[#allocation33_spill]] %s5731_s7 }
   0x7   :  { %5753 = sst [smem:[#allocation34_spill]] %s5732_s8 }
   0x8   :  { %14 = vsyncpa [#allocation3], 0 }
   0x9   :  { %15 = vsyncpa [#allocation6], 0 }
   0xa   :  { %17 = vsyncpa [#allocation6 + $0x1], 0 }
   0xb   :  { %18 = vsyncpa [#allocation9], 0 }
   0xc   :  { %20 = vsyncpa [#allocation9 + $0x1], 0 }
   0xd   :  { %21 = vsyncpa [#allocation12], 0 }
   0xe   :  { %23 = vsyncpa [#allocation12 + $0x1], 0 }
   0xf   :  { %24 = vsyncpa [#allocation4], 0 }
  0x10   :  { %26 = vsyncpa [#allocation4 + $0x1], 0 }
  0x11   :  { %27 = vsyncpa [#allocation15], 0 }
  0x12   :  { %29 = vsyncpa [#allocation15 + $0x1], 0  ;;  %s4621_s27 = smov 0   ;;  %s4623_s28 = smov 0  }
  0x13   :  { %s4625_s29 = smov 0   ;;  %s4627_s30 = smov 0  }
  0x14 LB: > { %5754 = sst [smem:[#allocation23_spill]] %s4547_s27  ;;  %s4642_s9 = sadd.s32 1, %s4559_s30   ;;  %s4559_s30 = sphi %s4627_s30, %s5786_s30   ;;  %s4555_s29 = sphi %s4625_s29, %s5788_s29   ;;  %s4551_s28 = sphi %s4623_s28, %s5790_s28   ;;  %s4547_s27 = sphi %s4621_s27, %s5789_s27  }
  0x15   : > { %5755 = sst [smem:[#allocation24_spill]] %s4555_s29  ;;  %s63_s10 = sadd.s32 1, %s4555_s29 }
  0x16   : > { %5756 = sst [smem:[#allocation25_spill]] %s4642_s9  ;;  %s60_s11 = ssub.s32 %s4559_s30, %s4642_s9 }
  0x17   : > { %p70_p0 = scmp.ne.s32.totalorder %s4555_s29, %s4551_s28  ;;  %p61_p1 = scmp.eq.s32.totalorder %s60_s11, 0 }
  0x18   : > { %p71_p2 = scmp.eq.s32.totalorder %s4559_s30, 0  ;;  %p3919_p4 = scmp.lt.s32.totalorder %s4559_s30, 2 }
  0x19   : > { %s4653_s12 = scalar_select %p61_p1, %s4555_s29, %s63_s10  }
  0x1a   : > { %p72_p5 = por %p71_p2, %p70_p0  ;;  %s5733_s13 = sand.u32 1, %s4559_s30  }
  0x1b   : > { %5757 = sst [smem:[#allocation26_spill]] %s4653_s12  ;;  %s4660_s14 = sand.u32 1, %s4555_s29  }
  0x1c   : > { %s5734_s15 = sshll.u32 %s4660_s14, 6  ;;  %s3861_s16 = sshll.u32 %s4559_s30, 6 }
  0x1d   : > { %s5758_s1 = sld [smem:[#allocation29_spill]]  ;;  %s300_s21 = scalar_lea.vmem [#allocation5], %s5734_s15 }
  0x1e   : > { %s308_s22 = sshll.u32 %s300_s21, 4  ;;  %p4671_p6 = pnand %p3919_p4, %p72_p5  ;;  %s309_s22 = int_to_ptr.vmem [resolvable:$true] %s308_s22 }
  0x1f   : > { %s5760_s2 = sld [smem:[#allocation30_spill]]  ;;  %s4680_s10 = scalar_lea.sflag [#allocation6], %s5733_s13 }
  0x20   : > { %p4684_p8 = pneg %p4671_p6 }
  0x23   : > { %s305_s19 = scalar_lea.hbm %s5758_s1, %s3861_s16 }
  0x24   : > { %s306_s20 = sshll.u32 %s305_s19, 4  ;;  %s307_s20 = int_to_ptr.hbm [resolvable:$true] %s306_s20 }
  0x25   : > { %s327_s26 = scalar_lea.hbm %s5760_s2, %s3861_s16  ;;  %s4241_s11 = sshra.s32 %s307_s20, 4  ;;  %s4242_s11 = int_to_ptr.hbm [resolvable:$true] %s4241_s11 }
  0x26   : > { %s4243_s17 = scalar_lea.hbm %s4242_s11, 64  ;;  %s4248_s16 = scalar_lea.hbm %s5758_s1, 128 }
  0x27   : > { %p4244_p7 = scmp.ne.s32.totalorder %s4242_s11, %s4243_s17  ;;  %p4249_p11 = scmp.lt.s32.totalorder %s4242_s11, %s5758_s1 }
  0x28   : > { %p4250_p12 = scmp.lt.s32.totalorder %s4248_s16, %s4243_s17 }
  0x29   : > { %p4246_p9 = pnand %p4684_p8, %p4244_p7 }
  0x2a   : > { %p4251_p13 = por %p4250_p12, %p4249_p11 }
  0x2b   : > { %p4247_p10 = pneg %p4246_p9 }
  0x2d   : > { %p4252_p1 = pnand %p4251_p13, %p4247_p10 }
  0x2f   : > { %4255 = shalt.err (!%p4252_p1)
}
  0x30   : > { %s5739_s13 = smov 128   ;;  %s5741_s15 = smov 8  }
  0x31   : > { %3895 = dma.hbm_to_vmem [thread:$0]  (!%p4671_p6), %s307_s20, 1024, %s309_s22, %s4680_s10, %s5739_s13, %s5739_s13, %s5741_s15  }
  0x32   : > { %s328_s19 = sshll.u32 %s327_s26, 4  ;;  %s5762_s21 = sshll.u32 %s4660_s14, 6  ;;  %s4704_s19 = int_to_ptr.hbm [resolvable:$true] %s328_s19 }
  0x33   : > { %s322_s11 = scalar_lea.vmem [#allocation7], %s5762_s21  ;;  %s3703_s16 = sshll.u32 %s4660_s14, 1 }
  0x34   : > { %s330_s17 = sshll.u32 %s322_s11, 4  ;;  %s3704_s24 = sshll.u32 %s4559_s30, 1  ;;  %s4706_s17 = int_to_ptr.vmem [resolvable:$true] %s330_s17 }
  0x35   : > { %s5763_s3 = sld [smem:[#allocation31_spill]]  ;;  %s344_s9 = scalar_lea.vmem [#allocation8], %s3703_s16 }
  0x36   : > { %s351_s6 = sshll.u32 %s344_s9, 4  ;;  %s5764_s20 = sand.u32 1, %s4559_s30   ;;  %s352_s6 = int_to_ptr.vmem [resolvable:$true] %s351_s6 }
  0x37   : > { %s4715_s22 = scalar_lea.sflag [#allocation9], %s5764_s20 }
  0x3b   : > { %s348_s12 = scalar_lea.hbm %s5763_s3, %s3704_s24  ;;  %s4278_s1 = scalar_lea.hbm %s5763_s3, 4 }
  0x3c   : > { %s349_s8 = sshll.u32 %s348_s12, 4  ;;  %s350_s8 = int_to_ptr.hbm [resolvable:$true] %s349_s8 }
  0x3d   : > { %s4271_s26 = sshra.s32 %s350_s8, 4  ;;  %s4272_s26 = int_to_ptr.hbm [resolvable:$true] %s4271_s26 }
  0x3e   : > { %s4273_s21 = scalar_lea.hbm %s4272_s26, 2  ;;  %p4279_p7 = scmp.lt.s32.totalorder %s4272_s26, %s5763_s3 }
  0x3f   : > { %p4274_p2 = scmp.ne.s32.totalorder %s4272_s26, %s4273_s21  ;;  %p4280_p9 = scmp.lt.s32.totalorder %s4278_s1, %s4273_s21 }
  0x41   : > { %p4276_p4 = pnand %p4274_p2, %p4684_p8  ;;  %p4281_p10 = por %p4280_p9, %p4279_p7 }
  0x43   : > { %p4277_p5 = pneg %p4276_p4 }
  0x45   : > { %p4282_p11 = pnand %p4281_p10, %p4277_p5 }
  0x47   : > { %4285 = shalt.err (!%p4282_p11)
}
  0x48   : > { %s4563_s9 = smov 16   ;;  %s4564_s12 = smov 1  }
  0x49   : > { %3901 = dma.hbm_to_vmem [thread:$0]  (!%p4671_p6), %s350_s8, 32, %s352_s6, %s4715_s22, %s4563_s9, %s4563_s9, %s4564_s12  }
  0x4a   : > { %s4729_s13 = sadd.s32 4294967295, %s4559_s30   ;;  %s5740_s25 = sadd.s32 4294967294, %s4559_s30  }
  0x4b   : > { %p76_p12 = scmp.ne.s32.totalorder %s4551_s28, %s4547_s27  ;;  %p5742_p13 = scmp.eq.s32.totalorder %s4729_s13, 0 }
  0x4c   : > { %p204_p1 = scmp.eq.s32.totalorder %s4729_s13, 1  ;;  %p210_p2 = scmp.eq.s32.totalorder %s5740_s25, 1 }
  0x4d   : > { %p3694_p4 = scmp.ge.s32.totalorder %s4559_s30, 1  ;;  %p4741_p5 = por %p5742_p13, %p76_p12 }
  0x4e   : > { %p4748_p7 = por %p204_p1, %p70_p0  ;;  %p4752_p9 = por %p210_p2, %p76_p12 }
  0x4f   : > { %p269_p10 = scmp.lt.s32.totalorder %s4559_s30, 3  ;;  %s5769_s0 = sld [smem:[#allocation28_spill]] }
  0x50   : > { %s5767_s8 = scalar_select %p4752_p9, 1, 0 }
  0x51   : > { %p4761_p3 = pnand %p3694_p4, %p269_p10  ;;  %s4565_s24 = smov [#allocation2]  }
  0x52   : > { %5768 = sst [smem:[#allocation27_spill]] %s5767_s8  ;;  %s282_s16 = sshll.u32 %s4565_s24, 4  ;;  %s283_s16 = int_to_ptr.vmem [resolvable:$true] %s282_s16 }
  0x53   : > { %p3888_p0 = pneg %p4761_p3  ;;  %s4301_s25 = sshra.s32 %s4704_s19, 4  ;;  %s4302_s25 = int_to_ptr.hbm [resolvable:$true] %s4301_s25 }
  0x54   : > { %s4303_s26 = scalar_lea.hbm %s4302_s25, 64  ;;  %p4309_p10 = scmp.lt.s32.totalorder %s4302_s25, %s5760_s2 }
  0x55   : > { %s280_s11 = sshll.u32 %s5769_s0, 4  ;;  %p4769_p12 = pnand %p3888_p0, %p5742_p13  ;;  %s281_s11 = int_to_ptr.hbm [resolvable:$true] %s280_s11 }
  0x56   : > { %p4304_p1 = scmp.ne.s32.totalorder %s4302_s25, %s4303_s26  ;;  %s4308_s0 = scalar_lea.hbm %s5760_s2, 128 }
  0x57   : > { %p4310_p0 = scmp.lt.s32.totalorder %s4308_s0, %s4303_s26 }
  0x58   : > { %p4306_p2 = pnand %p4304_p1, %p4684_p8 }
  0x59   : > { %p4311_p11 = por %p4310_p0, %p4309_p10 }
  0x5a   : > { %p4307_p4 = pneg %p4306_p2 }
  0x5c   : > { %p4312_p13 = pnand %p4311_p11, %p4307_p4 }
  0x5e   : > { %4315 = shalt.err (!%p4312_p13)
}
  0x5f   : > { %s5772_s12 = smov 8   ;;  %s5773_s29 = smov 128  }
  0x60   : > { %3898 = dma.hbm_to_vmem [thread:$0]  (!%p4671_p6), %s4704_s19, 1024, %s4706_s17, %s4680_s10, %s5773_s29, %s5773_s29, %s5772_s12  }
  0x61   : > { %s4566_s15 = smov 32   ;;  %s4567_s3 = smov 2  }
  0x62   : > { %3891 = dma.hbm_to_vmem [thread:$0]  (!%p4769_p12), %s281_s11, 256, %s283_s16, [#allocation3], %s4566_s15, %s4566_s15, %s4567_s3  }
  0x63   : > { %s3863_s0 = sshll.u32 %s4559_s30, 2  ;;  %s5774_s25 = sshll.u32 %s4660_s14, 2 }
  0x64   : > { %s365_s26 = scalar_lea.vmem [#allocation10], %s5774_s25  ;;  %s370_s8 = scalar_lea.hbm %s5728_s4, %s3863_s0 }
  0x65   : > { %s373_s21 = sshll.u32 %s365_s26, 4  ;;  %s371_s27 = sshll.u32 %s370_s8, 4  ;;  %s374_s21 = int_to_ptr.vmem [resolvable:$true] %s373_s21  ;;  %s372_s27 = int_to_ptr.hbm [resolvable:$true] %s371_s27 }
  0x66   : > { %s4361_s7 = sshra.s32 %s372_s27, 4  ;;  %s4368_s17 = scalar_lea.hbm %s5728_s4, 8  ;;  %s4362_s7 = int_to_ptr.hbm [resolvable:$true] %s4361_s7 }
  0x67   : > { %s4363_s29 = scalar_lea.hbm %s4362_s7, 4  ;;  %p4369_p12 = scmp.lt.s32.totalorder %s4362_s7, %s5728_s4 }
  0x68   : > { %p4364_p13 = scmp.ne.s32.totalorder %s4362_s7, %s4363_s29  ;;  %p4370_p2 = scmp.lt.s32.totalorder %s4368_s17, %s4363_s29 }
  0x6a   : > { %p4366_p11 = pnand %p4364_p13, %p4684_p8  ;;  %p4371_p4 = por %p4370_p2, %p4369_p12 }
  0x6c   : > { %p4367_p1 = pneg %p4366_p11 }
  0x6e   : > { %p4372_p10 = pnand %p4371_p4, %p4367_p1 }
  0x70   : > { %4375 = shalt.err (!%p4372_p10)
}
  0x71   : > { %3904 = dma.hbm_to_vmem [thread:$0]  (!%p4671_p6), %s372_s27, 64, %s374_s21, %s4715_s22, %s4566_s15, %s4566_s15, %s4567_s3  }
  0x72   : > { %s392_s9 = scalar_lea.hbm %s5729_s5, %s3863_s0  ;;  %s5775_s12 = smov %s5774_s25 }
  0x73   : > { %s387_s7 = scalar_lea.vmem [#allocation11], %s5775_s12  ;;  %s393_s26 = sshll.u32 %s392_s9, 4  ;;  %s394_s26 = int_to_ptr.hbm [resolvable:$true] %s393_s26 }
  0x74   : > { %s395_s25 = sshll.u32 %s387_s7, 4  ;;  %s384_s24 = scalar_lea.sflag [#allocation12], %s4660_s14  ;;  %s396_s25 = int_to_ptr.vmem [resolvable:$true] %s395_s25 }
  0x75   : > { %s4391_s29 = sshra.s32 %s394_s26, 4  ;;  %s4398_s22 = scalar_lea.hbm %s5729_s5, 8  ;;  %s4392_s29 = int_to_ptr.hbm [resolvable:$true] %s4391_s29 }
  0x76   : > { %s4393_s10 = scalar_lea.hbm %s4392_s29, 4  ;;  %p4399_p1 = scmp.lt.s32.totalorder %s4392_s29, %s5729_s5 }
  0x77   : > { %p4394_p0 = scmp.ne.s32.totalorder %s4392_s29, %s4393_s10  ;;  %p4400_p12 = scmp.lt.s32.totalorder %s4398_s22, %s4393_s10 }
  0x79   : > { %p4396_p13 = pnand %p4394_p0, %p4684_p8  ;;  %p4401_p2 = por %p4400_p12, %p4399_p1 }
  0x7b   : > { %p4397_p11 = pneg %p4396_p13 }
  0x7d   : > { %p4402_p4 = pnand %p4401_p2, %p4397_p11 }
  0x7f   : > { %4405 = shalt.err (!%p4402_p4)
}
  0x80   : > { %3907 = dma.hbm_to_vmem [thread:$0]  (!%p4671_p6), %s394_s26, 64, %s396_s25, %s384_s24, %s4566_s15, %s4566_s15, %s4567_s3  }
  0x81   : > { %407 = sbr.rel (%p4761_p3) target bundleno = 10763 (0x2a0b), region = 44  ;;  %p5776_p8 = scmp.eq.s32.totalorder (!%p4761_p3), %s4729_s13, 0 }
  0x86   : > { %4522 = dma.done.wait (%p5776_p8), [#allocation3], 256   ;;  %p5777_p10 = pmov %p5776_p8 }
  0x87   : > { %s4842_s14 = sand.u32 1, %s4729_s13   ;;  %s4845_s23 = sand.u32 1, %s4551_s28  }
  0x88   : > { %4524 = vsyncadd (%p5777_p10), [#allocation3], 4294967040  ;;  %s3713_s18 = sshll.u32 %s4845_s23, 6  ;;  %s415_s15 = scalar_lea.sflag [#allocation6], %s4842_s14 }
  0x89   : > { %s4849_s3 = scalar_lea.vmem [#allocation5], %s3713_s18 }
  0x8a   : > { %4526 = dma.done.wait (%p4741_p5), %s415_s15, 2048  }
  0x8b   : > { %4528 = vsyncadd (%p4741_p5), %s415_s15, 4294965248  ;;  %s3715_s1 = sshll.u32 %s4845_s23, 1  ;;  %s4856_s17 = scalar_lea.vmem [#allocation7], %s3713_s18 }
  0x8c   : > { %s435_s11 = scalar_lea.sflag [#allocation9], %s4842_s14  ;;  %s4859_s16 = scalar_lea.vmem [#allocation8], %s3715_s1 }
  0x8d   : > { %4530 = dma.done.wait (%p4741_p5), %s435_s11, 96  }
  0x8e   : > { %4532 = vsyncadd (%p4741_p5), %s435_s11, 4294967200  ;;  %s4866_s2 = sshll.u32 %s4845_s23, 2  ;;  %s455_s9 = scalar_lea.sflag [#allocation12], %s4845_s23 }
  0x8f   : > { %s4869_s8 = scalar_lea.vmem [#allocation10], %s4866_s2  ;;  %s4873_s12 = scalar_lea.vmem [#allocation11], %s4866_s2 }
  0x90   : > { %4534 = dma.done.wait (%p4741_p5), %s455_s9, 64  }
  0x91   : > { %4536 = vsyncadd (%p4741_p5), %s455_s9, 4294967232  ;;  %s3718_s7 = sshll.u32 %s4845_s23, 4  ;;  %v522_v0 = vld [vmem:[#allocation2] sm:$0x3]  ;;  %v523_v1 = vld [vmem:[#allocation2 + $0x2] sm:$0x3] }
  0x92   : > { %v524_v2 = vld [vmem:[#allocation2 + $0x4] sm:$0x3]  ;;  %v525_v3 = vld [vmem:[#allocation2 + $0x6] sm:$0x3]  ;;  %v526_v4 = vld [vmem:[#allocation2 + $0x8] sm:$0x3]  ;;  %3969 = vtanh.f32 %v522_v0 }
  0x93   : > { %v527_v5 = vld [vmem:[#allocation2 + $0xa] sm:$0x3]  ;;  %v528_v6 = vld [vmem:[#allocation2 + $0xc] sm:$0x3]  ;;  %3971 = vtanh.f32 %v523_v1  ;;  %v4881_v7 = vld [vmem:[%s4849_s3] sm:$0xff]  ;;  %s4952_s20 = scalar_lea.vmem [#allocation13], %s3718_s7 }
  0x94   : > { %v529_v8 = vld [vmem:[#allocation2 + $0xe] sm:$0x3]  ;;  %3973 = vtanh.f32 %v524_v2  ;;  %v4884_v9 = vld [vmem:[%s4849_s3 + $0x8] sm:$0xff]  ;;  %v4887_v10 = vld [vmem:[%s4849_s3 + $0x10] sm:$0xff]  ;;  %s4955_s25 = scalar_lea.vmem [#allocation14], %s4866_s2  ;;  %s4958_s26 = scalar_lea.vmem [#allocation16], %s4866_s2 }
  0x95   : > { %v4890_v11 = vld [vmem:[%s4849_s3 + $0x18] sm:$0xff]  ;;  %3975 = vtanh.f32 %v525_v3  ;;  %v4893_v12 = vld [vmem:[%s4849_s3 + $0x20] sm:$0xff]  ;;  %v4896_v13 = vld [vmem:[%s4849_s3 + $0x28] sm:$0xff]  ;;  %p5778_p3 = scmp.ne.s32.totalorder %s4729_s13, 0 }
  0x96   : > { %v4899_v14 = vld [vmem:[%s4849_s3 + $0x30] sm:$0xff]  ;;  %3977 = vtanh.f32 %v526_v4  ;;  %v4902_v15 = vld [vmem:[%s4849_s3 + $0x38] sm:$0xff]  ;;  %v4905_v16 = vld [vmem:[%s4856_s17] sm:$0xff]  ;;  %s4568_s24 = smov (!%p5778_p3), 64   ;;  %s4569_s29 = smov (!%p5778_p3), 32  }
  0x97   : > { %v4908_v17 = vld [vmem:[%s4856_s17 + $0x8] sm:$0xff]  ;;  %3979 = vtanh.f32 %v527_v5  ;;  %v4911_v18 = vld [vmem:[%s4856_s17 + $0x10] sm:$0xff]  ;;  %v4914_v19 = vld [vmem:[%s4856_s17 + $0x18] sm:$0xff]  ;;  %s4570_s10 = smov (!%p5778_p3), 96  }
  0x98   : > { %v4917_v20 = vld [vmem:[%s4856_s17 + $0x20] sm:$0xff]  ;;  %v4919_v21 = vpop.eup %3969  ;;  %3981 = vtanh.f32 %v528_v6  ;;  %v4922_v22 = vld [vmem:[%s4856_s17 + $0x28] sm:$0xff]  ;;  %v4925_v23 = vld [vmem:[%s4856_s17 + $0x30] sm:$0xff] }
  0x99   : > { %v4928_v24 = vld [vmem:[%s4856_s17 + $0x38] sm:$0xff]  ;;  %v4930_v25 = vpop.eup %3971  ;;  %3983 = vtanh.f32 %v529_v8  ;;  %v4933_v26 = vld [vmem:[%s4859_s16] sm:$0x1]  ;;  %v4936_v27 = vld [vmem:[%s4859_s16 + $0x1] sm:$0x1] }
  0x9a   : > { %v4938_v28 = vpop.eup %3973 }
  0x9b   : > { %v4940_v29 = vpop.eup %3975  ;;  %562 = sbr.rel (%p5778_p3) target bundleno = 5431 (0x1537), region = 72 }
  0x9c   : > { %v4942_v30 = vpop.eup %3977 }
  0x9d   : > { %v4944_v31 = vpop.eup %3979 }
  0x9e   : > { %v4946_v32 = vpop.eup %3981 }
  0x9f   : > { %v4948_v33 = vpop.eup %3983 }
  0xa0   : > { %585 = vmatpush.msra.mxu0 %v4914_v19  ;;  %608 = vmatpush.msra.mxu1 %v4890_v11  ;;  %v563_v34 = vld [vmem:[%s4869_s8] sm:$0x3]  ;;  %vm569_vm0 = vcmask 261120   ;;  %v5041_v35 = vperm.slane %v4933_v26, 0  ;;  %v566_v41 = vld [vmem:[%s4873_s12] sm:$0x3] }
  0xa1   : > { %676 = vmatpush.msra.mxu2 %v4928_v24  ;;  %701 = vmatpush.msra.mxu3 %v4902_v15  ;;  %v3731_v0 = vld [vmem:[%s4869_s8 + $0x2] sm:$0x3]  ;;  %v3732_v1 = vld [vmem:[%s4873_s12 + $0x2] sm:$0x3]  ;;  %vm758_vm13 = vcmask 254976  }
  0xa2   : > { %586 = vmatpush.msra.mxu0 %v4911_v18  ;;  %609 = vmatpush.msra.mxu1 %v4887_v10 }
  0xa3   : > { %677 = vmatpush.msra.mxu2 %v4925_v23  ;;  %702 = vmatpush.msra.mxu3 %v4899_v14 }
  0xa4   : > { %587 = vmatpush.msra.mxu0 %v4908_v17  ;;  %610 = vmatpush.msra.mxu1 %v4884_v9 }
  0xa5   : > { %678 = vmatpush.msra.mxu2 %v4922_v22  ;;  %703 = vmatpush.msra.mxu3 %v4896_v13 }
  0xa6   : > { %588 = vmatpush.msra.mxu0 %v4905_v16  ;;  %611 = vmatpush.msra.mxu1 %v4881_v7 }
  0xa7   : > { %3733 = vmatmul.msk.f32.vlgmr.msra.gmra.mxu0 %vm569_vm0, %v563_v34  ;;  %3734 = vmatmul.msk.f32.vlgmr.msra.gmra.mxu1 %vm569_vm0, %v4919_v21  ;;  %v5073_v34 = vperm.slane %v4936_v27, 0 }
  0xa8   : > { %772 = vmatpush.msrb.mxu0 %v4914_v19  ;;  %795 = vmatpush.msrb.mxu1 %v4890_v11 }
  0xa9   : > { %679 = vmatpush.msra.mxu2 %v4917_v20  ;;  %704 = vmatpush.msra.mxu3 %v4893_v12 }
  0xaa   : > { %773 = vmatpush.msrb.mxu0 %v4911_v18  ;;  %796 = vmatpush.msrb.mxu1 %v4887_v10 }
  0xab   : > { %855 = vmatpush.msrb.mxu2 %v4928_v24  ;;  %880 = vmatpush.msrb.mxu3 %v4902_v15 }
  0xac   : > { %774 = vmatpush.msrb.mxu0 %v4908_v17  ;;  %797 = vmatpush.msrb.mxu1 %v4884_v9 }
  0xad   : > { %856 = vmatpush.msrb.mxu2 %v4925_v23  ;;  %881 = vmatpush.msrb.mxu3 %v4899_v14 }
  0xae   : > { %775 = vmatpush.msrb.mxu0 %v4905_v16  ;;  %798 = vmatpush.msrb.mxu1 %v4881_v7 }
  0xaf   : > { %3740 = vmatmul.msk.f32.vlgmr.msrb.gmra.mxu1 %vm569_vm0, %v4930_v25  ;;  %857 = vmatpush.msrb.mxu2 %v4922_v22 }
  0xb0   : > { %944 = vmatpush.msra.mxu0 %v4914_v19  ;;  %967 = vmatpush.msra.mxu1 %v4890_v11 }
  0xb1   : > { %858 = vmatpush.msrb.mxu2 %v4917_v20  ;;  %882 = vmatpush.msrb.mxu3 %v4896_v13 }
  0xb2   : > { %945 = vmatpush.msra.mxu0 %v4911_v18  ;;  %968 = vmatpush.msra.mxu1 %v4887_v10 }
  0xb3   : > { %883 = vmatpush.msrb.mxu3 %v4893_v12  ;;  %3736 = vmatmul.msk.f32.vlgmr.msra.gmra.mxu2 %vm569_vm0, %v3731_v0 }
  0xb4   : > { %946 = vmatpush.msra.mxu0 %v4908_v17  ;;  %969 = vmatpush.msra.mxu1 %v4884_v9 }
  0xb5   : > { %1027 = vmatpush.msra.mxu2 %v4928_v24 }
  0xb6   : > { %947 = vmatpush.msra.mxu0 %v4905_v16  ;;  %970 = vmatpush.msra.mxu1 %v4881_v7 }
  0xb7   : > { %3747 = vmatmul.msk.f32.vlgmr.msra.gmra.mxu1 %vm569_vm0, %v4938_v28  ;;  %1028 = vmatpush.msra.mxu2 %v4925_v23 }
  0xb8   : > { %1139 = vmatpush.msrb.mxu1 %v4890_v11 }
  0xb9   : > { %1029 = vmatpush.msra.mxu2 %v4922_v22 }
  0xba   : > { %1140 = vmatpush.msrb.mxu1 %v4887_v10 }
  0xbb   : > { %1030 = vmatpush.msra.mxu2 %v4917_v20 }
  0xbc   : > { %1141 = vmatpush.msrb.mxu1 %v4884_v9 }
  0xbe   : > { %1142 = vmatpush.msrb.mxu1 %v4881_v7 }
  0xbf   : > { %3754 = vmatmul.msk.f32.vlgmr.msrb.gmra.mxu1 %vm569_vm0, %v4940_v29 }
  0xc0   : > { %1311 = vmatpush.msra.mxu1 %v4890_v11 }
  0xc2   : > { %1312 = vmatpush.msra.mxu1 %v4887_v10 }
  0xc4   : > { %1313 = vmatpush.msra.mxu1 %v4884_v9 }
  0xc6   : > { %1314 = vmatpush.msra.mxu1 %v4881_v7 }
  0xc7   : > { %3761 = vmatmul.msk.f32.vlgmr.msra.gmra.mxu1 %vm569_vm0, %v4942_v30 }
  0xc8   : > { %1483 = vmatpush.msrb.mxu1 %v4890_v11 }
  0xca   : > { %1484 = vmatpush.msrb.mxu1 %v4887_v10 }
  0xcc   : > { %1485 = vmatpush.msrb.mxu1 %v4884_v9 }
  0xce   : > { %1486 = vmatpush.msrb.mxu1 %v4881_v7 }
  0xcf   : > { %3768 = vmatmul.msk.f32.vlgmr.msrb.gmra.mxu1 %vm569_vm0, %v4944_v31 }
  0xd0   : > { %1655 = vmatpush.msra.mxu1 %v4890_v11 }
  0xd2   : > { %1656 = vmatpush.msra.mxu1 %v4887_v10 }
  0xd4   : > { %1657 = vmatpush.msra.mxu1 %v4884_v9 }
  0xd6   : > { %1658 = vmatpush.msra.mxu1 %v4881_v7 }
  0xd7   : > { %3775 = vmatmul.msk.f32.vlgmr.msra.gmra.mxu1 %vm569_vm0, %v4946_v32 }
  0xd8   : > { %1827 = vmatpush.msrb.mxu1 %v4890_v11 }
  0xda   : > { %1828 = vmatpush.msrb.mxu1 %v4887_v10 }
  0xdc   : > { %1829 = vmatpush.msrb.mxu1 %v4884_v9 }
  0xde   : > { %1830 = vmatpush.msrb.mxu1 %v4881_v7 }
  0xdf   : > { %3782 = vmatmul.msk.f32.vlgmr.msrb.gmra.mxu1 %vm569_vm0, %v4948_v33 }
 0x124   : > { %v590_v36 = vpop.f32.mrf.mxu0  ;;  %v613_v37 = vpop.f32.mrf.mxu1 }
 0x125   : > { %v614_v38 = vadd.f32 %v613_v37, %v590_v36 }
 0x127   : > { %v619_v39 = vadd.f32 %v5041_v35, %v614_v38 }
 0x129   : > { %3985 = vtanh.f32 %v619_v39  ;;  %v3735_v42 = vmul.f32 -1.442695, %v619_v39 }
 0x12b   : > { %3987 = vpow2.f32 %v3735_v42 }
 0x12c   : > { %v800_v3 = vpop.f32.mrf.mxu1 }
 0x12f   : > { %v3986_v40 = vpop.eup %3985 }
 0x130   : > { %646 = vrot.lane.b32.xlu0 %v3986_v40, %s4568_s24 }
 0x131   : > { %v3988_v43 = vpop.eup %3987 }
 0x132   : > { %v624_v44 = vadd.f32 1.0, %v3988_v43 }
 0x134   : > { %3989 = vrcp.f32 %v624_v44  ;;  %v636_v50 = vand.u32 2147483648, %v624_v44  ;;  %vm630_vm2 = vweird.f32 %v624_v44  ;;  %v634_v51 = vand.u32 2147483647, %v624_v44 }
 0x136   : > { %v637_v53 = vor.u32 1.1754944e-38, %v636_v50  ;;  %vm635_vm4 = vcmp.eq.f32.partialorder %v634_v51, 8.507059e+37  ;;  %v681_v8 = vpop.f32.mrf.mxu2 }
 0x138   : > { %641 = vrot.lane.b32.xlu0 %v566_v41, %s4569_s29 }
 0x13a   : > { %v3990_v45 = vpop.eup %3989 }
 0x13b   : > { %v626_v46 = vmul.f32 %v3990_v45, %v624_v44  ;;  %vm631_vm1 = vweird.f32 %v3990_v45 }
 0x13c   : > { %vm632_vm3 = vmor %vm630_vm2, %vm631_vm1 }
 0x13d   : > { %v627_v47 = vsub.f32 1.0, %v626_v46 }
 0x13f   : > { %v628_v48 = vmul.f32 %v3990_v45, %v627_v47 }
 0x141   : > { %v629_v49 = vadd.f32 %v3990_v45, %v628_v48 }
 0x143   : > { %v633_v52 = vsel %vm632_vm3, %v3990_v45, %v629_v49 }
 0x144   : > { %v638_v54 = vsel %vm635_vm4, %v637_v53, %v633_v52 }
 0x1a2   : > { %v647_v55 = vpop.permute.xlu0 %646 }
 0x1a3   : > { %v649_v56 = vmul.f32 %v647_v55, %v638_v54 }
 0x1a5   : > { %651 = vrot.lane.b32.xlu1 %v649_v56, %s4570_s10 }
 0x1aa   : > { %v642_v57 = vpop.permute.xlu0 %641 }
 0x1ab   : > { %v644_v58 = vmul.f32 %v642_v57, %v638_v54 }
 0x217   : > { %v652_v59 = vpop.permute.xlu1 %651 }
 0x218   : > { %v5048_v60 = vadd.f32 %v652_v59, %v644_v58 }
 0x21a   : > { %3991 = vtanh.f32 %v5048_v60 }
 0x220   : > { %v3992_v61 = vpop.eup %3991 }
 0x221   : > { %657 = vrot.lane.b32.xlu1 %v3992_v61, %s4568_s24 }
 0x229   : > { %734 = vrot.lane.b32.xlu1 %v3732_v1, %s4569_s29 }
 0x293   : > { %v658_v62 = vpop.permute.xlu1 %657 }
 0x294   : > { %v660_v63 = vmul.f32 %v658_v62, %v638_v54 }
 0x296   : > { %685 = vrot.lane.b32.xlu2 %v660_v63, %s4569_s29 }
 0x2f0   : > { %v686_v2 = vpop.permute.xlu2 %685 }
 0x2f1   : > { %3737 = vmatmul.msk.f32.vlgmr.msra.gmra.mxu3 %vm569_vm0, %v686_v2  ;;  %3739 = vmatmul.msk.f32.vlgmr.msrb.gmra.mxu0 %vm569_vm0, %v686_v2 }
 0x2f2   : > { %1052 = vmatpush.msra.mxu3 %v4902_v15  ;;  %1116 = vmatpush.msrb.mxu0 %v4914_v19 }
 0x2f4   : > { %1053 = vmatpush.msra.mxu3 %v4899_v14  ;;  %1117 = vmatpush.msrb.mxu0 %v4911_v18 }
 0x2f6   : > { %1054 = vmatpush.msra.mxu3 %v4896_v13  ;;  %1118 = vmatpush.msrb.mxu0 %v4908_v17 }
 0x2f8   : > { %1055 = vmatpush.msra.mxu3 %v4893_v12  ;;  %1119 = vmatpush.msrb.mxu0 %v4905_v16 }
 0x36e   : > { %v777_v4 = vpop.f32.mrf.mxu0 }
 0x36f   : > { %v801_v5 = vadd.f32 %v800_v3, %v777_v4 }
 0x371   : > { %v803_v6 = vadd.f32 %v801_v5, %v5041_v35 }
 0x373   : > { %3993 = vtanh.f32 %v803_v6  ;;  %v3741_v44 = vmul.f32 -1.442695, %v803_v6 }
 0x374   : > { %v706_v36 = vpop.f32.mrf.mxu3 }
 0x375   : > { %v707_v37 = vadd.f32 %v706_v36, %v681_v8  ;;  %v735_v36 = vpop.permute.xlu1 %734 }
 0x377   : > { %v712_v38 = vadd.f32 %v5073_v34, %v707_v37 }
 0x379   : > { %v3994_v39 = vpop.eup %3993  ;;  %3995 = vtanh.f32 %v712_v38  ;;  %v3738_v41 = vmul.f32 -1.442695, %v712_v38 }
 0x37a   : > { %826 = vrot.lane.b32.xlu0 %v3994_v39, %s4568_s24 }
 0x37b   : > { %3997 = vpow2.f32 %v3738_v41 }
 0x37f   : > { %v3996_v40 = vpop.eup %3995 }
 0x380   : > { %739 = vrot.lane.b32.xlu2 %v3996_v40, %s4568_s24 }
 0x381   : > { %v3998_v42 = vpop.eup %3997 }
 0x382   : > { %v717_v43 = vadd.f32 1.0, %v3998_v42 }
 0x384   : > { %3999 = vrcp.f32 %v717_v43  ;;  %v729_v52 = vand.u32 2147483648, %v717_v43  ;;  %vm723_vm6 = vweird.f32 %v717_v43  ;;  %v727_v53 = vand.u32 2147483647, %v717_v43 }
 0x385   : > { %4001 = vpow2.f32 %v3741_v44 }
 0x386   : > { %v730_v56 = vor.u32 1.1754944e-38, %v729_v52  ;;  %vm728_vm8 = vcmp.eq.f32.partialorder %v727_v53, 8.507059e+37 }
 0x38a   : > { %v4000_v45 = vpop.eup %3999 }
 0x38b   : > { %v719_v46 = vmul.f32 %v4000_v45, %v717_v43  ;;  %v4002_v47 = vpop.eup %4001  ;;  %vm724_vm5 = vweird.f32 %v4000_v45 }
 0x38c   : > { %v808_v49 = vadd.f32 1.0, %v4002_v47  ;;  %vm725_vm7 = vmor %vm723_vm6, %vm724_vm5 }
 0x38d   : > { %v720_v48 = vsub.f32 1.0, %v719_v46 }
 0x38e   : > { %4003 = vrcp.f32 %v808_v49  ;;  %v820_v1 = vand.u32 2147483648, %v808_v49  ;;  %vm814_vm10 = vweird.f32 %v808_v49  ;;  %v818_v2 = vand.u32 2147483647, %v808_v49 }
 0x38f   : > { %v721_v50 = vmul.f32 %v4000_v45, %v720_v48 }
 0x390   : > { %v821_v4 = vor.u32 1.1754944e-38, %v820_v1  ;;  %vm819_vm12 = vcmp.eq.f32.partialorder %v818_v2, 8.507059e+37 }
 0x391   : > { %v722_v51 = vadd.f32 %v4000_v45, %v721_v50  ;;  %v972_v50 = vpop.f32.mrf.mxu1 }
 0x393   : > { %v726_v55 = vsel %vm725_vm7, %v4000_v45, %v722_v51 }
 0x394   : > { %v4004_v54 = vpop.eup %4003  ;;  %v731_v58 = vsel %vm728_vm8, %v730_v56, %v726_v55 }
 0x395   : > { %v810_v57 = vmul.f32 %v4004_v54, %v808_v49  ;;  %vm815_vm9 = vweird.f32 %v4004_v54  ;;  %v737_v37 = vmul.f32 %v735_v36, %v731_v58 }
 0x396   : > { %vm816_vm11 = vmor %vm814_vm10, %vm815_vm9 }
 0x397   : > { %v811_v62 = vsub.f32 1.0, %v810_v57 }
 0x399   : > { %v812_v63 = vmul.f32 %v4004_v54, %v811_v62 }
 0x39b   : > { %v813_v0 = vadd.f32 %v4004_v54, %v812_v63 }
 0x39d   : > { %v817_v3 = vsel %vm816_vm11, %v4004_v54, %v813_v0 }
 0x39e   : > { %v822_v5 = vsel %vm819_vm12, %v821_v4, %v817_v3 }
 0x39f   : > { %v824_v41 = vmul.f32 %v822_v5, %v5048_v60 }
 0x3da   : > { %v740_v59 = vpop.permute.xlu2 %739 }
 0x3db   : > { %v742_v61 = vmul.f32 %v740_v59, %v731_v58 }
 0x3dd   : > { %744 = vrot.lane.b32.xlu2 %v742_v61, %s4570_s10 }
 0x3ec   : > { %v827_v6 = vpop.permute.xlu0 %826 }
 0x3ed   : > { %v829_v8 = vmul.f32 %v827_v6, %v822_v5 }
 0x3ef   : > { %831 = vrot.lane.b32.xlu0 %v829_v8, %s4570_s10 }
 0x437   : > { %v745_v38 = vpop.permute.xlu2 %744 }
 0x438   : > { %v5080_v39 = vadd.f32 %v745_v38, %v737_v37 }
 0x43a   : > { %4005 = vtanh.f32 %v5080_v39 }
 0x440   : > { %v4006_v40 = vpop.eup %4005 }
 0x441   : > { %750 = vrot.lane.b32.xlu1 %v4006_v40, %s4568_s24 }
 0x461   : > { %v832_v42 = vpop.permute.xlu0 %831 }
 0x462   : > { %v5085_v43 = vadd.f32 %v832_v42, %v824_v41 }
 0x464   : > { %4007 = vtanh.f32 %v5085_v43 }
 0x46a   : > { %v4008_v44 = vpop.eup %4007 }
 0x46b   : > { %837 = vrot.lane.b32.xlu2 %v4008_v44, %s4568_s24 }
 0x4b3   : > { %v751_v45 = vpop.permute.xlu1 %750 }
 0x4b4   : > { %v753_v46 = vmul.f32 %v751_v45, %v731_v58 }
 0x4b6   : > { %755 = vrot.lane.b32.xlu0 %v753_v46, %s4569_s29 }
 0x4c5   : > { %v838_v47 = vpop.permute.xlu2 %837 }
 0x4c6   : > { %v840_v48 = vmul.f32 %v838_v47, %v822_v5 }
 0x4c8   : > { %864 = vrot.lane.b32.xlu1 %v840_v48, %s4569_s29 }
 0x528   : > { %v756_v49 = vpop.permute.xlu0 %755 }
 0x529   : > { %759 = vst.msk [vmem:[%s4952_s20] sm:$0x3] %vm758_vm13, %v756_v49  ;;  %3742 = vmatmul.msk.f32.vlgmr.msrb.gmra.mxu2 %vm569_vm0, %v756_v49 }
 0x52a   : > { %1199 = vmatpush.msrb.mxu2 %v4928_v24 }
 0x52c   : > { %1200 = vmatpush.msrb.mxu2 %v4925_v23 }
 0x52e   : > { %1201 = vmatpush.msrb.mxu2 %v4922_v22 }
 0x530   : > { %1202 = vmatpush.msrb.mxu2 %v4917_v20 }
 0x53a   : > { %v865_v60 = vpop.permute.xlu1 %864 }
 0x53b   : > { %3743 = vmatmul.msk.f32.vlgmr.msrb.gmra.mxu3 %vm569_vm0, %v865_v60  ;;  %3746 = vmatmul.msk.f32.vlgmr.msra.gmra.mxu0 %vm569_vm0, %v865_v60 }
 0x53c   : > { %1224 = vmatpush.msrb.mxu3 %v4902_v15  ;;  %1288 = vmatpush.msra.mxu0 %v4914_v19 }
 0x53e   : > { %1225 = vmatpush.msrb.mxu3 %v4899_v14  ;;  %1289 = vmatpush.msra.mxu0 %v4911_v18 }
 0x540   : > { %1226 = vmatpush.msrb.mxu3 %v4896_v13  ;;  %1290 = vmatpush.msra.mxu0 %v4908_v17 }
 0x542   : > { %1227 = vmatpush.msrb.mxu3 %v4893_v12  ;;  %1291 = vmatpush.msra.mxu0 %v4905_v16 }
 0x5ac   : > { %v860_v54 = vpop.f32.mrf.mxu2 }
 0x5b8   : > { %v949_v51 = vpop.f32.mrf.mxu0 }
 0x5b9   : > { %v973_v52 = vadd.f32 %v972_v50, %v949_v51 }
 0x5bb   : > { %v975_v53 = vadd.f32 %v973_v52, %v5041_v35 }
 0x5bd   : > { %4009 = vtanh.f32 %v975_v53  ;;  %v3748_v0 = vmul.f32 -1.442695, %v975_v53 }
 0x5be   : > { %v885_v55 = vpop.f32.mrf.mxu3 }
 0x5bf   : > { %v886_v56 = vadd.f32 %v885_v55, %v860_v54 }
 0x5c1   : > { %v888_v57 = vadd.f32 %v886_v56, %v5073_v34 }
 0x5c3   : > { %v4010_v58 = vpop.eup %4009  ;;  %4011 = vtanh.f32 %v888_v57  ;;  %v3744_v61 = vmul.f32 -1.442695, %v888_v57 }
 0x5c4   : > { %998 = vrot.lane.b32.xlu0 %v4010_v58, %s4568_s24 }
 0x5c5   : > { %4013 = vpow2.f32 %v3744_v61 }
 0x5c9   : > { %v4012_v59 = vpop.eup %4011 }
 0x5ca   : > { %911 = vrot.lane.b32.xlu2 %v4012_v59, %s4568_s24 }
 0x5cb   : > { %v4014_v62 = vpop.eup %4013 }
 0x5cc   : > { %v893_v63 = vadd.f32 1.0, %v4014_v62 }
 0x5ce   : > { %4015 = vrcp.f32 %v893_v63  ;;  %v905_v36 = vand.u32 2147483648, %v893_v63  ;;  %vm899_vm15 = vweird.f32 %v893_v63  ;;  %v903_v37 = vand.u32 2147483647, %v893_v63 }
 0x5cf   : > { %4017 = vpow2.f32 %v3748_v0 }
 0x5d0   : > { %v906_v41 = vor.u32 1.1754944e-38, %v905_v36  ;;  %vm904_vm2 = vcmp.eq.f32.partialorder %v903_v37, 8.507059e+37 }
 0x5d4   : > { %v4016_v1 = vpop.eup %4015 }
 0x5d5   : > { %v895_v2 = vmul.f32 %v4016_v1, %v893_v63  ;;  %v4018_v3 = vpop.eup %4017  ;;  %vm900_vm14 = vweird.f32 %v4016_v1 }
 0x5d6   : > { %v980_v5 = vadd.f32 1.0, %v4018_v3  ;;  %vm901_vm1 = vmor %vm899_vm15, %vm900_vm14 }
 0x5d7   : > { %v896_v4 = vsub.f32 1.0, %v895_v2 }
 0x5d8   : > { %4019 = vrcp.f32 %v980_v5  ;;  %v992_v60 = vand.u32 2147483648, %v980_v5  ;;  %vm986_vm4 = vweird.f32 %v980_v5  ;;  %v990_v50 = vand.u32 2147483647, %v980_v5 }
 0x5d9   : > { %v897_v6 = vmul.f32 %v4016_v1, %v896_v4 }
 0x5da   : > { %v993_v52 = vor.u32 1.1754944e-38, %v992_v60  ;;  %vm991_vm6 = vcmp.eq.f32.partialorder %v990_v50, 8.507059e+37 }
 0x5db   : > { %v898_v8 = vadd.f32 %v4016_v1, %v897_v6 }
 0x5dd   : > { %v902_v40 = vsel %vm901_vm1, %v4016_v1, %v898_v8 }
 0x5de   : > { %v4020_v38 = vpop.eup %4019  ;;  %v907_v44 = vsel %vm904_vm2, %v906_v41, %v902_v40 }
 0x5df   : > { %v982_v42 = vmul.f32 %v4020_v38, %v980_v5  ;;  %vm987_vm3 = vweird.f32 %v4020_v38  ;;  %v909_v59 = vmul.f32 %v907_v44, %v5080_v39  ;;  %v1144_v5 = vpop.f32.mrf.mxu1 }
 0x5e0   : > { %vm988_vm5 = vmor %vm986_vm4, %vm987_vm3 }
 0x5e1   : > { %v983_v47 = vsub.f32 1.0, %v982_v42 }
 0x5e3   : > { %v984_v48 = vmul.f32 %v4020_v38, %v983_v47 }
 0x5e5   : > { %v985_v49 = vadd.f32 %v4020_v38, %v984_v48 }
 0x5e7   : > { %v989_v51 = vsel %vm988_vm5, %v4020_v38, %v985_v49 }
 0x5e8   : > { %v994_v53 = vsel %vm991_vm6, %v993_v52, %v989_v51 }
 0x5e9   : > { %v996_v56 = vmul.f32 %v994_v53, %v5085_v43 }
 0x624   : > { %v912_v45 = vpop.permute.xlu2 %911 }
 0x625   : > { %v914_v46 = vmul.f32 %v912_v45, %v907_v44 }
 0x627   : > { %916 = vrot.lane.b32.xlu1 %v914_v46, %s4570_s10 }
 0x636   : > { %v999_v54 = vpop.permute.xlu0 %998 }
 0x637   : > { %v1001_v55 = vmul.f32 %v999_v54, %v994_v53 }
 0x639   : > { %1003 = vrot.lane.b32.xlu2 %v1001_v55, %s4570_s10 }
 0x693   : > { %v1004_v57 = vpop.permute.xlu2 %1003 }
 0x694   : > { %v5115_v58 = vadd.f32 %v1004_v57, %v996_v56 }
 0x696   : > { %4021 = vtanh.f32 %v5115_v58 }
 0x699   : > { %v917_v61 = vpop.permute.xlu1 %916 }
 0x69a   : > { %v5119_v62 = vadd.f32 %v917_v61, %v909_v59 }
 0x69c   : > { %v4022_v63 = vpop.eup %4021  ;;  %4023 = vtanh.f32 %v5119_v62 }
 0x69d   : > { %1009 = vrot.lane.b32.xlu1 %v4022_v63, %s4568_s24 }
 0x6a2   : > { %v4024_v0 = vpop.eup %4023 }
 0x6a3   : > { %922 = vrot.lane.b32.xlu0 %v4024_v0, %s4568_s24 }
 0x70f   : > { %v1010_v43 = vpop.permute.xlu1 %1009 }
 0x710   : > { %v1012_v1 = vmul.f32 %v1010_v43, %v994_v53 }
 0x712   : > { %1036 = vrot.lane.b32.xlu0 %v1012_v1, %s4569_s29 }
 0x715   : > { %v923_v2 = vpop.permute.xlu0 %922 }
 0x716   : > { %v925_v3 = vmul.f32 %v923_v2, %v907_v44 }
 0x718   : > { %927 = vrot.lane.b32.xlu2 %v925_v3, %s4569_s29 }
 0x772   : > { %v928_v39 = vpop.permute.xlu2 %927 }
 0x773   : > { %3745 = vst.msk [vmem:[%s4952_s20 + $0x2] sm:$0x3] %vm758_vm13, %v928_v39  ;;  %3749 = vmatmul.msk.f32.vlgmr.msra.gmra.mxu2 %vm569_vm0, %v928_v39 }
 0x774   : > { %1371 = vmatpush.msra.mxu2 %v4928_v24 }
 0x776   : > { %1372 = vmatpush.msra.mxu2 %v4925_v23 }
 0x778   : > { %1373 = vmatpush.msra.mxu2 %v4922_v22 }
 0x77a   : > { %1374 = vmatpush.msra.mxu2 %v4917_v20 }
 0x784   : > { %v1037_v4 = vpop.permute.xlu0 %1036 }
 0x785   : > { %3750 = vmatmul.msk.f32.vlgmr.msra.gmra.mxu3 %vm569_vm0, %v1037_v4  ;;  %3753 = vmatmul.msk.f32.vlgmr.msrb.gmra.mxu0 %vm569_vm0, %v1037_v4 }
 0x786   : > { %1396 = vmatpush.msra.mxu3 %v4902_v15  ;;  %1460 = vmatpush.msrb.mxu0 %v4914_v19 }
 0x788   : > { %1397 = vmatpush.msra.mxu3 %v4899_v14  ;;  %1461 = vmatpush.msrb.mxu0 %v4911_v18 }
 0x78a   : > { %1398 = vmatpush.msra.mxu3 %v4896_v13  ;;  %1462 = vmatpush.msrb.mxu0 %v4908_v17 }
 0x78c   : > { %1399 = vmatpush.msra.mxu3 %v4893_v12  ;;  %1463 = vmatpush.msrb.mxu0 %v4905_v16 }
 0x7f6   : > { %v1032_v37 = vpop.f32.mrf.mxu2 }
 0x802   : > { %v1121_v6 = vpop.f32.mrf.mxu0 }
 0x803   : > { %v1145_v8 = vadd.f32 %v1144_v5, %v1121_v6 }
 0x805   : > { %v1147_v36 = vadd.f32 %v1145_v8, %v5041_v35 }
 0x807   : > { %4025 = vtanh.f32 %v1147_v36  ;;  %v3755_v45 = vmul.f32 -1.442695, %v1147_v36 }
 0x808   : > { %v1057_v38 = vpop.f32.mrf.mxu3 }
 0x809   : > { %v1058_v40 = vadd.f32 %v1057_v38, %v1032_v37 }
 0x80b   : > { %v1060_v41 = vadd.f32 %v1058_v40, %v5073_v34 }
 0x80d   : > { %v4026_v42 = vpop.eup %4025  ;;  %4027 = vtanh.f32 %v1060_v41  ;;  %v3751_v60 = vmul.f32 -1.442695, %v1060_v41 }
 0x80e   : > { %1170 = vrot.lane.b32.xlu2 %v4026_v42, %s4568_s24  ;;  %4029 = vpow2.f32 %v3755_v45 }
 0x813   : > { %v4028_v44 = vpop.eup %4027 }
 0x814   : > { %1083 = vrot.lane.b32.xlu1 %v4028_v44, %s4568_s24  ;;  %v4030_v46 = vpop.eup %4029 }
 0x815   : > { %v1152_v47 = vadd.f32 1.0, %v4030_v46 }
 0x817   : > { %4031 = vrcp.f32 %v1152_v47  ;;  %v1164_v53 = vand.u32 2147483648, %v1152_v47  ;;  %vm1158_vm8 = vweird.f32 %v1152_v47  ;;  %v1162_v55 = vand.u32 2147483647, %v1152_v47 }
 0x818   : > { %4033 = vpow2.f32 %v3751_v60 }
 0x819   : > { %v1165_v59 = vor.u32 1.1754944e-38, %v1164_v53  ;;  %vm1163_vm10 = vcmp.eq.f32.partialorder %v1162_v55, 8.507059e+37 }
 0x81d   : > { %v4032_v48 = vpop.eup %4031 }
 0x81e   : > { %v1154_v49 = vmul.f32 %v4032_v48, %v1152_v47  ;;  %vm1159_vm7 = vweird.f32 %v4032_v48  ;;  %v4034_v54 = vpop.eup %4033 }
 0x81f   : > { %vm1160_vm9 = vmor %vm1158_vm8, %vm1159_vm7  ;;  %v1065_v57 = vadd.f32 1.0, %v4034_v54 }
 0x820   : > { %v1155_v50 = vsub.f32 1.0, %v1154_v49 }
 0x821   : > { %4035 = vrcp.f32 %v1065_v57  ;;  %v1077_v4 = vand.u32 2147483648, %v1065_v57  ;;  %vm1071_vm12 = vweird.f32 %v1065_v57  ;;  %v1075_v5 = vand.u32 2147483647, %v1065_v57 }
 0x822   : > { %v1156_v51 = vmul.f32 %v4032_v48, %v1155_v50 }
 0x823   : > { %v1078_v8 = vor.u32 1.1754944e-38, %v1077_v4  ;;  %vm1076_vm15 = vcmp.eq.f32.partialorder %v1075_v5, 8.507059e+37 }
 0x824   : > { %v1157_v52 = vadd.f32 %v4032_v48, %v1156_v51 }
 0x826   : > { %v1161_v56 = vsel %vm1160_vm9, %v4032_v48, %v1157_v52  ;;  %v1316_v52 = vpop.f32.mrf.mxu1 }
 0x827   : > { %v1166_v61 = vsel %vm1163_vm10, %v1165_v59, %v1161_v56  ;;  %v4036_v43 = vpop.eup %4035 }
 0x828   : > { %v1067_v1 = vmul.f32 %v4036_v43, %v1065_v57  ;;  %vm1072_vm11 = vweird.f32 %v4036_v43  ;;  %v1168_v40 = vmul.f32 %v1166_v61, %v5115_v58 }
 0x829   : > { %vm1073_vm14 = vmor %vm1071_vm12, %vm1072_vm11 }
 0x82a   : > { %v1068_v2 = vsub.f32 1.0, %v1067_v1 }
 0x82c   : > { %v1069_v3 = vmul.f32 %v4036_v43, %v1068_v2 }
 0x82e   : > { %v1070_v39 = vadd.f32 %v4036_v43, %v1069_v3 }
 0x830   : > { %v1074_v6 = vsel %vm1073_vm14, %v4036_v43, %v1070_v39 }
 0x831   : > { %v1079_v36 = vsel %vm1076_vm15, %v1078_v8, %v1074_v6 }
 0x832   : > { %v1081_v45 = vmul.f32 %v1079_v36, %v5119_v62 }
 0x868   : > { %v1171_v63 = vpop.permute.xlu2 %1170 }
 0x869   : > { %v1173_v0 = vmul.f32 %v1171_v63, %v1166_v61 }
 0x86b   : > { %1175 = vrot.lane.b32.xlu1 %v1173_v0, %s4570_s10 }
 0x886   : > { %v1084_v37 = vpop.permute.xlu1 %1083 }
 0x887   : > { %v1086_v38 = vmul.f32 %v1084_v37, %v1079_v36 }
 0x889   : > { %1088 = vrot.lane.b32.xlu0 %v1086_v38, %s4570_s10 }
 0x8dd   : > { %v1176_v41 = vpop.permute.xlu1 %1175 }
 0x8de   : > { %v5150_v42 = vadd.f32 %v1176_v41, %v1168_v40 }
 0x8e0   : > { %4037 = vtanh.f32 %v5150_v42 }
 0x8e6   : > { %v4038_v44 = vpop.eup %4037 }
 0x8e7   : > { %1181 = vrot.lane.b32.xlu0 %v4038_v44, %s4568_s24 }
 0x8fb   : > { %v1089_v46 = vpop.permute.xlu0 %1088 }
 0x8fc   : > { %v5155_v47 = vadd.f32 %v1089_v46, %v1081_v45 }
 0x8fe   : > { %4039 = vtanh.f32 %v5155_v47 }
 0x904   : > { %v4040_v48 = vpop.eup %4039 }
 0x905   : > { %1094 = vrot.lane.b32.xlu2 %v4040_v48, %s4568_s24 }
 0x959   : > { %v1182_v49 = vpop.permute.xlu0 %1181 }
 0x95a   : > { %v1184_v58 = vmul.f32 %v1182_v49, %v1166_v61 }
 0x95c   : > { %1208 = vrot.lane.b32.xlu2 %v1184_v58, %s4569_s29 }
 0x95f   : > { %v1095_v60 = vpop.permute.xlu2 %1094 }
 0x960   : > { %v1097_v50 = vmul.f32 %v1095_v60, %v1079_v36 }
 0x962   : > { %1099 = vrot.lane.b32.xlu1 %v1097_v50, %s4569_s29 }
 0x9b6   : > { %v1209_v51 = vpop.permute.xlu2 %1208 }
 0x9b7   : > { %3757 = vmatmul.msk.f32.vlgmr.msrb.gmra.mxu3 %vm569_vm0, %v1209_v51  ;;  %3760 = vmatmul.msk.f32.vlgmr.msra.gmra.mxu0 %vm569_vm0, %v1209_v51 }
 0x9b8   : > { %1568 = vmatpush.msrb.mxu3 %v4902_v15  ;;  %1632 = vmatpush.msra.mxu0 %v4914_v19 }
 0x9ba   : > { %1569 = vmatpush.msrb.mxu3 %v4899_v14  ;;  %1633 = vmatpush.msra.mxu0 %v4911_v18 }
 0x9bc   : > { %1570 = vmatpush.msrb.mxu3 %v4896_v13  ;;  %1634 = vmatpush.msra.mxu0 %v4908_v17 }
 0x9be   : > { %1571 = vmatpush.msrb.mxu3 %v4893_v12  ;;  %1635 = vmatpush.msra.mxu0 %v4905_v16 }
 0x9d4   : > { %v1100_v62 = vpop.permute.xlu1 %1099 }
 0x9d5   : > { %3752 = vst.msk [vmem:[%s4952_s20 + $0x4] sm:$0x3] %vm758_vm13, %v1100_v62  ;;  %3756 = vmatmul.msk.f32.vlgmr.msrb.gmra.mxu2 %vm569_vm0, %v1100_v62 }
 0x9d6   : > { %1543 = vmatpush.msrb.mxu2 %v4928_v24 }
 0x9d8   : > { %1544 = vmatpush.msrb.mxu2 %v4925_v23 }
 0x9da   : > { %1545 = vmatpush.msrb.mxu2 %v4922_v22 }
 0x9dc   : > { %1546 = vmatpush.msrb.mxu2 %v4917_v20 }
 0xa34   : > { %v1293_v53 = vpop.f32.mrf.mxu0 }
 0xa35   : > { %v1317_v54 = vadd.f32 %v1316_v52, %v1293_v53 }
 0xa37   : > { %v1319_v55 = vadd.f32 %v1317_v54, %v5041_v35 }
 0xa39   : > { %4041 = vtanh.f32 %v1319_v55  ;;  %v3762_v43 = vmul.f32 -1.442695, %v1319_v55 }
 0xa3a   : > { %v1229_v57 = vpop.f32.mrf.mxu3 }
 0xa3f   : > { %v4042_v56 = vpop.eup %4041 }
 0xa40   : > { %1342 = vrot.lane.b32.xlu1 %v4042_v56, %s4568_s24 }
 0xa58   : > { %v1204_v59 = vpop.f32.mrf.mxu2 }
 0xa59   : > { %v1230_v61 = vadd.f32 %v1229_v57, %v1204_v59 }
 0xa5b   : > { %v1232_v63 = vadd.f32 %v1230_v61, %v5073_v34 }
 0xa5d   : > { %4043 = vtanh.f32 %v1232_v63  ;;  %v3758_v6 = vmul.f32 -1.442695, %v1232_v63 }
 0xa5e   : > { %4045 = vpow2.f32 %v3762_v43 }
 0xa63   : > { %v4044_v0 = vpop.eup %4043 }
 0xa64   : > { %1255 = vrot.lane.b32.xlu0 %v4044_v0, %s4568_s24  ;;  %v4046_v1 = vpop.eup %4045 }
 0xa65   : > { %v1324_v2 = vadd.f32 1.0, %v4046_v1 }
 0xa67   : > { %4047 = vrcp.f32 %v1324_v2  ;;  %v1336_v36 = vand.u32 2147483648, %v1324_v2  ;;  %vm1330_vm2 = vweird.f32 %v1324_v2  ;;  %v1334_v37 = vand.u32 2147483647, %v1324_v2 }
 0xa68   : > { %4049 = vpow2.f32 %v3758_v6 }
 0xa69   : > { %v1337_v40 = vor.u32 1.1754944e-38, %v1336_v36  ;;  %vm1335_vm4 = vcmp.eq.f32.partialorder %v1334_v37, 8.507059e+37 }
 0xa6d   : > { %v4048_v3 = vpop.eup %4047 }
 0xa6e   : > { %v1326_v39 = vmul.f32 %v4048_v3, %v1324_v2  ;;  %vm1331_vm1 = vweird.f32 %v4048_v3  ;;  %v4050_v45 = vpop.eup %4049 }
 0xa6f   : > { %vm1332_vm3 = vmor %vm1330_vm2, %vm1331_vm1  ;;  %v1237_v48 = vadd.f32 1.0, %v4050_v45 }
 0xa70   : > { %v1327_v4 = vsub.f32 1.0, %v1326_v39 }
 0xa71   : > { %4051 = vrcp.f32 %v1237_v48  ;;  %v1249_v62 = vand.u32 2147483648, %v1237_v48  ;;  %vm1243_vm6 = vweird.f32 %v1237_v48  ;;  %v1247_v52 = vand.u32 2147483647, %v1237_v48 }
 0xa72   : > { %v1328_v5 = vmul.f32 %v4048_v3, %v1327_v4 }
 0xa73   : > { %v1250_v54 = vor.u32 1.1754944e-38, %v1249_v62  ;;  %vm1248_vm8 = vcmp.eq.f32.partialorder %v1247_v52, 8.507059e+37 }
 0xa74   : > { %v1329_v8 = vadd.f32 %v4048_v3, %v1328_v5 }
 0xa76   : > { %v1333_v38 = vsel %vm1332_vm3, %v4048_v3, %v1329_v8  ;;  %v1488_v8 = vpop.f32.mrf.mxu1 }
 0xa77   : > { %v1338_v41 = vsel %vm1335_vm4, %v1337_v40, %v1333_v38  ;;  %v4052_v49 = vpop.eup %4051 }
 0xa78   : > { %v1239_v58 = vmul.f32 %v4052_v49, %v1237_v48  ;;  %vm1244_vm5 = vweird.f32 %v4052_v49  ;;  %v1340_v59 = vmul.f32 %v1338_v41, %v5150_v42 }
 0xa79   : > { %vm1245_vm7 = vmor %vm1243_vm6, %vm1244_vm5 }
 0xa7a   : > { %v1240_v60 = vsub.f32 1.0, %v1239_v58 }
 0xa7c   : > { %v1241_v50 = vmul.f32 %v4052_v49, %v1240_v60 }
 0xa7e   : > { %v1242_v51 = vadd.f32 %v4052_v49, %v1241_v50 }
 0xa80   : > { %v1246_v53 = vsel %vm1245_vm7, %v4052_v49, %v1242_v51 }
 0xa81   : > { %v1251_v55 = vsel %vm1248_vm8, %v1250_v54, %v1246_v53 }
 0xa82   : > { %v1253_v43 = vmul.f32 %v1251_v55, %v5155_v47 }
 0xab2   : > { %v1343_v44 = vpop.permute.xlu1 %1342 }
 0xab3   : > { %v1345_v46 = vmul.f32 %v1343_v44, %v1338_v41 }
 0xab5   : > { %1347 = vrot.lane.b32.xlu0 %v1345_v46, %s4570_s10 }
 0xad6   : > { %v1256_v56 = vpop.permute.xlu0 %1255 }
 0xad7   : > { %v1258_v57 = vmul.f32 %v1256_v56, %v1251_v55 }
 0xad9   : > { %1260 = vrot.lane.b32.xlu2 %v1258_v57, %s4570_s10 }
 0xb27   : > { %v1348_v61 = vpop.permute.xlu0 %1347 }
 0xb28   : > { %v5185_v63 = vadd.f32 %v1348_v61, %v1340_v59 }
 0xb2a   : > { %4053 = vtanh.f32 %v5185_v63 }
 0xb30   : > { %v4054_v0 = vpop.eup %4053 }
 0xb31   : > { %1353 = vrot.lane.b32.xlu2 %v4054_v0, %s4568_s24 }
 0xb33   : > { %v1261_v1 = vpop.permute.xlu2 %1260 }
 0xb34   : > { %v5190_v2 = vadd.f32 %v1261_v1, %v1253_v43 }
 0xb36   : > { %4055 = vtanh.f32 %v5190_v2 }
 0xb3c   : > { %v4056_v3 = vpop.eup %4055 }
 0xb3d   : > { %1266 = vrot.lane.b32.xlu1 %v4056_v3, %s4568_s24 }
 0xb8b   : > { %v1354_v39 = vpop.permute.xlu2 %1353 }
 0xb8c   : > { %v1356_v42 = vmul.f32 %v1354_v39, %v1338_v41 }
 0xb8e   : > { %1380 = vrot.lane.b32.xlu1 %v1356_v42, %s4569_s29 }
 0xbaf   : > { %v1267_v4 = vpop.permute.xlu1 %1266 }
 0xbb0   : > { %v1269_v5 = vmul.f32 %v1267_v4, %v1251_v55 }
 0xbb2   : > { %1271 = vrot.lane.b32.xlu0 %v1269_v5, %s4569_s29 }
 0xc00   : > { %v1381_v6 = vpop.permute.xlu1 %1380 }
 0xc01   : > { %3764 = vmatmul.msk.f32.vlgmr.msra.gmra.mxu3 %vm569_vm0, %v1381_v6  ;;  %3767 = vmatmul.msk.f32.vlgmr.msrb.gmra.mxu0 %vm569_vm0, %v1381_v6 }
 0xc02   : > { %1740 = vmatpush.msra.mxu3 %v4902_v15  ;;  %1804 = vmatpush.msrb.mxu0 %v4914_v19 }
 0xc04   : > { %1741 = vmatpush.msra.mxu3 %v4899_v14  ;;  %1805 = vmatpush.msrb.mxu0 %v4911_v18 }
 0xc06   : > { %1742 = vmatpush.msra.mxu3 %v4896_v13  ;;  %1806 = vmatpush.msrb.mxu0 %v4908_v17 }
 0xc08   : > { %1743 = vmatpush.msra.mxu3 %v4893_v12  ;;  %1807 = vmatpush.msrb.mxu0 %v4905_v16 }
 0xc24   : > { %v1272_v47 = vpop.permute.xlu0 %1271 }
 0xc25   : > { %3759 = vst.msk [vmem:[%s4952_s20 + $0x6] sm:$0x3] %vm758_vm13, %v1272_v47  ;;  %3763 = vmatmul.msk.f32.vlgmr.msra.gmra.mxu2 %vm569_vm0, %v1272_v47 }
 0xc26   : > { %1715 = vmatpush.msra.mxu2 %v4928_v24 }
 0xc28   : > { %1716 = vmatpush.msra.mxu2 %v4925_v23 }
 0xc2a   : > { %1717 = vmatpush.msra.mxu2 %v4922_v22 }
 0xc2c   : > { %1718 = vmatpush.msra.mxu2 %v4917_v20 }
 0xc7e   : > { %v1465_v36 = vpop.f32.mrf.mxu0 }
 0xc7f   : > { %v1489_v37 = vadd.f32 %v1488_v8, %v1465_v36 }
 0xc81   : > { %v1491_v38 = vadd.f32 %v1489_v37, %v5041_v35 }
 0xc83   : > { %4057 = vtanh.f32 %v1491_v38  ;;  %v3769_v49 = vmul.f32 -1.442695, %v1491_v38 }
 0xc84   : > { %v1401_v41 = vpop.f32.mrf.mxu3 }
 0xc89   : > { %v4058_v40 = vpop.eup %4057 }
 0xc8a   : > { %1514 = vrot.lane.b32.xlu0 %v4058_v40, %s4568_s24 }
 0xca8   : > { %v1376_v44 = vpop.f32.mrf.mxu2 }
 0xca9   : > { %v1402_v45 = vadd.f32 %v1401_v41, %v1376_v44 }
 0xcab   : > { %v1404_v46 = vadd.f32 %v1402_v45, %v5073_v34 }
 0xcad   : > { %4059 = vtanh.f32 %v1404_v46  ;;  %v3765_v50 = vmul.f32 -1.442695, %v1404_v46 }
 0xcae   : > { %4061 = vpow2.f32 %v3769_v49 }
 0xcb3   : > { %v4060_v48 = vpop.eup %4059 }
 0xcb4   : > { %1427 = vrot.lane.b32.xlu2 %v4060_v48, %s4568_s24  ;;  %v4062_v58 = vpop.eup %4061 }
 0xcb5   : > { %v1496_v60 = vadd.f32 1.0, %v4062_v58 }
 0xcb7   : > { %4063 = vrcp.f32 %v1496_v60  ;;  %v1508_v57 = vand.u32 2147483648, %v1496_v60  ;;  %vm1502_vm10 = vweird.f32 %v1496_v60  ;;  %v1506_v59 = vand.u32 2147483647, %v1496_v60 }
 0xcb8   : > { %4065 = vpow2.f32 %v3765_v50 }
 0xcb9   : > { %v1509_v43 = vor.u32 1.1754944e-38, %v1508_v57  ;;  %vm1507_vm12 = vcmp.eq.f32.partialorder %v1506_v59, 8.507059e+37 }
 0xcbd   : > { %v4064_v51 = vpop.eup %4063 }
 0xcbe   : > { %v1498_v62 = vmul.f32 %v4064_v51, %v1496_v60  ;;  %v4066_v52 = vpop.eup %4065  ;;  %vm1503_vm9 = vweird.f32 %v4064_v51 }
 0xcbf   : > { %v1409_v54 = vadd.f32 1.0, %v4066_v52  ;;  %vm1504_vm11 = vmor %vm1502_vm10, %vm1503_vm9 }
 0xcc0   : > { %v1499_v53 = vsub.f32 1.0, %v1498_v62 }
 0xcc1   : > { %4067 = vrcp.f32 %v1409_v54  ;;  %v1421_v47 = vand.u32 2147483648, %v1409_v54  ;;  %vm1415_vm15 = vweird.f32 %v1409_v54  ;;  %v1419_v8 = vand.u32 2147483647, %v1409_v54 }
 0xcc2   : > { %v1500_v55 = vmul.f32 %v4064_v51, %v1499_v53 }
 0xcc3   : > { %v1422_v37 = vor.u32 1.1754944e-38, %v1421_v47  ;;  %vm1420_vm2 = vcmp.eq.f32.partialorder %v1419_v8, 8.507059e+37 }
 0xcc4   : > { %v1501_v56 = vadd.f32 %v4064_v51, %v1500_v55 }
 0xcc6   : > { %v1505_v0 = vsel %vm1504_vm11, %v4064_v51, %v1501_v56 }
 0xcc7   : > { %v4068_v61 = vpop.eup %4067  ;;  %v1510_v3 = vsel %vm1507_vm12, %v1509_v43, %v1505_v0 }
 0xcc8   : > { %v1411_v1 = vmul.f32 %v4068_v61, %v1409_v54  ;;  %vm1416_vm14 = vweird.f32 %v4068_v61  ;;  %v1512_v44 = vmul.f32 %v1510_v3, %v5185_v63  ;;  %v1660_v54 = vpop.f32.mrf.mxu1 }
 0xcc9   : > { %vm1417_vm1 = vmor %vm1415_vm15, %vm1416_vm14 }
 0xcca   : > { %v1412_v4 = vsub.f32 1.0, %v1411_v1 }
 0xccc   : > { %v1413_v5 = vmul.f32 %v4068_v61, %v1412_v4 }
 0xcce   : > { %v1414_v6 = vadd.f32 %v4068_v61, %v1413_v5 }
 0xcd0   : > { %v1418_v36 = vsel %vm1417_vm1, %v4068_v61, %v1414_v6 }
 0xcd1   : > { %v1423_v38 = vsel %vm1420_vm2, %v1422_v37, %v1418_v36 }
 0xcd2   : > { %v1425_v49 = vmul.f32 %v1423_v38, %v5190_v2 }
 0xcfc   : > { %v1515_v39 = vpop.permute.xlu0 %1514 }
 0xcfd   : > { %v1517_v42 = vmul.f32 %v1515_v39, %v1510_v3 }
 0xcff   : > { %1519 = vrot.lane.b32.xlu2 %v1517_v42, %s4570_s10 }
 0xd0e   : > { %v1428_v40 = vpop.permute.xlu2 %1427 }
 0xd0f   : > { %v1430_v41 = vmul.f32 %v1428_v40, %v1423_v38 }
 0xd11   : > { %1432 = vrot.lane.b32.xlu1 %v1430_v41, %s4570_s10 }
 0xd59   : > { %v1520_v45 = vpop.permute.xlu2 %1519 }
 0xd5a   : > { %v5220_v46 = vadd.f32 %v1520_v45, %v1512_v44 }
 0xd5c   : > { %4069 = vtanh.f32 %v5220_v46 }
 0xd62   : > { %v4070_v48 = vpop.eup %4069 }
 0xd63   : > { %1525 = vrot.lane.b32.xlu1 %v4070_v48, %s4568_s24 }
 0xd83   : > { %v1433_v58 = vpop.permute.xlu1 %1432 }
 0xd84   : > { %v5225_v60 = vadd.f32 %v1433_v58, %v1425_v49 }
 0xd86   : > { %4071 = vtanh.f32 %v5225_v60 }
 0xd8c   : > { %v4072_v50 = vpop.eup %4071 }
 0xd8d   : > { %1438 = vrot.lane.b32.xlu0 %v4072_v50, %s4568_s24 }
 0xdd5   : > { %v1526_v63 = vpop.permute.xlu1 %1525 }
 0xdd6   : > { %v1528_v51 = vmul.f32 %v1526_v63, %v1510_v3 }
 0xdd8   : > { %1552 = vrot.lane.b32.xlu0 %v1528_v51, %s4569_s29 }
 0xdff   : > { %v1439_v62 = vpop.permute.xlu0 %1438 }
 0xe00   : > { %v1441_v52 = vmul.f32 %v1439_v62, %v1423_v38 }
 0xe02   : > { %1443 = vrot.lane.b32.xlu2 %v1441_v52, %s4569_s29 }
 0xe4a   : > { %v1553_v53 = vpop.permute.xlu0 %1552 }
 0xe4b   : > { %3771 = vmatmul.msk.f32.vlgmr.msrb.gmra.mxu3 %vm569_vm0, %v1553_v53  ;;  %3774 = vmatmul.msk.f32.vlgmr.msra.gmra.mxu0 %vm569_vm0, %v1553_v53 }
 0xe4c   : > { %1912 = vmatpush.msrb.mxu3 %v4902_v15 }
 0xe4e   : > { %1913 = vmatpush.msrb.mxu3 %v4899_v14 }
 0xe50   : > { %1914 = vmatpush.msrb.mxu3 %v4896_v13 }
 0xe52   : > { %1915 = vmatpush.msrb.mxu3 %v4893_v12 }
 0xe5c   : > { %v1444_v2 = vpop.permute.xlu2 %1443 }
 0xe5d   : > { %3766 = vst.msk [vmem:[%s4952_s20 + $0x8] sm:$0x3] %vm758_vm13, %v1444_v2  ;;  %3770 = vmatmul.msk.f32.vlgmr.msrb.gmra.mxu2 %vm569_vm0, %v1444_v2 }
 0xe5e   : > { %1887 = vmatpush.msrb.mxu2 %v4928_v24 }
 0xe60   : > { %1888 = vmatpush.msrb.mxu2 %v4925_v23 }
 0xe62   : > { %1889 = vmatpush.msrb.mxu2 %v4922_v22 }
 0xe64   : > { %1890 = vmatpush.msrb.mxu2 %v4917_v20 }
 0xec8   : > { %v1637_v55 = vpop.f32.mrf.mxu0 }
 0xec9   : > { %v1661_v56 = vadd.f32 %v1660_v54, %v1637_v55 }
 0xecb   : > { %v1663_v57 = vadd.f32 %v1661_v56, %v5041_v35 }
 0xecd   : > { %4073 = vtanh.f32 %v1663_v57  ;;  %v3776_v39 = vmul.f32 -1.442695, %v1663_v57 }
 0xece   : > { %v1573_v61 = vpop.f32.mrf.mxu3 }
 0xed3   : > { %v4074_v59 = vpop.eup %4073 }
 0xed4   : > { %1686 = vrot.lane.b32.xlu2 %v4074_v59, %s4568_s24 }
 0xee0   : > { %v1548_v0 = vpop.f32.mrf.mxu2 }
 0xee1   : > { %v1574_v43 = vadd.f32 %v1573_v61, %v1548_v0 }
 0xee3   : > { %v1576_v1 = vadd.f32 %v1574_v43, %v5073_v34 }
 0xee5   : > { %4075 = vtanh.f32 %v1576_v1  ;;  %v3772_v49 = vmul.f32 -1.442695, %v1576_v1 }
 0xee6   : > { %4077 = vpow2.f32 %v3776_v39 }
 0xeeb   : > { %v4076_v3 = vpop.eup %4075 }
 0xeec   : > { %1599 = vrot.lane.b32.xlu1 %v4076_v3, %s4568_s24  ;;  %v4078_v42 = vpop.eup %4077 }
 0xeed   : > { %v1668_v4 = vadd.f32 1.0, %v4078_v42 }
 0xeef   : > { %4079 = vrcp.f32 %v1668_v4  ;;  %v1680_v37 = vand.u32 2147483648, %v1668_v4  ;;  %vm1674_vm4 = vweird.f32 %v1668_v4  ;;  %v1678_v38 = vand.u32 2147483647, %v1668_v4 }
 0xef0   : > { %4081 = vpow2.f32 %v3772_v49 }
 0xef1   : > { %v1681_v41 = vor.u32 1.1754944e-38, %v1680_v37  ;;  %vm1679_vm6 = vcmp.eq.f32.partialorder %v1678_v38, 8.507059e+37  ;;  %v1832_v37 = vpop.f32.mrf.mxu1 }
 0xef5   : > { %v4080_v5 = vpop.eup %4079 }
 0xef6   : > { %v1670_v6 = vmul.f32 %v4080_v5, %v1668_v4  ;;  %vm1675_vm3 = vweird.f32 %v4080_v5  ;;  %v4082_v58 = vpop.eup %4081 }
 0xef7   : > { %vm1676_vm5 = vmor %vm1674_vm4, %vm1675_vm3  ;;  %v1581_v50 = vadd.f32 1.0, %v4082_v58 }
 0xef8   : > { %v1671_v47 = vsub.f32 1.0, %v1670_v6 }
 0xef9   : > { %4083 = vrcp.f32 %v1581_v50  ;;  %v1593_v2 = vand.u32 2147483648, %v1581_v50  ;;  %vm1587_vm8 = vweird.f32 %v1581_v50  ;;  %v1591_v54 = vand.u32 2147483647, %v1581_v50 }
 0xefa   : > { %v1672_v8 = vmul.f32 %v4080_v5, %v1671_v47 }
 0xefb   : > { %v1594_v56 = vor.u32 1.1754944e-38, %v1593_v2  ;;  %vm1592_vm10 = vcmp.eq.f32.partialorder %v1591_v54, 8.507059e+37 }
 0xefc   : > { %v1673_v36 = vadd.f32 %v4080_v5, %v1672_v8 }
 0xefe   : > { %v1677_v40 = vsel %vm1676_vm5, %v4080_v5, %v1673_v36 }
 0xeff   : > { %v1682_v44 = vsel %vm1679_vm6, %v1681_v41, %v1677_v40  ;;  %v4084_v63 = vpop.eup %4083 }
 0xf00   : > { %v1583_v51 = vmul.f32 %v4084_v63, %v1581_v50  ;;  %vm1588_vm7 = vweird.f32 %v4084_v63  ;;  %v1684_v0 = vmul.f32 %v1682_v44, %v5220_v46 }
 0xf01   : > { %vm1589_vm9 = vmor %vm1587_vm8, %vm1588_vm7 }
 0xf02   : > { %v1584_v62 = vsub.f32 1.0, %v1583_v51 }
 0xf04   : > { %v1585_v52 = vmul.f32 %v4084_v63, %v1584_v62 }
 0xf06   : > { %v1586_v53 = vadd.f32 %v4084_v63, %v1585_v52 }
 0xf08   : > { %v1590_v55 = vsel %vm1589_vm9, %v4084_v63, %v1586_v53 }
 0xf09   : > { %v1595_v57 = vsel %vm1592_vm10, %v1594_v56, %v1590_v55 }
 0xf0a   : > { %v1597_v39 = vmul.f32 %v1595_v57, %v5225_v60 }
 0xf2e   : > { %v1687_v45 = vpop.permute.xlu2 %1686 }
 0xf2f   : > { %v1689_v48 = vmul.f32 %v1687_v45, %v1682_v44 }
 0xf31   : > { %1691 = vrot.lane.b32.xlu1 %v1689_v48, %s4570_s10 }
 0xf5e   : > { %v1600_v59 = vpop.permute.xlu1 %1599 }
 0xf5f   : > { %v1602_v61 = vmul.f32 %v1600_v59, %v1595_v57 }
 0xf61   : > { %1604 = vrot.lane.b32.xlu0 %v1602_v61, %s4570_s10 }
 0xfa3   : > { %v1692_v43 = vpop.permute.xlu1 %1691 }
 0xfa4   : > { %v5251_v1 = vadd.f32 %v1692_v43, %v1684_v0 }
 0xfa6   : > { %4085 = vtanh.f32 %v5251_v1 }
 0xfac   : > { %v4086_v3 = vpop.eup %4085 }
 0xfad   : > { %1697 = vrot.lane.b32.xlu0 %v4086_v3, %s4568_s24 }
 0xfd3   : > { %v1605_v42 = vpop.permute.xlu0 %1604 }
 0xfd4   : > { %v5256_v4 = vadd.f32 %v1605_v42, %v1597_v39 }
 0xfd6   : > { %4087 = vtanh.f32 %v5256_v4 }
 0xfdc   : > { %v4088_v5 = vpop.eup %4087 }
 0xfdd   : > { %1610 = vrot.lane.b32.xlu2 %v4088_v5, %s4568_s24 }
0x101f   : > { %v1698_v46 = vpop.permute.xlu0 %1697 }
0x1020   : > { %v1700_v6 = vmul.f32 %v1698_v46, %v1682_v44 }
0x1022   : > { %1724 = vrot.lane.b32.xlu2 %v1700_v6, %s4569_s29 }
0x1037   : > { %v1611_v47 = vpop.permute.xlu2 %1610 }
0x1038   : > { %v1613_v8 = vmul.f32 %v1611_v47, %v1595_v57 }
0x103a   : > { %1615 = vrot.lane.b32.xlu1 %v1613_v8, %s4569_s29 }
0x107c   : > { %v1725_v36 = vpop.permute.xlu2 %1724 }
0x107d   : > { %3778 = vmatmul.msk.f32.vlgmr.msra.gmra.mxu3 %vm569_vm0, %v1725_v36  ;;  %3781 = vmatmul.msk.f32.vlgmr.msrb.gmra.mxu0 %vm569_vm0, %v1725_v36 }
0x10ac   : > { %v1616_v60 = vpop.permute.xlu1 %1615 }
0x10ad   : > { %3773 = vst.msk [vmem:[%s4952_s20 + $0xa] sm:$0x3] %vm758_vm13, %v1616_v60  ;;  %3777 = vmatmul.msk.f32.vlgmr.msra.gmra.mxu2 %vm569_vm0, %v1616_v60 }
0x10fa   : > { %v1809_v38 = vpop.f32.mrf.mxu0 }
0x10fb   : > { %v1833_v40 = vadd.f32 %v1832_v37, %v1809_v38 }
0x10fd   : > { %v1835_v41 = vadd.f32 %v1833_v40, %v5041_v35 }
0x10ff   : > { %4089 = vtanh.f32 %v1835_v41  ;;  %v3783_v63 = vmul.f32 -1.442695, %v1835_v41 }
0x1100   : > { %v1745_v45 = vpop.f32.mrf.mxu3 }
0x1105   : > { %v4090_v44 = vpop.eup %4089 }
0x1106   : > { %1858 = vrot.lane.b32.xlu1 %v4090_v44, %s4568_s24 }
0x1130   : > { %v1720_v48 = vpop.f32.mrf.mxu2 }
0x1131   : > { %v1746_v49 = vadd.f32 %v1745_v45, %v1720_v48 }
0x1133   : > { %v1748_v58 = vadd.f32 %v1746_v49, %v5073_v34 }
0x1135   : > { %4091 = vtanh.f32 %v1748_v58  ;;  %v3779_v3 = vmul.f32 -1.442695, %v1748_v58 }
0x1136   : > { %4093 = vpow2.f32 %v3783_v63 }
0x113b   : > { %v4092_v50 = vpop.eup %4091 }
0x113c   : > { %1771 = vrot.lane.b32.xlu0 %v4092_v50, %s4568_s24  ;;  %v4094_v51 = vpop.eup %4093 }
0x113d   : > { %v1840_v62 = vadd.f32 1.0, %v4094_v51 }
0x113f   : > { %4095 = vrcp.f32 %v1840_v62  ;;  %v1852_v55 = vand.u32 2147483648, %v1840_v62  ;;  %vm1846_vm12 = vweird.f32 %v1840_v62  ;;  %v1850_v56 = vand.u32 2147483647, %v1840_v62 }
0x1140   : > { %4097 = vpow2.f32 %v3779_v3 }
0x1141   : > { %v1853_v59 = vor.u32 1.1754944e-38, %v1852_v55  ;;  %vm1851_vm15 = vcmp.eq.f32.partialorder %v1850_v56, 8.507059e+37 }
0x1145   : > { %v4096_v52 = vpop.eup %4095 }
0x1146   : > { %v1842_v35 = vmul.f32 %v4096_v52, %v1840_v62  ;;  %vm1847_vm11 = vweird.f32 %v4096_v52  ;;  %v4098_v39 = vpop.eup %4097 }
0x1147   : > { %vm1848_vm14 = vmor %vm1846_vm12, %vm1847_vm11  ;;  %v1753_v42 = vadd.f32 1.0, %v4098_v39 }
0x1148   : > { %v1843_v53 = vsub.f32 1.0, %v1842_v35 }
0x1149   : > { %4099 = vrcp.f32 %v1753_v42  ;;  %v1765_v36 = vand.u32 2147483648, %v1753_v42  ;;  %vm1759_vm2 = vweird.f32 %v1753_v42  ;;  %v1763_v60 = vand.u32 2147483647, %v1753_v42 }
0x114a   : > { %v1844_v2 = vmul.f32 %v4096_v52, %v1843_v53 }
0x114b   : > { %v1766_v38 = vor.u32 1.1754944e-38, %v1765_v36  ;;  %vm1764_vm4 = vcmp.eq.f32.partialorder %v1763_v60, 8.507059e+37 }
0x114c   : > { %v1845_v54 = vadd.f32 %v4096_v52, %v1844_v2 }
0x114e   : > { %v1849_v57 = vsel %vm1848_vm14, %v4096_v52, %v1845_v54 }
0x114f   : > { %v1854_v61 = vsel %vm1851_vm15, %v1853_v59, %v1849_v57  ;;  %v4100_v5 = vpop.eup %4099 }
0x1150   : > { %v1755_v46 = vmul.f32 %v4100_v5, %v1753_v42  ;;  %vm1760_vm1 = vweird.f32 %v4100_v5  ;;  %v1856_v45 = vmul.f32 %v1854_v61, %v5251_v1 }
0x1151   : > { %vm1761_vm3 = vmor %vm1759_vm2, %vm1760_vm1 }
0x1152   : > { %v1756_v6 = vsub.f32 1.0, %v1755_v46 }
0x1154   : > { %v1757_v47 = vmul.f32 %v4100_v5, %v1756_v6 }
0x1156   : > { %v1758_v8 = vadd.f32 %v4100_v5, %v1757_v47 }
0x1158   : > { %v1762_v37 = vsel %vm1761_vm3, %v4100_v5, %v1758_v8 }
0x1159   : > { %v1767_v40 = vsel %vm1764_vm4, %v1766_v38, %v1762_v37 }
0x115a   : > { %v1769_v50 = vmul.f32 %v1767_v40, %v5256_v4 }
0x1178   : > { %v1859_v0 = vpop.permute.xlu1 %1858 }
0x1179   : > { %v1861_v43 = vmul.f32 %v1859_v0, %v1854_v61 }
0x117b   : > { %1863 = vrot.lane.b32.xlu0 %v1861_v43, %s4570_s10 }
0x11ae   : > { %v1772_v41 = vpop.permute.xlu0 %1771 }
0x11af   : > { %v1774_v44 = vmul.f32 %v1772_v41, %v1767_v40 }
0x11b1   : > { %1776 = vrot.lane.b32.xlu2 %v1774_v44, %s4570_s10 }
0x11ed   : > { %v1864_v48 = vpop.permute.xlu0 %1863 }
0x11ee   : > { %v1866_v49 = vadd.f32 %v1864_v48, %v1856_v45 }
0x11f0   : > { %4101 = vtanh.f32 %v1866_v49 }
0x11f6   : > { %v4102_v58 = vpop.eup %4101 }
0x11f7   : > { %1869 = vrot.lane.b32.xlu2 %v4102_v58, %s4568_s24 }
0x120b   : > { %v1777_v63 = vpop.permute.xlu2 %1776 }
0x120c   : > { %v1779_v51 = vadd.f32 %v1777_v63, %v1769_v50 }
0x120e   : > { %4103 = vtanh.f32 %v1779_v51 }
0x1214   : > { %v4104_v62 = vpop.eup %4103 }
0x1215   : > { %1782 = vrot.lane.b32.xlu1 %v4104_v62, %s4568_s24 }
0x1251   : > { %v1870_v52 = vpop.permute.xlu2 %1869 }
0x1252   : > { %v1872_v35 = vmul.f32 %v1870_v52, %v1854_v61 }
0x1254   : > { %1896 = vrot.lane.b32.xlu1 %v1872_v35, %s4569_s29 }
0x1287   : > { %v1783_v1 = vpop.permute.xlu1 %1782 }
0x1288   : > { %v1785_v53 = vmul.f32 %v1783_v1, %v1767_v40 }
0x128a   : > { %1787 = vrot.lane.b32.xlu0 %v1785_v53, %s4569_s29 }
0x12c6   : > { %v1897_v2 = vpop.permute.xlu1 %1896 }
0x12c7   : > { %1965 = vst.msk [vmem:[%s4955_s25] sm:$0x3] %vm758_vm13, %v1897_v2  ;;  %3785 = vmatmul.msk.f32.vlgmr.msrb.gmra.mxu3 %vm569_vm0, %v1897_v2 }
0x12fc   : > { %v1788_v4 = vpop.permute.xlu0 %1787 }
0x12fd   : > { %3780 = vst.msk [vmem:[%s4952_s20 + $0xc] sm:$0x3] %vm758_vm13, %v1788_v4  ;;  %3784 = vmatmul.msk.f32.vlgmr.msrb.gmra.mxu2 %vm569_vm0, %v1788_v4 }
0x134a   : > { %v1917_v54 = vpop.f32.mrf.mxu3 }
0x1380   : > { %v1892_v55 = vpop.f32.mrf.mxu2 }
0x1381   : > { %v1918_v56 = vadd.f32 %v1917_v54, %v1892_v55 }
0x1383   : > { %v1920_v57 = vadd.f32 %v1918_v56, %v5073_v34 }
0x1385   : > { %4105 = vtanh.f32 %v1920_v57  ;;  %v3786_v61 = vmul.f32 -1.442695, %v1920_v57 }
0x1387   : > { %4107 = vpow2.f32 %v3786_v61 }
0x138b   : > { %v4106_v59 = vpop.eup %4105 }
0x138c   : > { %1943 = vrot.lane.b32.xlu2 %v4106_v59, %s4568_s24 }
0x138d   : > { %v4108_v0 = vpop.eup %4107 }
0x138e   : > { %v1925_v43 = vadd.f32 1.0, %v4108_v0 }
0x1390   : > { %4109 = vrcp.f32 %v1925_v43  ;;  %v1937_v6 = vand.u32 2147483648, %v1925_v43  ;;  %vm1931_vm5 = vweird.f32 %v1925_v43  ;;  %v1935_v47 = vand.u32 2147483647, %v1925_v43 }
0x1392   : > { %v1938_v8 = vor.u32 1.1754944e-38, %v1937_v6  ;;  %vm1936_vm7 = vcmp.eq.f32.partialorder %v1935_v47, 8.507059e+37 }
0x1396   : > { %v4110_v3 = vpop.eup %4109 }
0x1397   : > { %v1927_v39 = vmul.f32 %v4110_v3, %v1925_v43  ;;  %vm1932_vm0 = vweird.f32 %v4110_v3 }
0x1398   : > { %vm1933_vm6 = vmor %vm1931_vm5, %vm1932_vm0 }
0x1399   : > { %v1928_v42 = vsub.f32 1.0, %v1927_v39 }
0x139b   : > { %v1929_v5 = vmul.f32 %v4110_v3, %v1928_v42 }
0x139d   : > { %v1930_v46 = vadd.f32 %v4110_v3, %v1929_v5 }
0x139f   : > { %v1934_v34 = vsel %vm1933_vm6, %v4110_v3, %v1930_v46 }
0x13a0   : > { %v1939_v36 = vsel %vm1936_vm7, %v1938_v8, %v1934_v34 }
0x13a1   : > { %v1941_v38 = vmul.f32 %v1939_v36, %v1779_v51 }
0x13e6   : > { %v1944_v60 = vpop.permute.xlu2 %1943 }
0x13e7   : > { %v1946_v37 = vmul.f32 %v1944_v60, %v1939_v36 }
0x13e9   : > { %1948 = vrot.lane.b32.xlu0 %v1946_v37, %s4570_s10 }
0x13f1   : > { %1967 = vrot.lane.b32.xlu0 %v1866_v49, %s4570_s10 }
0x145b   : > { %v1949_v40 = vpop.permute.xlu0 %1948 }
0x145c   : > { %v1951_v41 = vadd.f32 %v1949_v40, %v1941_v38 }
0x145e   : > { %4111 = vtanh.f32 %v1951_v41 }
0x1463   : > { %v1968_v44 = vpop.permute.xlu0 %1967 }
0x1464   : > { %v4112_v45 = vpop.eup %4111  ;;  %1970 = vst.msk [vmem:[%s4958_s26] sm:$0x3] %vm758_vm13, %v1968_v44 }
0x1465   : > { %1954 = vrot.lane.b32.xlu1 %v4112_v45, %s4568_s24 }
0x146d   : > { %1974 = vrot.lane.b32.xlu1 %v1951_v41, %s4570_s10 }
0x14d7   : > { %v1955_v48 = vpop.permute.xlu1 %1954 }
0x14d8   : > { %v1957_v58 = vmul.f32 %v1955_v48, %v1939_v36 }
0x14da   : > { %1959 = vrot.lane.b32.xlu2 %v1957_v58, %s4569_s29 }
0x14df   : > { %v1975_v50 = vpop.permute.xlu1 %1974 }
0x14e0   : > { %3789 = vst.msk [vmem:[%s4958_s26 + $0x2] sm:$0x3] %vm758_vm13, %v1975_v50 }
0x1534   : > { %v1960_v49 = vpop.permute.xlu2 %1959 }
0x1535   : > { %3787 = vst.msk [vmem:[%s4952_s20 + $0xe] sm:$0x3] %vm758_vm13, %v1960_v49 }
0x1536   : > { %3788 = vst.msk [vmem:[%s4955_s25 + $0x2] sm:$0x3] %vm758_vm13, %v1960_v49 }
0x1537 PF: > { %p3790_p6 = scmp.ne.s32.totalorder %s4729_s13, 1 }
0x1538   : > { %s4571_s19 = smov (!%p3790_p6), 64   ;;  %s4572_s27 = smov (!%p3790_p6), 32  }
0x1539   : > { %1982 = sbr.rel (%p3790_p6) target bundleno = 10709 (0x29d5), region = 76  ;;  %s4573_s22 = smov (!%p3790_p6), 96  }
0x153e   : > { %2005 = vmatpush.msra.mxu0 %v4914_v19  ;;  %2028 = vmatpush.msra.mxu1 %v4890_v11  ;;  %v1983_v63 = vld [vmem:[%s4869_s8] sm:$0x3]  ;;  %vm1989_vm13 = vcmask 261120   ;;  %v3791_v3 = vld [vmem:[%s4869_s8 + $0x2] sm:$0x3]  ;;  %v5412_v8 = vperm.slane %v4936_v27, 0 }
0x153f   : > { %2096 = vmatpush.msra.mxu2 %v4928_v24  ;;  %2121 = vmatpush.msra.mxu3 %v4902_v15  ;;  %v3792_v39 = vld [vmem:[%s4873_s12 + $0x2] sm:$0x3]  ;;  %vm2179_vm5 = vcmask 254976  }
0x1540   : > { %2006 = vmatpush.msra.mxu0 %v4911_v18  ;;  %2029 = vmatpush.msra.mxu1 %v4887_v10 }
0x1541   : > { %2097 = vmatpush.msra.mxu2 %v4925_v23  ;;  %2122 = vmatpush.msra.mxu3 %v4899_v14 }
0x1542   : > { %2007 = vmatpush.msra.mxu0 %v4908_v17  ;;  %2030 = vmatpush.msra.mxu1 %v4884_v9 }
0x1543   : > { %2098 = vmatpush.msra.mxu2 %v4922_v22  ;;  %2123 = vmatpush.msra.mxu3 %v4896_v13 }
0x1544   : > { %2008 = vmatpush.msra.mxu0 %v4905_v16  ;;  %2031 = vmatpush.msra.mxu1 %v4881_v7 }
0x1545   : > { %3793 = vmatmul.msk.f32.vlgmr.msra.gmra.mxu0 %vm1989_vm13, %v1983_v63  ;;  %3794 = vmatmul.msk.f32.vlgmr.msra.gmra.mxu1 %vm1989_vm13, %v4948_v33 }
0x1546   : > { %2193 = vmatpush.msrb.mxu0 %v4914_v19  ;;  %2216 = vmatpush.msrb.mxu1 %v4890_v11 }
0x1547   : > { %2099 = vmatpush.msra.mxu2 %v4917_v20  ;;  %2124 = vmatpush.msra.mxu3 %v4893_v12 }
0x1548   : > { %2194 = vmatpush.msrb.mxu0 %v4911_v18  ;;  %2217 = vmatpush.msrb.mxu1 %v4887_v10 }
0x1549   : > { %2276 = vmatpush.msrb.mxu2 %v4928_v24  ;;  %2301 = vmatpush.msrb.mxu3 %v4902_v15 }
0x154a   : > { %2195 = vmatpush.msrb.mxu0 %v4908_v17  ;;  %2218 = vmatpush.msrb.mxu1 %v4884_v9 }
0x154b   : > { %2277 = vmatpush.msrb.mxu2 %v4925_v23  ;;  %2302 = vmatpush.msrb.mxu3 %v4899_v14 }
0x154c   : > { %2196 = vmatpush.msrb.mxu0 %v4905_v16  ;;  %2219 = vmatpush.msrb.mxu1 %v4881_v7 }
0x154d   : > { %3801 = vmatmul.msk.f32.vlgmr.msrb.gmra.mxu1 %vm1989_vm13, %v4946_v32  ;;  %2278 = vmatpush.msrb.mxu2 %v4922_v22 }
0x154e   : > { %2365 = vmatpush.msra.mxu0 %v4914_v19  ;;  %2388 = vmatpush.msra.mxu1 %v4890_v11 }
0x154f   : > { %2279 = vmatpush.msrb.mxu2 %v4917_v20  ;;  %2303 = vmatpush.msrb.mxu3 %v4896_v13 }
0x1550   : > { %2366 = vmatpush.msra.mxu0 %v4911_v18  ;;  %2389 = vmatpush.msra.mxu1 %v4887_v10 }
0x1551   : > { %2304 = vmatpush.msrb.mxu3 %v4893_v12  ;;  %3796 = vmatmul.msk.f32.vlgmr.msra.gmra.mxu2 %vm1989_vm13, %v3791_v3 }
0x1552   : > { %2367 = vmatpush.msra.mxu0 %v4908_v17  ;;  %2390 = vmatpush.msra.mxu1 %v4884_v9 }
0x1553   : > { %2448 = vmatpush.msra.mxu2 %v4928_v24 }
0x1554   : > { %2368 = vmatpush.msra.mxu0 %v4905_v16  ;;  %2391 = vmatpush.msra.mxu1 %v4881_v7 }
0x1555   : > { %3808 = vmatmul.msk.f32.vlgmr.msra.gmra.mxu1 %vm1989_vm13, %v4944_v31  ;;  %2449 = vmatpush.msra.mxu2 %v4925_v23 }
0x1556   : > { %2560 = vmatpush.msrb.mxu1 %v4890_v11 }
0x1557   : > { %2450 = vmatpush.msra.mxu2 %v4922_v22 }
0x1558   : > { %2561 = vmatpush.msrb.mxu1 %v4887_v10 }
0x1559   : > { %2451 = vmatpush.msra.mxu2 %v4917_v20 }
0x155a   : > { %2562 = vmatpush.msrb.mxu1 %v4884_v9 }
0x155c   : > { %2563 = vmatpush.msrb.mxu1 %v4881_v7 }
0x155d   : > { %3815 = vmatmul.msk.f32.vlgmr.msrb.gmra.mxu1 %vm1989_vm13, %v4942_v30 }
0x155e   : > { %2732 = vmatpush.msra.mxu1 %v4890_v11 }
0x1560   : > { %2733 = vmatpush.msra.mxu1 %v4887_v10 }
0x1562   : > { %2734 = vmatpush.msra.mxu1 %v4884_v9 }
0x1564   : > { %2735 = vmatpush.msra.mxu1 %v4881_v7 }
0x1565   : > { %3822 = vmatmul.msk.f32.vlgmr.msra.gmra.mxu1 %vm1989_vm13, %v4940_v29 }
0x1566   : > { %2904 = vmatpush.msrb.mxu1 %v4890_v11 }
0x1568   : > { %2905 = vmatpush.msrb.mxu1 %v4887_v10 }
0x156a   : > { %2906 = vmatpush.msrb.mxu1 %v4884_v9 }
0x156c   : > { %2907 = vmatpush.msrb.mxu1 %v4881_v7 }
0x156d   : > { %3829 = vmatmul.msk.f32.vlgmr.msrb.gmra.mxu1 %vm1989_vm13, %v4938_v28  ;;  %v5380_v28 = vperm.slane %v4933_v26, 0 }
0x156e   : > { %3076 = vmatpush.msra.mxu1 %v4890_v11 }
0x1570   : > { %3077 = vmatpush.msra.mxu1 %v4887_v10 }
0x1572   : > { %3078 = vmatpush.msra.mxu1 %v4884_v9 }
0x1574   : > { %3079 = vmatpush.msra.mxu1 %v4881_v7 }
0x1575   : > { %3836 = vmatmul.msk.f32.vlgmr.msra.gmra.mxu1 %vm1989_vm13, %v4930_v25 }
0x1576   : > { %3248 = vmatpush.msrb.mxu1 %v4890_v11 }
0x1578   : > { %3249 = vmatpush.msrb.mxu1 %v4887_v10  ;;  %v1986_v10 = vld [vmem:[%s4873_s12] sm:$0x3] }
0x157a   : > { %3250 = vmatpush.msrb.mxu1 %v4884_v9 }
0x157c   : > { %3251 = vmatpush.msrb.mxu1 %v4881_v7 }
0x157d   : > { %3843 = vmatmul.msk.f32.vlgmr.msrb.gmra.mxu1 %vm1989_vm13, %v4919_v21 }
0x15c2   : > { %v2010_v29 = vpop.f32.mrf.mxu0  ;;  %v2033_v30 = vpop.f32.mrf.mxu1 }
0x15c3   : > { %v2034_v31 = vadd.f32 %v2033_v30, %v2010_v29 }
0x15c5   : > { %v2039_v32 = vadd.f32 %v5380_v28, %v2034_v31 }
0x15c7   : > { %4113 = vtanh.f32 %v2039_v32  ;;  %v3795_v7 = vmul.f32 -1.442695, %v2039_v32 }
0x15c9   : > { %4115 = vpow2.f32 %v3795_v7 }
0x15ca   : > { %v2221_v5 = vpop.f32.mrf.mxu1 }
0x15cd   : > { %v4114_v25 = vpop.eup %4113 }
0x15ce   : > { %2066 = vrot.lane.b32.xlu0 %v4114_v25, %s4571_s19 }
0x15cf   : > { %v4116_v9 = vpop.eup %4115 }
0x15d0   : > { %v2044_v11 = vadd.f32 1.0, %v4116_v9 }
0x15d2   : > { %4117 = vrcp.f32 %v2044_v11  ;;  %v2056_v52 = vand.u32 2147483648, %v2044_v11  ;;  %vm2050_vm9 = vweird.f32 %v2044_v11  ;;  %v2054_v35 = vand.u32 2147483647, %v2044_v11 }
0x15d4   : > { %v2057_v53 = vor.u32 1.1754944e-38, %v2056_v52  ;;  %vm2055_vm11 = vcmp.eq.f32.partialorder %v2054_v35, 8.507059e+37  ;;  %v2101_v34 = vpop.f32.mrf.mxu2 }
0x15d6   : > { %2061 = vrot.lane.b32.xlu0 %v1986_v10, %s4572_s27 }
0x15d8   : > { %v4118_v21 = vpop.eup %4117 }
0x15d9   : > { %v2046_v26 = vmul.f32 %v4118_v21, %v2044_v11  ;;  %vm2051_vm8 = vweird.f32 %v4118_v21 }
0x15da   : > { %vm2052_vm10 = vmor %vm2050_vm9, %vm2051_vm8 }
0x15db   : > { %v2047_v33 = vsub.f32 1.0, %v2046_v26 }
0x15dd   : > { %v2048_v51 = vmul.f32 %v4118_v21, %v2047_v33 }
0x15df   : > { %v2049_v62 = vadd.f32 %v4118_v21, %v2048_v51 }
0x15e1   : > { %v2053_v1 = vsel %vm2052_vm10, %v4118_v21, %v2049_v62 }
0x15e2   : > { %v2058_v2 = vsel %vm2055_vm11, %v2057_v53, %v2053_v1 }
0x1640   : > { %v2067_v4 = vpop.permute.xlu0 %2066 }
0x1641   : > { %v2069_v54 = vmul.f32 %v2067_v4, %v2058_v2 }
0x1643   : > { %2071 = vrot.lane.b32.xlu1 %v2069_v54, %s4573_s22 }
0x1648   : > { %v2062_v55 = vpop.permute.xlu0 %2061 }
0x1649   : > { %v2064_v56 = vmul.f32 %v2062_v55, %v2058_v2 }
0x16b5   : > { %v2072_v57 = vpop.permute.xlu1 %2071 }
0x16b6   : > { %v5387_v59 = vadd.f32 %v2072_v57, %v2064_v56 }
0x16b8   : > { %4119 = vtanh.f32 %v5387_v59 }
0x16be   : > { %v4120_v61 = vpop.eup %4119 }
0x16bf   : > { %2077 = vrot.lane.b32.xlu1 %v4120_v61, %s4571_s19 }
0x16c7   : > { %2154 = vrot.lane.b32.xlu1 %v3792_v39, %s4572_s27 }
0x1731   : > { %v2078_v0 = vpop.permute.xlu1 %2077 }
0x1732   : > { %v2080_v43 = vmul.f32 %v2078_v0, %v2058_v2 }
0x1734   : > { %2105 = vrot.lane.b32.xlu2 %v2080_v43, %s4572_s27 }
0x1739   : > { %v2155_v55 = vpop.permute.xlu1 %2154 }
0x178e   : > { %v2106_v42 = vpop.permute.xlu2 %2105 }
0x178f   : > { %3797 = vmatmul.msk.f32.vlgmr.msra.gmra.mxu3 %vm1989_vm13, %v2106_v42  ;;  %3800 = vmatmul.msk.f32.vlgmr.msrb.gmra.mxu0 %vm1989_vm13, %v2106_v42 }
0x1790   : > { %2473 = vmatpush.msra.mxu3 %v4902_v15  ;;  %2537 = vmatpush.msrb.mxu0 %v4914_v19 }
0x1792   : > { %2474 = vmatpush.msra.mxu3 %v4899_v14  ;;  %2538 = vmatpush.msrb.mxu0 %v4911_v18 }
0x1794   : > { %2475 = vmatpush.msra.mxu3 %v4896_v13  ;;  %2539 = vmatpush.msrb.mxu0 %v4908_v17 }
0x1796   : > { %2476 = vmatpush.msra.mxu3 %v4893_v12  ;;  %2540 = vmatpush.msrb.mxu0 %v4905_v16 }
0x180c   : > { %v2198_v46 = vpop.f32.mrf.mxu0 }
0x180d   : > { %v2222_v6 = vadd.f32 %v2221_v5, %v2198_v46 }
0x180f   : > { %v2224_v47 = vadd.f32 %v2222_v6, %v5380_v28 }
0x1811   : > { %4121 = vtanh.f32 %v2224_v47  ;;  %v3802_v48 = vmul.f32 -1.442695, %v2224_v47 }
0x1812   : > { %v2126_v36 = vpop.f32.mrf.mxu3 }
0x1813   : > { %v2127_v60 = vadd.f32 %v2126_v36, %v2101_v34  ;;  %v2393_v36 = vpop.f32.mrf.mxu1 }
0x1815   : > { %v2132_v37 = vadd.f32 %v5412_v8, %v2127_v60 }
0x1817   : > { %v4122_v38 = vpop.eup %4121  ;;  %4123 = vtanh.f32 %v2132_v37  ;;  %v3798_v41 = vmul.f32 -1.442695, %v2132_v37 }
0x1818   : > { %2247 = vrot.lane.b32.xlu0 %v4122_v38, %s4571_s19 }
0x1819   : > { %4125 = vpow2.f32 %v3798_v41 }
0x181d   : > { %v4124_v40 = vpop.eup %4123 }
0x181e   : > { %2159 = vrot.lane.b32.xlu2 %v4124_v40, %s4571_s19 }
0x181f   : > { %v4126_v44 = vpop.eup %4125 }
0x1820   : > { %v2137_v45 = vadd.f32 1.0, %v4126_v44 }
0x1822   : > { %4127 = vrcp.f32 %v2137_v45  ;;  %v2149_v31 = vand.u32 2147483648, %v2137_v45  ;;  %vm2143_vm14 = vweird.f32 %v2137_v45  ;;  %v2147_v32 = vand.u32 2147483647, %v2137_v45 }
0x1823   : > { %4129 = vpow2.f32 %v3802_v48 }
0x1824   : > { %v2150_v7 = vor.u32 1.1754944e-38, %v2149_v31  ;;  %vm2148_vm1 = vcmp.eq.f32.partialorder %v2147_v32, 8.507059e+37 }
0x1828   : > { %v4128_v27 = vpop.eup %4127 }
0x1829   : > { %v2139_v58 = vmul.f32 %v4128_v27, %v2137_v45  ;;  %v4130_v50 = vpop.eup %4129  ;;  %vm2144_vm12 = vweird.f32 %v4128_v27 }
0x182a   : > { %v2229_v63 = vadd.f32 1.0, %v4130_v50  ;;  %vm2145_vm15 = vmor %vm2143_vm14, %vm2144_vm12 }
0x182b   : > { %v2140_v49 = vsub.f32 1.0, %v2139_v58 }
0x182c   : > { %4131 = vrcp.f32 %v2229_v63  ;;  %v2241_v52 = vand.u32 2147483648, %v2229_v63  ;;  %vm2235_vm3 = vweird.f32 %v2229_v63  ;;  %v2239_v35 = vand.u32 2147483647, %v2229_v63 }
0x182d   : > { %v2141_v29 = vmul.f32 %v4128_v27, %v2140_v49 }
0x182e   : > { %v2242_v53 = vor.u32 1.1754944e-38, %v2241_v52  ;;  %vm2240_vm0 = vcmp.eq.f32.partialorder %v2239_v35, 8.507059e+37 }
0x182f   : > { %v2142_v30 = vadd.f32 %v4128_v27, %v2141_v29 }
0x1831   : > { %v2146_v10 = vsel %vm2145_vm15, %v4128_v27, %v2142_v30 }
0x1832   : > { %v4132_v25 = vpop.eup %4131  ;;  %v2151_v11 = vsel %vm2148_vm1, %v2150_v7, %v2146_v10 }
0x1833   : > { %v2231_v9 = vmul.f32 %v4132_v25, %v2229_v63  ;;  %vm2236_vm2 = vweird.f32 %v4132_v25  ;;  %v2157_v56 = vmul.f32 %v2155_v55, %v2151_v11 }
0x1834   : > { %vm2237_vm4 = vmor %vm2235_vm3, %vm2236_vm2 }
0x1835   : > { %v2232_v33 = vsub.f32 1.0, %v2231_v9 }
0x1837   : > { %v2233_v51 = vmul.f32 %v4132_v25, %v2232_v33 }
0x1839   : > { %v2234_v62 = vadd.f32 %v4132_v25, %v2233_v51 }
0x183b   : > { %v2238_v1 = vsel %vm2237_vm4, %v4132_v25, %v2234_v62 }
0x183c   : > { %v2243_v2 = vsel %vm2240_vm0, %v2242_v53, %v2238_v1 }
0x183d   : > { %v2245_v43 = vmul.f32 %v2243_v2, %v5387_v59 }
0x1878   : > { %v2160_v21 = vpop.permute.xlu2 %2159 }
0x1879   : > { %v2162_v26 = vmul.f32 %v2160_v21, %v2151_v11 }
0x187b   : > { %2164 = vrot.lane.b32.xlu2 %v2162_v26, %s4573_s22 }
0x188a   : > { %v2248_v4 = vpop.permute.xlu0 %2247 }
0x188b   : > { %v2250_v54 = vmul.f32 %v2248_v4, %v2243_v2 }
0x188d   : > { %2252 = vrot.lane.b32.xlu0 %v2250_v54, %s4573_s22 }
0x18d5   : > { %v2165_v57 = vpop.permute.xlu2 %2164 }
0x18d6   : > { %v5419_v61 = vadd.f32 %v2165_v57, %v2157_v56 }
0x18d8   : > { %4133 = vtanh.f32 %v5419_v61 }
0x18de   : > { %v4134_v0 = vpop.eup %4133 }
0x18df   : > { %2170 = vrot.lane.b32.xlu1 %v4134_v0, %s4571_s19 }
0x18ff   : > { %v2253_v3 = vpop.permute.xlu0 %2252 }
0x1900   : > { %v5424_v39 = vadd.f32 %v2253_v3, %v2245_v43 }
0x1902   : > { %4135 = vtanh.f32 %v5424_v39 }
0x1908   : > { %v4136_v42 = vpop.eup %4135 }
0x1909   : > { %2258 = vrot.lane.b32.xlu2 %v4136_v42, %s4571_s19 }
0x1951   : > { %v2171_v5 = vpop.permute.xlu1 %2170 }
0x1952   : > { %v2173_v46 = vmul.f32 %v2171_v5, %v2151_v11 }
0x1954   : > { %2175 = vrot.lane.b32.xlu0 %v2173_v46, %s4572_s27 }
0x1963   : > { %v2259_v6 = vpop.permute.xlu2 %2258 }
0x1964   : > { %v2261_v47 = vmul.f32 %v2259_v6, %v2243_v2 }
0x1966   : > { %2285 = vrot.lane.b32.xlu1 %v2261_v47, %s4572_s27 }
0x19c6   : > { %v2176_v34 = vpop.permute.xlu0 %2175 }
0x19c7   : > { %3799 = vst.msk [vmem:[%s4952_s20 + $0xe] sm:$0x3] %vm2179_vm5, %v2176_v34  ;;  %3803 = vmatmul.msk.f32.vlgmr.msrb.gmra.mxu2 %vm1989_vm13, %v2176_v34 }
0x19c8   : > { %2620 = vmatpush.msrb.mxu2 %v4928_v24 }
0x19ca   : > { %2621 = vmatpush.msrb.mxu2 %v4925_v23 }
0x19cc   : > { %2622 = vmatpush.msrb.mxu2 %v4922_v22 }
0x19ce   : > { %2623 = vmatpush.msrb.mxu2 %v4917_v20 }
0x19d8   : > { %v2286_v59 = vpop.permute.xlu1 %2285 }
0x19d9   : > { %3804 = vmatmul.msk.f32.vlgmr.msrb.gmra.mxu3 %vm1989_vm13, %v2286_v59  ;;  %3807 = vmatmul.msk.f32.vlgmr.msra.gmra.mxu0 %vm1989_vm13, %v2286_v59 }
0x19da   : > { %2645 = vmatpush.msrb.mxu3 %v4902_v15  ;;  %2709 = vmatpush.msra.mxu0 %v4914_v19 }
0x19dc   : > { %2646 = vmatpush.msrb.mxu3 %v4899_v14  ;;  %2710 = vmatpush.msra.mxu0 %v4911_v18 }
0x19de   : > { %2647 = vmatpush.msrb.mxu3 %v4896_v13  ;;  %2711 = vmatpush.msra.mxu0 %v4908_v17 }
0x19e0   : > { %2648 = vmatpush.msrb.mxu3 %v4893_v12  ;;  %2712 = vmatpush.msra.mxu0 %v4905_v16 }
0x1a4a   : > { %v2281_v40 = vpop.f32.mrf.mxu2 }
0x1a56   : > { %v2370_v60 = vpop.f32.mrf.mxu0 }
0x1a57   : > { %v2394_v37 = vadd.f32 %v2393_v36, %v2370_v60 }
0x1a59   : > { %v2396_v38 = vadd.f32 %v2394_v37, %v5380_v28 }
0x1a5b   : > { %4137 = vtanh.f32 %v2396_v38  ;;  %v3809_v63 = vmul.f32 -1.442695, %v2396_v38 }
0x1a5c   : > { %v2306_v41 = vpop.f32.mrf.mxu3 }
0x1a5d   : > { %v2307_v44 = vadd.f32 %v2306_v41, %v2281_v40  ;;  %v2565_v40 = vpop.f32.mrf.mxu1 }
0x1a5f   : > { %v2309_v45 = vadd.f32 %v2307_v44, %v5412_v8 }
0x1a61   : > { %v4138_v48 = vpop.eup %4137  ;;  %4139 = vtanh.f32 %v2309_v45  ;;  %v3805_v58 = vmul.f32 -1.442695, %v2309_v45 }
0x1a62   : > { %2419 = vrot.lane.b32.xlu0 %v4138_v48, %s4571_s19 }
0x1a63   : > { %4141 = vpow2.f32 %v3805_v58 }
0x1a67   : > { %v4140_v27 = vpop.eup %4139 }
0x1a68   : > { %2332 = vrot.lane.b32.xlu2 %v4140_v27, %s4571_s19 }
0x1a69   : > { %v4142_v50 = vpop.eup %4141 }
0x1a6a   : > { %v2314_v49 = vadd.f32 1.0, %v4142_v50 }
0x1a6c   : > { %4143 = vrcp.f32 %v2314_v49  ;;  %v2326_v9 = vand.u32 2147483648, %v2314_v49  ;;  %vm2320_vm7 = vweird.f32 %v2314_v49  ;;  %v2324_v11 = vand.u32 2147483647, %v2314_v49 }
0x1a6d   : > { %4145 = vpow2.f32 %v3809_v63 }
0x1a6e   : > { %v2327_v33 = vor.u32 1.1754944e-38, %v2326_v9  ;;  %vm2325_vm9 = vcmp.eq.f32.partialorder %v2324_v11, 8.507059e+37 }
0x1a72   : > { %v4144_v29 = vpop.eup %4143 }
0x1a73   : > { %v2316_v30 = vmul.f32 %v4144_v29, %v2314_v49  ;;  %v4146_v31 = vpop.eup %4145  ;;  %vm2321_vm6 = vweird.f32 %v4144_v29 }
0x1a74   : > { %v2401_v25 = vadd.f32 1.0, %v4146_v31  ;;  %vm2322_vm8 = vmor %vm2320_vm7, %vm2321_vm6 }
0x1a75   : > { %v2317_v32 = vsub.f32 1.0, %v2316_v30 }
0x1a76   : > { %4147 = vrcp.f32 %v2401_v25  ;;  %v2413_v4 = vand.u32 2147483648, %v2401_v25  ;;  %vm2407_vm11 = vweird.f32 %v2401_v25  ;;  %v2411_v54 = vand.u32 2147483647, %v2401_v25 }
0x1a77   : > { %v2318_v10 = vmul.f32 %v4144_v29, %v2317_v32 }
0x1a78   : > { %v2414_v56 = vor.u32 1.1754944e-38, %v2413_v4  ;;  %vm2412_vm14 = vcmp.eq.f32.partialorder %v2411_v54, 8.507059e+37 }
0x1a79   : > { %v2319_v7 = vadd.f32 %v4144_v29, %v2318_v10 }
0x1a7b   : > { %v2323_v26 = vsel %vm2322_vm8, %v4144_v29, %v2319_v7 }
0x1a7c   : > { %v4148_v21 = vpop.eup %4147  ;;  %v2328_v62 = vsel %vm2325_vm9, %v2327_v33, %v2323_v26 }
0x1a7d   : > { %v2403_v51 = vmul.f32 %v4148_v21, %v2401_v25  ;;  %vm2408_vm10 = vweird.f32 %v4148_v21  ;;  %v2330_v46 = vmul.f32 %v2328_v62, %v5419_v61 }
0x1a7e   : > { %vm2409_vm12 = vmor %vm2407_vm11, %vm2408_vm10 }
0x1a7f   : > { %v2404_v1 = vsub.f32 1.0, %v2403_v51 }
0x1a81   : > { %v2405_v53 = vmul.f32 %v4148_v21, %v2404_v1 }
0x1a83   : > { %v2406_v2 = vadd.f32 %v4148_v21, %v2405_v53 }
0x1a85   : > { %v2410_v55 = vsel %vm2409_vm12, %v4148_v21, %v2406_v2 }
0x1a86   : > { %v2415_v57 = vsel %vm2412_vm14, %v2414_v56, %v2410_v55 }
0x1a87   : > { %v2417_v3 = vmul.f32 %v2415_v57, %v5424_v39 }
0x1ac2   : > { %v2333_v52 = vpop.permute.xlu2 %2332 }
0x1ac3   : > { %v2335_v35 = vmul.f32 %v2333_v52, %v2328_v62 }
0x1ac5   : > { %2337 = vrot.lane.b32.xlu1 %v2335_v35, %s4573_s22 }
0x1ad4   : > { %v2420_v0 = vpop.permute.xlu0 %2419 }
0x1ad5   : > { %v2422_v43 = vmul.f32 %v2420_v0, %v2415_v57 }
0x1ad7   : > { %2424 = vrot.lane.b32.xlu2 %v2422_v43, %s4573_s22 }
0x1b31   : > { %v2425_v42 = vpop.permute.xlu2 %2424 }
0x1b32   : > { %v5454_v5 = vadd.f32 %v2425_v42, %v2417_v3 }
0x1b34   : > { %4149 = vtanh.f32 %v5454_v5 }
0x1b37   : > { %v2338_v6 = vpop.permute.xlu1 %2337 }
0x1b38   : > { %v5458_v47 = vadd.f32 %v2338_v6, %v2330_v46 }
0x1b3a   : > { %v4150_v34 = vpop.eup %4149  ;;  %4151 = vtanh.f32 %v5458_v47 }
0x1b3b   : > { %2430 = vrot.lane.b32.xlu1 %v4150_v34, %s4571_s19 }
0x1b40   : > { %v4152_v59 = vpop.eup %4151 }
0x1b41   : > { %2343 = vrot.lane.b32.xlu0 %v4152_v59, %s4571_s19 }
0x1bad   : > { %v2431_v39 = vpop.permute.xlu1 %2430 }
0x1bae   : > { %v2433_v36 = vmul.f32 %v2431_v39, %v2415_v57 }
0x1bb0   : > { %2457 = vrot.lane.b32.xlu0 %v2433_v36, %s4572_s27 }
0x1bb3   : > { %v2344_v60 = vpop.permute.xlu0 %2343 }
0x1bb4   : > { %v2346_v37 = vmul.f32 %v2344_v60, %v2328_v62 }
0x1bb6   : > { %2348 = vrot.lane.b32.xlu2 %v2346_v37, %s4572_s27 }
0x1c10   : > { %v2349_v61 = vpop.permute.xlu2 %2348 }
0x1c11   : > { %3806 = vst.msk [vmem:[%s4952_s20 + $0xc] sm:$0x3] %vm2179_vm5, %v2349_v61  ;;  %3810 = vmatmul.msk.f32.vlgmr.msra.gmra.mxu2 %vm1989_vm13, %v2349_v61 }
0x1c12   : > { %2792 = vmatpush.msra.mxu2 %v4928_v24 }
0x1c14   : > { %2793 = vmatpush.msra.mxu2 %v4925_v23 }
0x1c16   : > { %2794 = vmatpush.msra.mxu2 %v4922_v22 }
0x1c18   : > { %2795 = vmatpush.msra.mxu2 %v4917_v20 }
0x1c22   : > { %v2458_v38 = vpop.permute.xlu0 %2457 }
0x1c23   : > { %3811 = vmatmul.msk.f32.vlgmr.msra.gmra.mxu3 %vm1989_vm13, %v2458_v38  ;;  %3814 = vmatmul.msk.f32.vlgmr.msrb.gmra.mxu0 %vm1989_vm13, %v2458_v38 }
0x1c24   : > { %2817 = vmatpush.msra.mxu3 %v4902_v15  ;;  %2881 = vmatpush.msrb.mxu0 %v4914_v19 }
0x1c26   : > { %2818 = vmatpush.msra.mxu3 %v4899_v14  ;;  %2882 = vmatpush.msrb.mxu0 %v4911_v18 }
0x1c28   : > { %2819 = vmatpush.msra.mxu3 %v4896_v13  ;;  %2883 = vmatpush.msrb.mxu0 %v4908_v17 }
0x1c2a   : > { %2820 = vmatpush.msra.mxu3 %v4893_v12  ;;  %2884 = vmatpush.msrb.mxu0 %v4905_v16 }
0x1c94   : > { %v2453_v48 = vpop.f32.mrf.mxu2 }
0x1ca0   : > { %v2542_v41 = vpop.f32.mrf.mxu0 }
0x1ca1   : > { %v2566_v44 = vadd.f32 %v2565_v40, %v2542_v41 }
0x1ca3   : > { %v2568_v45 = vadd.f32 %v2566_v44, %v5380_v28 }
0x1ca5   : > { %4153 = vtanh.f32 %v2568_v45  ;;  %v3816_v29 = vmul.f32 -1.442695, %v2568_v45 }
0x1ca6   : > { %v2478_v27 = vpop.f32.mrf.mxu3 }
0x1ca7   : > { %v2479_v58 = vadd.f32 %v2478_v27, %v2453_v48  ;;  %v2737_v48 = vpop.f32.mrf.mxu1 }
0x1ca9   : > { %v2481_v50 = vadd.f32 %v2479_v58, %v5412_v8 }
0x1cab   : > { %v4154_v49 = vpop.eup %4153  ;;  %4155 = vtanh.f32 %v2481_v50  ;;  %v3812_v10 = vmul.f32 -1.442695, %v2481_v50 }
0x1cac   : > { %2591 = vrot.lane.b32.xlu2 %v4154_v49, %s4571_s19  ;;  %4157 = vpow2.f32 %v3816_v29 }
0x1cb1   : > { %v4156_v63 = vpop.eup %4155 }
0x1cb2   : > { %2504 = vrot.lane.b32.xlu1 %v4156_v63, %s4571_s19  ;;  %v4158_v30 = vpop.eup %4157 }
0x1cb3   : > { %v2573_v31 = vadd.f32 1.0, %v4158_v30 }
0x1cb5   : > { %4159 = vrcp.f32 %v2573_v31  ;;  %v2585_v21 = vand.u32 2147483648, %v2573_v31  ;;  %vm2579_vm1 = vweird.f32 %v2573_v31  ;;  %v2583_v33 = vand.u32 2147483647, %v2573_v31 }
0x1cb6   : > { %4161 = vpow2.f32 %v3812_v10 }
0x1cb7   : > { %v2586_v52 = vor.u32 1.1754944e-38, %v2585_v21  ;;  %vm2584_vm3 = vcmp.eq.f32.partialorder %v2583_v33, 8.507059e+37 }
0x1cbb   : > { %v4160_v32 = vpop.eup %4159 }
0x1cbc   : > { %v2575_v25 = vmul.f32 %v4160_v32, %v2573_v31  ;;  %vm2580_vm15 = vweird.f32 %v4160_v32  ;;  %v4162_v26 = vpop.eup %4161 }
0x1cbd   : > { %vm2581_vm2 = vmor %vm2579_vm1, %vm2580_vm15  ;;  %v2486_v62 = vadd.f32 1.0, %v4162_v26 }
0x1cbe   : > { %v2576_v7 = vsub.f32 1.0, %v2575_v25 }
0x1cbf   : > { %4163 = vrcp.f32 %v2486_v62  ;;  %v2498_v57 = vand.u32 2147483648, %v2486_v62  ;;  %vm2492_vm0 = vweird.f32 %v2486_v62  ;;  %v2496_v0 = vand.u32 2147483647, %v2486_v62 }
0x1cc0   : > { %v2577_v9 = vmul.f32 %v4160_v32, %v2576_v7 }
0x1cc1   : > { %v2499_v3 = vor.u32 1.1754944e-38, %v2498_v57  ;;  %vm2497_vm7 = vcmp.eq.f32.partialorder %v2496_v0, 8.507059e+37 }
0x1cc2   : > { %v2578_v11 = vadd.f32 %v4160_v32, %v2577_v9 }
0x1cc4   : > { %v2582_v51 = vsel %vm2581_vm2, %v4160_v32, %v2578_v11 }
0x1cc5   : > { %v2587_v35 = vsel %vm2584_vm3, %v2586_v52, %v2582_v51  ;;  %v4164_v2 = vpop.eup %4163 }
0x1cc6   : > { %v2488_v4 = vmul.f32 %v4164_v2, %v2486_v62  ;;  %vm2493_vm4 = vweird.f32 %v4164_v2  ;;  %v2589_v34 = vmul.f32 %v2587_v35, %v5454_v5 }
0x1cc7   : > { %vm2494_vm6 = vmor %vm2492_vm0, %vm2493_vm4 }
0x1cc8   : > { %v2489_v54 = vsub.f32 1.0, %v2488_v4 }
0x1cca   : > { %v2490_v55 = vmul.f32 %v4164_v2, %v2489_v54 }
0x1ccc   : > { %v2491_v56 = vadd.f32 %v4164_v2, %v2490_v55 }
0x1cce   : > { %v2495_v43 = vsel %vm2494_vm6, %v4164_v2, %v2491_v56 }
0x1ccf   : > { %v2500_v42 = vsel %vm2497_vm7, %v2499_v3, %v2495_v43 }
0x1cd0   : > { %v2502_v60 = vmul.f32 %v2500_v42, %v5458_v47 }
0x1d06   : > { %v2592_v1 = vpop.permute.xlu2 %2591 }
0x1d07   : > { %v2594_v53 = vmul.f32 %v2592_v1, %v2587_v35 }
0x1d09   : > { %2596 = vrot.lane.b32.xlu1 %v2594_v53, %s4573_s22 }
0x1d24   : > { %v2505_v46 = vpop.permute.xlu1 %2504 }
0x1d25   : > { %v2507_v6 = vmul.f32 %v2505_v46, %v2500_v42 }
0x1d27   : > { %2509 = vrot.lane.b32.xlu0 %v2507_v6, %s4573_s22 }
0x1d7b   : > { %v2597_v59 = vpop.permute.xlu1 %2596 }
0x1d7c   : > { %v5489_v39 = vadd.f32 %v2597_v59, %v2589_v34 }
0x1d7e   : > { %4165 = vtanh.f32 %v5489_v39 }
0x1d84   : > { %v4166_v36 = vpop.eup %4165 }
0x1d85   : > { %2602 = vrot.lane.b32.xlu0 %v4166_v36, %s4571_s19 }
0x1d99   : > { %v2510_v37 = vpop.permute.xlu0 %2509 }
0x1d9a   : > { %v5494_v61 = vadd.f32 %v2510_v37, %v2502_v60 }
0x1d9c   : > { %4167 = vtanh.f32 %v5494_v61 }
0x1da2   : > { %v4168_v38 = vpop.eup %4167 }
0x1da3   : > { %2515 = vrot.lane.b32.xlu2 %v4168_v38, %s4571_s19 }
0x1df7   : > { %v2603_v40 = vpop.permute.xlu0 %2602 }
0x1df8   : > { %v2605_v5 = vmul.f32 %v2603_v40, %v2587_v35 }
0x1dfa   : > { %2629 = vrot.lane.b32.xlu2 %v2605_v5, %s4572_s27 }
0x1dfd   : > { %v2516_v41 = vpop.permute.xlu2 %2515 }
0x1dfe   : > { %v2518_v44 = vmul.f32 %v2516_v41, %v2500_v42 }
0x1e00   : > { %2520 = vrot.lane.b32.xlu1 %v2518_v44, %s4572_s27 }
0x1e54   : > { %v2630_v45 = vpop.permute.xlu2 %2629 }
0x1e55   : > { %3818 = vmatmul.msk.f32.vlgmr.msrb.gmra.mxu3 %vm1989_vm13, %v2630_v45  ;;  %3821 = vmatmul.msk.f32.vlgmr.msra.gmra.mxu0 %vm1989_vm13, %v2630_v45 }
0x1e56   : > { %2989 = vmatpush.msrb.mxu3 %v4902_v15  ;;  %3053 = vmatpush.msra.mxu0 %v4914_v19 }
0x1e58   : > { %2990 = vmatpush.msrb.mxu3 %v4899_v14  ;;  %3054 = vmatpush.msra.mxu0 %v4911_v18 }
0x1e5a   : > { %2991 = vmatpush.msrb.mxu3 %v4896_v13  ;;  %3055 = vmatpush.msra.mxu0 %v4908_v17 }
0x1e5c   : > { %2992 = vmatpush.msrb.mxu3 %v4893_v12  ;;  %3056 = vmatpush.msra.mxu0 %v4905_v16 }
0x1e72   : > { %v2521_v47 = vpop.permute.xlu1 %2520 }
0x1e73   : > { %3813 = vst.msk [vmem:[%s4952_s20 + $0xa] sm:$0x3] %vm2179_vm5, %v2521_v47  ;;  %3817 = vmatmul.msk.f32.vlgmr.msrb.gmra.mxu2 %vm1989_vm13, %v2521_v47 }
0x1e74   : > { %2964 = vmatpush.msrb.mxu2 %v4928_v24 }
0x1e76   : > { %2965 = vmatpush.msrb.mxu2 %v4925_v23 }
0x1e78   : > { %2966 = vmatpush.msrb.mxu2 %v4922_v22 }
0x1e7a   : > { %2967 = vmatpush.msrb.mxu2 %v4917_v20 }
0x1ed2   : > { %v2714_v27 = vpop.f32.mrf.mxu0 }
0x1ed3   : > { %v2738_v58 = vadd.f32 %v2737_v48, %v2714_v27 }
0x1ed5   : > { %v2740_v50 = vadd.f32 %v2738_v58, %v5380_v28 }
0x1ed7   : > { %4169 = vtanh.f32 %v2740_v50  ;;  %v3823_v25 = vmul.f32 -1.442695, %v2740_v50 }
0x1ed8   : > { %v2650_v63 = vpop.f32.mrf.mxu3 }
0x1edd   : > { %v4170_v49 = vpop.eup %4169 }
0x1ede   : > { %2763 = vrot.lane.b32.xlu1 %v4170_v49, %s4571_s19 }
0x1ef6   : > { %v2625_v29 = vpop.f32.mrf.mxu2 }
0x1ef7   : > { %v2651_v30 = vadd.f32 %v2650_v63, %v2625_v29 }
0x1ef9   : > { %v2653_v31 = vadd.f32 %v2651_v30, %v5412_v8 }
0x1efb   : > { %4171 = vtanh.f32 %v2653_v31  ;;  %v3819_v33 = vmul.f32 -1.442695, %v2653_v31 }
0x1efc   : > { %4173 = vpow2.f32 %v3823_v25 }
0x1f01   : > { %v4172_v32 = vpop.eup %4171 }
0x1f02   : > { %2676 = vrot.lane.b32.xlu0 %v4172_v32, %s4571_s19  ;;  %v4174_v10 = vpop.eup %4173 }
0x1f03   : > { %v2745_v7 = vadd.f32 1.0, %v4174_v10 }
0x1f05   : > { %4175 = vrcp.f32 %v2745_v7  ;;  %v2757_v62 = vand.u32 2147483648, %v2745_v7  ;;  %vm2751_vm9 = vweird.f32 %v2745_v7  ;;  %v2755_v52 = vand.u32 2147483647, %v2745_v7 }
0x1f06   : > { %4177 = vpow2.f32 %v3819_v33 }
0x1f07   : > { %v2758_v1 = vor.u32 1.1754944e-38, %v2757_v62  ;;  %vm2756_vm11 = vcmp.eq.f32.partialorder %v2755_v52, 8.507059e+37 }
0x1f0b   : > { %v4176_v9 = vpop.eup %4175 }
0x1f0c   : > { %v2747_v11 = vmul.f32 %v4176_v9, %v2745_v7  ;;  %vm2752_vm8 = vweird.f32 %v4176_v9  ;;  %v4178_v4 = vpop.eup %4177 }
0x1f0d   : > { %vm2753_vm10 = vmor %vm2751_vm9, %vm2752_vm8  ;;  %v2658_v55 = vadd.f32 1.0, %v4178_v4 }
0x1f0e   : > { %v2748_v21 = vsub.f32 1.0, %v2747_v11 }
0x1f0f   : > { %4179 = vrcp.f32 %v2658_v55  ;;  %v2670_v42 = vand.u32 2147483648, %v2658_v55  ;;  %vm2664_vm14 = vweird.f32 %v2658_v55  ;;  %v2668_v46 = vand.u32 2147483647, %v2658_v55 }
0x1f10   : > { %v2749_v26 = vmul.f32 %v4176_v9, %v2748_v21 }
0x1f11   : > { %v2671_v34 = vor.u32 1.1754944e-38, %v2670_v42  ;;  %vm2669_vm1 = vcmp.eq.f32.partialorder %v2668_v46, 8.507059e+37 }
0x1f12   : > { %v2750_v51 = vadd.f32 %v4176_v9, %v2749_v26 }
0x1f14   : > { %v2754_v35 = vsel %vm2753_vm10, %v4176_v9, %v2750_v51 }
0x1f15   : > { %v2759_v53 = vsel %vm2756_vm11, %v2758_v1, %v2754_v35  ;;  %v4180_v56 = vpop.eup %4179 }
0x1f16   : > { %v2660_v57 = vmul.f32 %v4180_v56, %v2658_v55  ;;  %vm2665_vm12 = vweird.f32 %v4180_v56  ;;  %v2761_v37 = vmul.f32 %v2759_v53, %v5489_v39 }
0x1f17   : > { %vm2666_vm15 = vmor %vm2664_vm14, %vm2665_vm12 }
0x1f18   : > { %v2661_v0 = vsub.f32 1.0, %v2660_v57 }
0x1f1a   : > { %v2662_v43 = vmul.f32 %v4180_v56, %v2661_v0 }
0x1f1c   : > { %v2663_v3 = vadd.f32 %v4180_v56, %v2662_v43 }
0x1f1e   : > { %v2667_v6 = vsel %vm2666_vm15, %v4180_v56, %v2663_v3 }
0x1f1f   : > { %v2672_v59 = vsel %vm2669_vm1, %v2671_v34, %v2667_v6 }
0x1f20   : > { %v2674_v41 = vmul.f32 %v2672_v59, %v5494_v61 }
0x1f50   : > { %v2764_v2 = vpop.permute.xlu1 %2763 }
0x1f51   : > { %v2766_v54 = vmul.f32 %v2764_v2, %v2759_v53 }
0x1f53   : > { %2768 = vrot.lane.b32.xlu0 %v2766_v54, %s4573_s22 }
0x1f74   : > { %v2677_v36 = vpop.permute.xlu0 %2676 }
0x1f75   : > { %v2679_v60 = vmul.f32 %v2677_v36, %v2672_v59 }
0x1f77   : > { %2681 = vrot.lane.b32.xlu2 %v2679_v60, %s4573_s22 }
0x1fc5   : > { %v2769_v38 = vpop.permute.xlu0 %2768 }
0x1fc6   : > { %v5524_v40 = vadd.f32 %v2769_v38, %v2761_v37 }
0x1fc8   : > { %4181 = vtanh.f32 %v5524_v40 }
0x1fce   : > { %v4182_v5 = vpop.eup %4181 }
0x1fcf   : > { %2774 = vrot.lane.b32.xlu2 %v4182_v5, %s4571_s19 }
0x1fd1   : > { %v2682_v44 = vpop.permute.xlu2 %2681 }
0x1fd2   : > { %v5529_v45 = vadd.f32 %v2682_v44, %v2674_v41 }
0x1fd4   : > { %4183 = vtanh.f32 %v5529_v45 }
0x1fda   : > { %v4184_v47 = vpop.eup %4183 }
0x1fdb   : > { %2687 = vrot.lane.b32.xlu1 %v4184_v47, %s4571_s19 }
0x2029   : > { %v2775_v48 = vpop.permute.xlu2 %2774 }
0x202a   : > { %v2777_v39 = vmul.f32 %v2775_v48, %v2759_v53 }
0x202c   : > { %2801 = vrot.lane.b32.xlu1 %v2777_v39, %s4572_s27 }
0x204d   : > { %v2688_v27 = vpop.permute.xlu1 %2687 }
0x204e   : > { %v2690_v58 = vmul.f32 %v2688_v27, %v2672_v59 }
0x2050   : > { %2692 = vrot.lane.b32.xlu0 %v2690_v58, %s4572_s27 }
0x209e   : > { %v2802_v50 = vpop.permute.xlu1 %2801 }
0x209f   : > { %3825 = vmatmul.msk.f32.vlgmr.msra.gmra.mxu3 %vm1989_vm13, %v2802_v50  ;;  %3828 = vmatmul.msk.f32.vlgmr.msrb.gmra.mxu0 %vm1989_vm13, %v2802_v50 }
0x20a0   : > { %3161 = vmatpush.msra.mxu3 %v4902_v15  ;;  %3225 = vmatpush.msrb.mxu0 %v4914_v19 }
0x20a2   : > { %3162 = vmatpush.msra.mxu3 %v4899_v14  ;;  %3226 = vmatpush.msrb.mxu0 %v4911_v18  ;;  %v2909_v18 = vpop.f32.mrf.mxu1 }
0x20a4   : > { %3163 = vmatpush.msra.mxu3 %v4896_v13  ;;  %3227 = vmatpush.msrb.mxu0 %v4908_v17 }
0x20a6   : > { %3164 = vmatpush.msra.mxu3 %v4893_v12  ;;  %3228 = vmatpush.msrb.mxu0 %v4905_v16 }
0x20c2   : > { %v2693_v61 = vpop.permute.xlu0 %2692 }
0x20c3   : > { %3820 = vst.msk [vmem:[%s4952_s20 + $0x8] sm:$0x3] %vm2179_vm5, %v2693_v61  ;;  %3824 = vmatmul.msk.f32.vlgmr.msra.gmra.mxu2 %vm1989_vm13, %v2693_v61 }
0x20c4   : > { %3136 = vmatpush.msra.mxu2 %v4928_v24 }
0x20c6   : > { %3137 = vmatpush.msra.mxu2 %v4925_v23 }
0x20c8   : > { %3138 = vmatpush.msra.mxu2 %v4922_v22 }
0x20ca   : > { %3139 = vmatpush.msra.mxu2 %v4917_v20 }
0x211c   : > { %v2886_v19 = vpop.f32.mrf.mxu0 }
0x211d   : > { %v2910_v17 = vadd.f32 %v2909_v18, %v2886_v19 }
0x211f   : > { %v2912_v49 = vadd.f32 %v2910_v17, %v5380_v28 }
0x2121   : > { %4185 = vtanh.f32 %v2912_v49  ;;  %v3830_v25 = vmul.f32 -1.442695, %v2912_v49 }
0x2122   : > { %v2822_v63 = vpop.f32.mrf.mxu3 }
0x2127   : > { %v4186_v16 = vpop.eup %4185 }
0x2128   : > { %2935 = vrot.lane.b32.xlu0 %v4186_v16, %s4571_s19 }
0x2146   : > { %v2797_v29 = vpop.f32.mrf.mxu2 }
0x2147   : > { %v2823_v30 = vadd.f32 %v2822_v63, %v2797_v29 }
0x2149   : > { %v2825_v31 = vadd.f32 %v2823_v30, %v5412_v8 }
0x214b   : > { %4187 = vtanh.f32 %v2825_v31  ;;  %v3826_v9 = vmul.f32 -1.442695, %v2825_v31 }
0x214c   : > { %4189 = vpow2.f32 %v3830_v25 }
0x2151   : > { %v4188_v32 = vpop.eup %4187 }
0x2152   : > { %2848 = vrot.lane.b32.xlu2 %v4188_v32, %s4571_s19  ;;  %v4190_v10 = vpop.eup %4189 }
0x2153   : > { %v2917_v7 = vadd.f32 1.0, %v4190_v10 }
0x2155   : > { %4191 = vrcp.f32 %v2917_v7  ;;  %v2929_v35 = vand.u32 2147483648, %v2917_v7  ;;  %vm2923_vm3 = vweird.f32 %v2917_v7  ;;  %v2927_v1 = vand.u32 2147483647, %v2917_v7 }
0x2156   : > { %4193 = vpow2.f32 %v3826_v9 }
0x2157   : > { %v2930_v4 = vor.u32 1.1754944e-38, %v2929_v35  ;;  %vm2928_vm0 = vcmp.eq.f32.partialorder %v2927_v1, 8.507059e+37 }
0x215b   : > { %v4192_v11 = vpop.eup %4191 }
0x215c   : > { %v2919_v21 = vmul.f32 %v4192_v11, %v2917_v7  ;;  %v4194_v26 = vpop.eup %4193  ;;  %vm2924_vm2 = vweird.f32 %v4192_v11 }
0x215d   : > { %v2830_v51 = vadd.f32 1.0, %v4194_v26  ;;  %vm2925_vm4 = vmor %vm2923_vm3, %vm2924_vm2 }
0x215e   : > { %v2920_v33 = vsub.f32 1.0, %v2919_v21 }
0x215f   : > { %4195 = vrcp.f32 %v2830_v51  ;;  %v2842_v42 = vand.u32 2147483648, %v2830_v51  ;;  %vm2836_vm7 = vweird.f32 %v2830_v51  ;;  %v2840_v46 = vand.u32 2147483647, %v2830_v51 }
0x2160   : > { %v2921_v62 = vmul.f32 %v4192_v11, %v2920_v33 }
0x2161   : > { %v2843_v34 = vor.u32 1.1754944e-38, %v2842_v42  ;;  %vm2841_vm9 = vcmp.eq.f32.partialorder %v2840_v46, 8.507059e+37 }
0x2162   : > { %v2922_v52 = vadd.f32 %v4192_v11, %v2921_v62 }
0x2164   : > { %v2926_v2 = vsel %vm2925_vm4, %v4192_v11, %v2922_v52 }
0x2165   : > { %v4196_v53 = vpop.eup %4195  ;;  %v2931_v55 = vsel %vm2928_vm0, %v2930_v4, %v2926_v2 }
0x2166   : > { %v2832_v54 = vmul.f32 %v4196_v53, %v2830_v51  ;;  %vm2837_vm6 = vweird.f32 %v4196_v53  ;;  %v2933_v37 = vmul.f32 %v2931_v55, %v5524_v40 }
0x2167   : > { %vm2838_vm8 = vmor %vm2836_vm7, %vm2837_vm6 }
0x2168   : > { %v2833_v0 = vsub.f32 1.0, %v2832_v54 }
0x216a   : > { %v2834_v43 = vmul.f32 %v4196_v53, %v2833_v0 }
0x216c   : > { %v2835_v3 = vadd.f32 %v4196_v53, %v2834_v43 }
0x216e   : > { %v2839_v6 = vsel %vm2838_vm8, %v4196_v53, %v2835_v3 }
0x216f   : > { %v2844_v59 = vsel %vm2841_vm9, %v2843_v34, %v2839_v6 }
0x2170   : > { %v2846_v44 = vmul.f32 %v2844_v59, %v5529_v45 }
0x219a   : > { %v2936_v56 = vpop.permute.xlu0 %2935 }
0x219b   : > { %v2938_v57 = vmul.f32 %v2936_v56, %v2931_v55 }
0x219d   : > { %2940 = vrot.lane.b32.xlu2 %v2938_v57, %s4573_s22 }
0x21ac   : > { %v2849_v36 = vpop.permute.xlu2 %2848 }
0x21ad   : > { %v2851_v60 = vmul.f32 %v2849_v36, %v2844_v59 }
0x21af   : > { %2853 = vrot.lane.b32.xlu1 %v2851_v60, %s4573_s22 }
0x21f7   : > { %v2941_v38 = vpop.permute.xlu2 %2940 }
0x21f8   : > { %v5559_v5 = vadd.f32 %v2941_v38, %v2933_v37 }
0x21fa   : > { %4197 = vtanh.f32 %v5559_v5 }
0x2200   : > { %v4198_v41 = vpop.eup %4197 }
0x2201   : > { %2946 = vrot.lane.b32.xlu1 %v4198_v41, %s4571_s19 }
0x2221   : > { %v2854_v47 = vpop.permute.xlu1 %2853 }
0x2222   : > { %v5564_v48 = vadd.f32 %v2854_v47, %v2846_v44 }
0x2224   : > { %4199 = vtanh.f32 %v5564_v48 }
0x222a   : > { %v4200_v39 = vpop.eup %4199 }
0x222b   : > { %2859 = vrot.lane.b32.xlu0 %v4200_v39, %s4571_s19 }
0x2273   : > { %v2947_v40 = vpop.permute.xlu1 %2946 }
0x2274   : > { %v2949_v27 = vmul.f32 %v2947_v40, %v2931_v55 }
0x2276   : > { %2973 = vrot.lane.b32.xlu0 %v2949_v27, %s4572_s27 }
0x229d   : > { %v2860_v58 = vpop.permute.xlu0 %2859 }
0x229e   : > { %v2862_v50 = vmul.f32 %v2860_v58, %v2844_v59 }
0x22a0   : > { %2864 = vrot.lane.b32.xlu2 %v2862_v50, %s4572_s27 }
0x22e8   : > { %v2974_v61 = vpop.permute.xlu0 %2973 }
0x22e9   : > { %3832 = vmatmul.msk.f32.vlgmr.msrb.gmra.mxu3 %vm1989_vm13, %v2974_v61  ;;  %3835 = vmatmul.msk.f32.vlgmr.msra.gmra.mxu0 %vm1989_vm13, %v2974_v61 }
0x22ea   : > { %3333 = vmatpush.msrb.mxu3 %v4902_v15  ;;  %v3081_v15 = vpop.f32.mrf.mxu1 }
0x22ec   : > { %3334 = vmatpush.msrb.mxu3 %v4899_v14 }
0x22ee   : > { %3335 = vmatpush.msrb.mxu3 %v4896_v13 }
0x22f0   : > { %3336 = vmatpush.msrb.mxu3 %v4893_v12 }
0x22fa   : > { %v2865_v45 = vpop.permute.xlu2 %2864 }
0x22fb   : > { %3827 = vst.msk [vmem:[%s4952_s20 + $0x6] sm:$0x3] %vm2179_vm5, %v2865_v45  ;;  %3831 = vmatmul.msk.f32.vlgmr.msrb.gmra.mxu2 %vm1989_vm13, %v2865_v45 }
0x22fc   : > { %3308 = vmatpush.msrb.mxu2 %v4928_v24 }
0x22fe   : > { %3309 = vmatpush.msrb.mxu2 %v4925_v23 }
0x2300   : > { %3310 = vmatpush.msrb.mxu2 %v4922_v22 }
0x2302   : > { %3311 = vmatpush.msrb.mxu2 %v4917_v20 }
0x2366   : > { %v3058_v18 = vpop.f32.mrf.mxu0 }
0x2367   : > { %v3082_v14 = vadd.f32 %v3081_v15, %v3058_v18 }
0x2369   : > { %v3084_v13 = vadd.f32 %v3082_v14, %v5380_v28 }
0x236b   : > { %4201 = vtanh.f32 %v3084_v13  ;;  %v3837_v22 = vmul.f32 -1.442695, %v3084_v13 }
0x236c   : > { %v2994_v19 = vpop.f32.mrf.mxu3 }
0x2371   : > { %v4202_v12 = vpop.eup %4201 }
0x2372   : > { %3107 = vrot.lane.b32.xlu2 %v4202_v12, %s4571_s19 }
0x237e   : > { %v2969_v17 = vpop.f32.mrf.mxu2 }
0x237f   : > { %v2995_v49 = vadd.f32 %v2994_v19, %v2969_v17 }
0x2381   : > { %v2997_v24 = vadd.f32 %v2995_v49, %v5412_v8 }
0x2383   : > { %4203 = vtanh.f32 %v2997_v24  ;;  %v3833_v33 = vmul.f32 -1.442695, %v2997_v24 }
0x2384   : > { %4205 = vpow2.f32 %v3837_v22 }
0x2389   : > { %v4204_v23 = vpop.eup %4203 }
0x238a   : > { %3020 = vrot.lane.b32.xlu1 %v4204_v23, %s4571_s19  ;;  %v4206_v20 = vpop.eup %4205 }
0x238b   : > { %v3089_v16 = vadd.f32 1.0, %v4206_v20 }
0x238d   : > { %4207 = vrcp.f32 %v3089_v16  ;;  %v3101_v25 = vand.u32 2147483648, %v3089_v16  ;;  %vm3095_vm11 = vweird.f32 %v3089_v16  ;;  %v3099_v10 = vand.u32 2147483647, %v3089_v16 }
0x238e   : > { %4209 = vpow2.f32 %v3833_v33 }
0x238f   : > { %v3102_v9 = vor.u32 1.1754944e-38, %v3101_v25  ;;  %vm3100_vm14 = vcmp.eq.f32.partialorder %v3099_v10, 8.507059e+37 }
0x2393   : > { %v4208_v63 = vpop.eup %4207 }
0x2394   : > { %v3091_v29 = vmul.f32 %v4208_v63, %v3089_v16  ;;  %vm3096_vm10 = vweird.f32 %v4208_v63  ;;  %v4210_v51 = vpop.eup %4209 }
0x2395   : > { %vm3097_vm12 = vmor %vm3095_vm11, %vm3096_vm10  ;;  %v3002_v62 = vadd.f32 1.0, %v4210_v51 }
0x2396   : > { %v3092_v30 = vsub.f32 1.0, %v3091_v29 }
0x2397   : > { %4211 = vrcp.f32 %v3002_v62  ;;  %v3014_v4 = vand.u32 2147483648, %v3002_v62  ;;  %vm3008_vm1 = vweird.f32 %v3002_v62  ;;  %v3012_v54 = vand.u32 2147483647, %v3002_v62 }
0x2398   : > { %v3093_v31 = vmul.f32 %v4208_v63, %v3092_v30 }
0x2399   : > { %v3015_v56 = vor.u32 1.1754944e-38, %v3014_v4  ;;  %vm3013_vm3 = vcmp.eq.f32.partialorder %v3012_v54, 8.507059e+37 }
0x239a   : > { %v3094_v32 = vadd.f32 %v4208_v63, %v3093_v31 }
0x239c   : > { %v3098_v7 = vsel %vm3097_vm12, %v4208_v63, %v3094_v32 }
0x239d   : > { %v3103_v11 = vsel %vm3100_vm14, %v3102_v9, %v3098_v7  ;;  %v4212_v52 = vpop.eup %4211 }
0x239e   : > { %v3004_v35 = vmul.f32 %v4212_v52, %v3002_v62  ;;  %vm3009_vm15 = vweird.f32 %v4212_v52  ;;  %v3105_v3 = vmul.f32 %v3103_v11, %v5559_v5 }
0x239f   : > { %vm3010_vm2 = vmor %vm3008_vm1, %vm3009_vm15 }
0x23a0   : > { %v3005_v1 = vsub.f32 1.0, %v3004_v35 }
0x23a2   : > { %v3006_v53 = vmul.f32 %v4212_v52, %v3005_v1 }
0x23a4   : > { %v3007_v2 = vadd.f32 %v4212_v52, %v3006_v53 }
0x23a6   : > { %v3011_v55 = vsel %vm3010_vm2, %v4212_v52, %v3007_v2 }
0x23a7   : > { %v3016_v57 = vsel %vm3013_vm3, %v3015_v56, %v3011_v55 }
0x23a8   : > { %v3018_v34 = vmul.f32 %v3016_v57, %v5564_v48  ;;  %v3253_v48 = vpop.f32.mrf.mxu1 }
0x23cc   : > { %v3108_v21 = vpop.permute.xlu2 %3107 }
0x23cd   : > { %v3110_v26 = vmul.f32 %v3108_v21, %v3103_v11 }
0x23cf   : > { %3112 = vrot.lane.b32.xlu1 %v3110_v26, %s4573_s22 }
0x23fc   : > { %v3021_v0 = vpop.permute.xlu1 %3020 }
0x23fd   : > { %v3023_v43 = vmul.f32 %v3021_v0, %v3016_v57 }
0x23ff   : > { %3025 = vrot.lane.b32.xlu0 %v3023_v43, %s4573_s22 }
0x2441   : > { %v3113_v42 = vpop.permute.xlu1 %3112 }
0x2442   : > { %v5590_v46 = vadd.f32 %v3113_v42, %v3105_v3 }
0x2444   : > { %4213 = vtanh.f32 %v5590_v46 }
0x244a   : > { %v4214_v6 = vpop.eup %4213 }
0x244b   : > { %3118 = vrot.lane.b32.xlu0 %v4214_v6, %s4571_s19 }
0x2471   : > { %v3026_v59 = vpop.permute.xlu0 %3025 }
0x2472   : > { %v5595_v36 = vadd.f32 %v3026_v59, %v3018_v34 }
0x2474   : > { %4215 = vtanh.f32 %v5595_v36 }
0x247a   : > { %v4216_v60 = vpop.eup %4215 }
0x247b   : > { %3031 = vrot.lane.b32.xlu2 %v4216_v60, %s4571_s19 }
0x24bd   : > { %v3119_v37 = vpop.permute.xlu0 %3118 }
0x24be   : > { %v3121_v38 = vmul.f32 %v3119_v37, %v3103_v11 }
0x24c0   : > { %3145 = vrot.lane.b32.xlu2 %v3121_v38, %s4572_s27 }
0x24d5   : > { %v3032_v5 = vpop.permute.xlu2 %3031 }
0x24d6   : > { %v3034_v41 = vmul.f32 %v3032_v5, %v3016_v57 }
0x24d8   : > { %3036 = vrot.lane.b32.xlu1 %v3034_v41, %s4572_s27 }
0x251a   : > { %v3146_v44 = vpop.permute.xlu2 %3145 }
0x251b   : > { %3839 = vmatmul.msk.f32.vlgmr.msra.gmra.mxu3 %vm1989_vm13, %v3146_v44  ;;  %3842 = vmatmul.msk.f32.vlgmr.msrb.gmra.mxu0 %vm1989_vm13, %v3146_v44 }
0x254a   : > { %v3037_v47 = vpop.permute.xlu1 %3036 }
0x254b   : > { %3834 = vst.msk [vmem:[%s4952_s20 + $0x4] sm:$0x3] %vm2179_vm5, %v3037_v47  ;;  %3838 = vmatmul.msk.f32.vlgmr.msra.gmra.mxu2 %vm1989_vm13, %v3037_v47 }
0x2598   : > { %v3230_v39 = vpop.f32.mrf.mxu0 }
0x2599   : > { %v3254_v40 = vadd.f32 %v3253_v48, %v3230_v39 }
0x259b   : > { %v3256_v27 = vadd.f32 %v3254_v40, %v5380_v28 }
0x259d   : > { %4217 = vtanh.f32 %v3256_v27  ;;  %v3844_v14 = vmul.f32 -1.442695, %v3256_v27 }
0x259e   : > { %v3166_v50 = vpop.f32.mrf.mxu3 }
0x25a3   : > { %v4218_v58 = vpop.eup %4217 }
0x25a4   : > { %3279 = vrot.lane.b32.xlu1 %v4218_v58, %s4571_s19 }
0x25ce   : > { %v3141_v61 = vpop.f32.mrf.mxu2 }
0x25cf   : > { %v3167_v45 = vadd.f32 %v3166_v50, %v3141_v61 }
0x25d1   : > { %v3169_v15 = vadd.f32 %v3167_v45, %v5412_v8 }
0x25d3   : > { %4219 = vtanh.f32 %v3169_v15  ;;  %v3840_v31 = vmul.f32 -1.442695, %v3169_v15 }
0x25d4   : > { %4221 = vpow2.f32 %v3844_v14 }
0x25d9   : > { %v4220_v18 = vpop.eup %4219 }
0x25da   : > { %3192 = vrot.lane.b32.xlu0 %v4220_v18, %s4571_s19  ;;  %v4222_v13 = vpop.eup %4221 }
0x25db   : > { %v3261_v12 = vadd.f32 1.0, %v4222_v13 }
0x25dd   : > { %4223 = vrcp.f32 %v3261_v12  ;;  %v3273_v23 = vand.u32 2147483648, %v3261_v12  ;;  %vm3267_vm0 = vweird.f32 %v3261_v12  ;;  %v3271_v22 = vand.u32 2147483647, %v3261_v12 }
0x25de   : > { %4225 = vpow2.f32 %v3840_v31 }
0x25df   : > { %v3274_v16 = vor.u32 1.1754944e-38, %v3273_v23  ;;  %vm3272_vm7 = vcmp.eq.f32.partialorder %v3271_v22, 8.507059e+37 }
0x25e3   : > { %v4224_v19 = vpop.eup %4223 }
0x25e4   : > { %v3263_v28 = vmul.f32 %v4224_v19, %v3261_v12  ;;  %vm3268_vm4 = vweird.f32 %v4224_v19  ;;  %v4226_v32 = vpop.eup %4225 }
0x25e5   : > { %vm3269_vm6 = vmor %vm3267_vm0, %vm3268_vm4  ;;  %v3174_v25 = vadd.f32 1.0, %v4226_v32 }
0x25e6   : > { %v3264_v17 = vsub.f32 1.0, %v3263_v28 }
0x25e7   : > { %4227 = vrcp.f32 %v3174_v25  ;;  %v3186_v26 = vand.u32 2147483648, %v3174_v25  ;;  %vm3180_vm9 = vweird.f32 %v3174_v25  ;;  %v3184_v33 = vand.u32 2147483647, %v3174_v25 }
0x25e8   : > { %v3265_v49 = vmul.f32 %v4224_v19, %v3264_v17 }
0x25e9   : > { %v3187_v62 = vor.u32 1.1754944e-38, %v3186_v26  ;;  %vm3185_vm11 = vcmp.eq.f32.partialorder %v3184_v33, 8.507059e+37 }
0x25ea   : > { %v3266_v24 = vadd.f32 %v4224_v19, %v3265_v49 }
0x25ec   : > { %v3270_v20 = vsel %vm3269_vm6, %v4224_v19, %v3266_v24 }
0x25ed   : > { %v3275_v63 = vsel %vm3272_vm7, %v3274_v16, %v3270_v20  ;;  %v4228_v10 = vpop.eup %4227 }
0x25ee   : > { %v3176_v7 = vmul.f32 %v4228_v10, %v3174_v25  ;;  %vm3181_vm8 = vweird.f32 %v4228_v10  ;;  %v3277_v53 = vmul.f32 %v3275_v63, %v5590_v46 }
0x25ef   : > { %vm3182_vm10 = vmor %vm3180_vm9, %vm3181_vm8 }
0x25f0   : > { %v3177_v9 = vsub.f32 1.0, %v3176_v7 }
0x25f2   : > { %v3178_v11 = vmul.f32 %v4228_v10, %v3177_v9 }
0x25f4   : > { %v3179_v21 = vadd.f32 %v4228_v10, %v3178_v11 }
0x25f6   : > { %v3183_v51 = vsel %vm3182_vm10, %v4228_v10, %v3179_v21 }
0x25f7   : > { %v3188_v52 = vsel %vm3185_vm11, %v3187_v62, %v3183_v51 }
0x25f8   : > { %v3190_v55 = vmul.f32 %v3188_v52, %v5595_v36 }
0x2616   : > { %v3280_v29 = vpop.permute.xlu1 %3279 }
0x2617   : > { %v3282_v30 = vmul.f32 %v3280_v29, %v3275_v63 }
0x2619   : > { %3284 = vrot.lane.b32.xlu0 %v3282_v30, %s4573_s22 }
0x264c   : > { %v3193_v35 = vpop.permute.xlu0 %3192 }
0x264d   : > { %v3195_v1 = vmul.f32 %v3193_v35, %v3188_v52 }
0x264f   : > { %3197 = vrot.lane.b32.xlu2 %v3195_v1, %s4573_s22 }
0x268b   : > { %v3285_v2 = vpop.permute.xlu0 %3284 }
0x268c   : > { %v3287_v4 = vadd.f32 %v3285_v2, %v3277_v53 }
0x268e   : > { %4229 = vtanh.f32 %v3287_v4 }
0x2694   : > { %v4230_v54 = vpop.eup %4229 }
0x2695   : > { %3290 = vrot.lane.b32.xlu2 %v4230_v54, %s4571_s19 }
0x26a9   : > { %v3198_v56 = vpop.permute.xlu2 %3197 }
0x26aa   : > { %v3200_v57 = vadd.f32 %v3198_v56, %v3190_v55 }
0x26ac   : > { %4231 = vtanh.f32 %v3200_v57 }
0x26b2   : > { %v4232_v0 = vpop.eup %4231 }
0x26b3   : > { %3203 = vrot.lane.b32.xlu1 %v4232_v0, %s4571_s19 }
0x26ef   : > { %v3291_v43 = vpop.permute.xlu2 %3290 }
0x26f0   : > { %v3293_v3 = vmul.f32 %v3291_v43, %v3275_v63 }
0x26f2   : > { %3317 = vrot.lane.b32.xlu1 %v3293_v3, %s4572_s27 }
0x2725   : > { %v3204_v42 = vpop.permute.xlu1 %3203 }
0x2726   : > { %v3206_v46 = vmul.f32 %v3204_v42, %v3188_v52 }
0x2728   : > { %3208 = vrot.lane.b32.xlu0 %v3206_v46, %s4572_s27 }
0x2764   : > { %v3318_v6 = vpop.permute.xlu1 %3317 }
0x2765   : > { %3385 = vst.msk [vmem:[%s4955_s25] sm:$0x3] %vm2179_vm5, %v3318_v6  ;;  %3846 = vmatmul.msk.f32.vlgmr.msrb.gmra.mxu3 %vm1989_vm13, %v3318_v6 }
0x279a   : > { %v3209_v34 = vpop.permute.xlu0 %3208 }
0x279b   : > { %3841 = vst.msk [vmem:[%s4952_s20 + $0x2] sm:$0x3] %vm2179_vm5, %v3209_v34  ;;  %3845 = vmatmul.msk.f32.vlgmr.msrb.gmra.mxu2 %vm1989_vm13, %v3209_v34 }
0x27e8   : > { %v3338_v59 = vpop.f32.mrf.mxu3 }
0x281e   : > { %v3313_v36 = vpop.f32.mrf.mxu2 }
0x281f   : > { %v3339_v60 = vadd.f32 %v3338_v59, %v3313_v36 }
0x2821   : > { %v3341_v37 = vadd.f32 %v3339_v60, %v5412_v8 }
0x2823   : > { %4233 = vtanh.f32 %v3341_v37  ;;  %v3847_v5 = vmul.f32 -1.442695, %v3341_v37 }
0x2825   : > { %4235 = vpow2.f32 %v3847_v5 }
0x2829   : > { %v4234_v38 = vpop.eup %4233 }
0x282a   : > { %3364 = vrot.lane.b32.xlu2 %v4234_v38, %s4571_s19 }
0x282b   : > { %v4236_v41 = vpop.eup %4235 }
0x282c   : > { %v3346_v44 = vadd.f32 1.0, %v4236_v41 }
0x282e   : > { %4237 = vrcp.f32 %v3346_v44  ;;  %v3358_v58 = vand.u32 2147483648, %v3346_v44  ;;  %vm3352_vm12 = vweird.f32 %v3346_v44  ;;  %v3356_v50 = vand.u32 2147483647, %v3346_v44 }
0x2830   : > { %v3359_v61 = vor.u32 1.1754944e-38, %v3358_v58  ;;  %vm3357_vm15 = vcmp.eq.f32.partialorder %v3356_v50, 8.507059e+37 }
0x2834   : > { %v4238_v47 = vpop.eup %4237 }
0x2835   : > { %v3348_v48 = vmul.f32 %v4238_v47, %v3346_v44  ;;  %vm3353_vm13 = vweird.f32 %v4238_v47 }
0x2836   : > { %vm3354_vm14 = vmor %vm3352_vm12, %vm3353_vm13 }
0x2837   : > { %v3349_v39 = vsub.f32 1.0, %v3348_v48 }
0x2839   : > { %v3350_v40 = vmul.f32 %v4238_v47, %v3349_v39 }
0x283b   : > { %v3351_v27 = vadd.f32 %v4238_v47, %v3350_v40 }
0x283d   : > { %v3355_v8 = vsel %vm3354_vm14, %v4238_v47, %v3351_v27 }
0x283e   : > { %v3360_v45 = vsel %vm3357_vm15, %v3359_v61, %v3355_v8 }
0x283f   : > { %v3362_v14 = vmul.f32 %v3360_v45, %v3200_v57 }
0x2884   : > { %v3365_v15 = vpop.permute.xlu2 %3364 }
0x2885   : > { %v3367_v18 = vmul.f32 %v3365_v15, %v3360_v45 }
0x2887   : > { %3369 = vrot.lane.b32.xlu0 %v3367_v18, %s4573_s22 }
0x288f   : > { %3387 = vrot.lane.b32.xlu0 %v3287_v4, %s4573_s22 }
0x28f9   : > { %v3370_v13 = vpop.permute.xlu0 %3369 }
0x28fa   : > { %v3372_v12 = vadd.f32 %v3370_v13, %v3362_v14 }
0x28fc   : > { %4239 = vtanh.f32 %v3372_v12 }
0x2901   : > { %v3388_v19 = vpop.permute.xlu0 %3387 }
0x2902   : > { %v4240_v28 = vpop.eup %4239  ;;  %3390 = vst.msk [vmem:[%s4958_s26] sm:$0x3] %vm2179_vm5, %v3388_v19 }
0x2903   : > { %3375 = vrot.lane.b32.xlu1 %v4240_v28, %s4571_s19 }
0x290b   : > { %3394 = vrot.lane.b32.xlu1 %v3372_v12, %s4573_s22 }
0x2975   : > { %v3376_v17 = vpop.permute.xlu1 %3375 }
0x2976   : > { %v3378_v49 = vmul.f32 %v3376_v17, %v3360_v45 }
0x2978   : > { %3380 = vrot.lane.b32.xlu2 %v3378_v49, %s4572_s27 }
0x297d   : > { %v3395_v24 = vpop.permute.xlu1 %3394 }
0x297e   : > { %3849 = vst.msk [vmem:[%s4958_s26 + $0x2] sm:$0x3] %vm2179_vm5, %v3395_v24 }
0x29d2   : > { %v3381_v23 = vpop.permute.xlu2 %3380 }
0x29d3   : > { %3383 = vst.msk [vmem:[%s4952_s20] sm:$0x3] %vm2179_vm5, %v3381_v23 }
0x29d4   : > { %3848 = vst.msk [vmem:[%s4955_s25 + $0x2] sm:$0x3] %vm2179_vm5, %v3381_v23 }
0x29d5 PF: > { %s3866_s21 = sshll.u32 %s4729_s13, 2  ;;  %s5779_s15 = sld [smem:[#allocation33_spill]] }
0x29d6   : > { %s3439_s1 = sshll.u32 %s4955_s25, 4  ;;  %s5780_s2 = sld [smem:[#allocation34_spill]]  ;;  %s3440_s1 = int_to_ptr.vmem [resolvable:$true] %s3439_s1 }
0x29d7   : > { %s3405_s9 = scalar_lea.sflag [#allocation15], %s4842_s14 }
0x29db   : > { %s3438_s3 = scalar_lea.hbm %s5779_s15, %s3866_s21  ;;  %s4441_s25 = scalar_lea.hbm %s5779_s15, 8 }
0x29dc   : > { %s3441_s17 = sshll.u32 %s3438_s3, 4  ;;  %s5647_s8 = scalar_lea.hbm %s5780_s2, %s3866_s21  ;;  %s3442_s17 = int_to_ptr.hbm [resolvable:$true] %s3441_s17 }
0x29dd   : > { %s4435_s12 = sshra.s32 %s3442_s17, 4  ;;  %s4436_s12 = int_to_ptr.hbm [resolvable:$true] %s4435_s12 }
0x29de   : > { %s4437_s7 = scalar_lea.hbm %s4436_s12, 4  ;;  %p4442_p11 = scmp.lt.s32.totalorder %s4436_s12, %s5779_s15 }
0x29df   : > { %p4438_p5 = scmp.ne.s32.totalorder %s4436_s12, %s4437_s7  ;;  %p4443_p1 = scmp.lt.s32.totalorder %s4441_s25, %s4437_s7 }
0x29e1   : > { %p4439_p0 = pnand %p4438_p5, %p4748_p7  ;;  %p4444_p12 = por %p4443_p1, %p4442_p11 }
0x29e3   : > { %p4440_p13 = pneg %p4439_p0 }
0x29e5   : > { %p4445_p2 = pnand %p4444_p12, %p4440_p13 }
0x29e7   : > { %4448 = shalt.err (!%p4445_p2)
}
0x29e8   : > { %s4574_s27 = smov 32   ;;  %s4575_s22 = smov 2  }
0x29e9   : > { %3883 = dma.vmem_to_hbm [thread:$0]  (%p4748_p7), %s3440_s1, 64, %s3442_s17, %s3405_s9, %s4574_s27, %s4574_s27, %s4575_s22  }
0x29ea   : > { %s3458_s21 = sshll.u32 %s5647_s8, 4  ;;  %s3865_s0 = sshll.u32 %s4729_s13, 4  ;;  %s3459_s21 = int_to_ptr.hbm [resolvable:$true] %s3458_s21 }
0x29eb   : > { %s3422_s18 = sshll.u32 %s4952_s20, 4  ;;  %s5781_s16 = sld [smem:[#allocation32_spill]]  ;;  %s3423_s18 = int_to_ptr.vmem [resolvable:$true] %s3422_s18 }
0x29ec   : > { %s3456_s24 = sshll.u32 %s4958_s26, 4  ;;  %s3400_s29 = scalar_lea.sflag [#allocation4], %s4845_s23  ;;  %s5672_s24 = int_to_ptr.vmem [resolvable:$true] %s3456_s24 }
0x29f1   : > { %s3421_s12 = scalar_lea.hbm %s5781_s16, %s3865_s0  ;;  %s4469_s1 = scalar_lea.hbm %s5781_s16, 32 }
0x29f2   : > { %s3424_s7 = sshll.u32 %s3421_s12, 4  ;;  %s3425_s7 = int_to_ptr.hbm [resolvable:$true] %s3424_s7 }
0x29f3   : > { %s4463_s25 = sshra.s32 %s3425_s7, 4  ;;  %s4464_s25 = int_to_ptr.hbm [resolvable:$true] %s4463_s25 }
0x29f4   : > { %s4465_s10 = scalar_lea.hbm %s4464_s25, 16  ;;  %p4470_p3 = scmp.lt.s32.totalorder %s4464_s25, %s5781_s16 }
0x29f5   : > { %p4466_p4 = scmp.ne.s32.totalorder %s4464_s25, %s4465_s10  ;;  %p4471_p6 = scmp.lt.s32.totalorder %s4469_s1, %s4465_s10 }
0x29f7   : > { %p4467_p8 = pnand %p4466_p4, %p4748_p7  ;;  %p4472_p5 = por %p4471_p6, %p4470_p3 }
0x29f9   : > { %p4468_p10 = pneg %p4467_p8 }
0x29fb   : > { %p4473_p0 = pnand %p4472_p5, %p4468_p10 }
0x29fd   : > { %4476 = shalt.err (!%p4473_p0)
}
0x29fe   : > { %3882 = dma.vmem_to_hbm [thread:$0]  (%p4748_p7), %s3423_s18, 256, %s3425_s7, %s3400_s29, %s4574_s27, %s4574_s27, %s4575_s22  }
0x29ff   : > { %s4491_s23 = sshra.s32 %s3459_s21, 4  ;;  %s4497_s3 = scalar_lea.hbm %s5780_s2, 8  ;;  %s4492_s23 = int_to_ptr.hbm [resolvable:$true] %s4491_s23 }
0x2a00   : > { %s4493_s26 = scalar_lea.hbm %s4492_s23, 4  ;;  %p4498_p12 = scmp.lt.s32.totalorder %s4492_s23, %s5780_s2 }
0x2a01   : > { %p4494_p13 = scmp.ne.s32.totalorder %s4492_s23, %s4493_s26  ;;  %p4499_p2 = scmp.lt.s32.totalorder %s4497_s3, %s4493_s26 }
0x2a03   : > { %p4495_p11 = pnand %p4494_p13, %p4748_p7  ;;  %p4500_p4 = por %p4499_p2, %p4498_p12 }
0x2a05   : > { %p4496_p1 = pneg %p4495_p11 }
0x2a07   : > { %p4501_p8 = pnand %p4500_p4, %p4496_p1 }
0x2a09   : > { %4504 = shalt.err (!%p4501_p8)
}
0x2a0a   : > { %3884 = dma.vmem_to_hbm [thread:$0]  (%p4748_p7), %s5672_s24, 64, %s3459_s21, %s3405_s9, %s4574_s27, %s4574_s27, %s4575_s22  }
0x2a0b PF: > { %s5782_s18 = sld [smem:[#allocation23_spill]]  ;;  %p5784_p10 = scmp.ge.s32.totalorder %s4559_s30, 2 }
0x2a0d   : > { %p3909_p3 = pnand %p5784_p10, %p4752_p9 }
0x2a0f   : > { %p3910_p6 = pneg %p3909_p3 }
0x2a11   : > { %s3473_s29 = sand.u32 1, %s5782_s18  }
0x2a12   : > { %s3474_s25 = scalar_lea.sflag [#allocation4], %s3473_s29 }
0x2a13   : > { %4538 = dma.done.wait (%p3910_p6), %s3474_s25, 256  }
0x2a14   : > { %4540 = vsyncadd (%p3910_p6), %s3474_s25, 4294967040  ;;  %s5785_s6 = sadd.s32 4294967294, %s4559_s30  }
0x2a15   : > { %s3483_s10 = sand.u32 1, %s5785_s6  }
0x2a16   : > { %s3484_s13 = scalar_lea.sflag [#allocation15], %s3483_s10 }
0x2a17   : > { %4542 = dma.done.wait (%p3910_p6), %s3484_s13, 128  }
0x2a18   : > { %4544 = vsyncadd (%p3910_p6), %s3484_s13, 4294967168  ;;  %s5786_s30 = sld [smem:[#allocation25_spill]]  ;;  %s5789_s27 = smov %s4551_s28 }
0x2a19   : > { %s5787_s14 = sld [smem:[#allocation24_spill]] }
0x2a1a   : > { %s5788_s29 = sld [smem:[#allocation26_spill]] }
0x2a1e   : > { %p32_p7 = scmp.ge.s32.totalorder %s5786_s30, 4  }
0x2a1f   : > { %s5790_s28 = smov %s5787_s14 }
0x2a20   :  { %34 = sbr.rel (!%p32_p7) target bundleno = 20 (0x14), region = 207 }
0x2a25   :  { %3500 = vsyncpa [#allocation3], 1 }
0x2a26   :  { %3502 = vsyncpa [#allocation3 + $0x1], 1 }
0x2a27   :  { %3503 = vsyncpa [#allocation6], 1 }
0x2a28   :  { %3505 = vsyncpa [#allocation6 + $0x1], 1 }
0x2a29   :  { %3506 = vsyncpa [#allocation9], 1 }
0x2a2a   :  { %3508 = vsyncpa [#allocation9 + $0x1], 1 }
0x2a2b   :  { %3509 = vsyncpa [#allocation12], 1 }
0x2a2c   :  { %3511 = vsyncpa [#allocation12 + $0x1], 1 }
0x2a2d   :  { %3512 = vsyncpa [#allocation4], 1 }
0x2a2e   :  { %3514 = vsyncpa [#allocation4 + $0x1], 1 }
0x2a2f   :  { %3515 = vsyncpa [#allocation15], 1 }
0x2a30   :  { %3517 = vsyncpa [#allocation15 + $0x1], 1 }

</bundles_post_ra>
